<compile_context>
chip_gen: v5e
topology: v5e:2x2
jax: 0.10.0
libtpu: 0.0.40
codegen_flags: <defaults>
</compile_context>

<pallas_src>
import functools

import jax
import jax.numpy as jnp
from jax.experimental import pallas as pl
from jax.experimental.pallas import tpu as pltpu


def _temporal_attn_kernel(x_ref, pe_ref, mask_ref,
                          we_ref, be_ref,
                          wqkv_ref, bqkv_ref,
                          wo_ref, bo_ref,
                          o_ref,
                          *, group, pack, num_heads, hidden_size):
    G, P, nh, H = group, pack, num_heads, hidden_size
    T = pe_ref.shape[0]
    HH = nh * H
    D = x_ref.shape[-1]

    # ---- encoder + positional encoding: all G slabs as one (G*T, .) GEMM ----
    x = x_ref[...].reshape(G * T, D).astype(jnp.bfloat16)
    h = jnp.dot(x, we_ref[...], preferred_element_type=jnp.float32) + be_ref[0]
    h = (h.reshape(G, T, H) + pe_ref[...]).reshape(G * T, H)          # add PE per slab

    # ---- fused Q/K/V projection: one GEMM with N = 3*nh*H (1/scale pre-folded) ----
    qkv = jnp.dot(h.astype(jnp.bfloat16), wqkv_ref[...],
                  preferred_element_type=jnp.float32) + bqkv_ref[0]
    qkv = qkv.reshape(G, T, 3 * HH)

    # ---- head-batched attention: batch dim = nh*G (no per-head Python matmul loop) ----
    q = jnp.concatenate([qkv[:, :, i * H:(i + 1) * H] for i in range(nh)], axis=0)
    k = jnp.concatenate([qkv[:, :, HH + i * H:HH + (i + 1) * H] for i in range(nh)], axis=0)
    v = jnp.concatenate([qkv[:, :, 2 * HH + i * H:2 * HH + (i + 1) * H] for i in range(nh)], axis=0)

    s = jnp.einsum('btd,bsd->bts', q.astype(jnp.bfloat16), k.astype(jnp.bfloat16),
                   preferred_element_type=jnp.float32)                # (nh*G, T, T)
    s = s + mask_ref[...]                                             # additive causal bias (0 / -1e30)
    s = s - jnp.max(s, axis=-1, keepdims=True)
    p = jnp.exp(s)
    p = p * pl.reciprocal(jnp.sum(p, axis=-1, keepdims=True), approx=True)
    o = jnp.einsum('bts,bsd->btd', p.astype(jnp.bfloat16), v.astype(jnp.bfloat16),
                   preferred_element_type=jnp.float32)                # (nh*G, T, H)

    # ---- concat heads back to (G*T, nh*H) and apply the output projection ----
    cat = jnp.concatenate([o[i * G:(i + 1) * G] for i in range(nh)], axis=-1)   # (G, T, nh*H)
    cat = cat.reshape(G * T, HH).astype(jnp.bfloat16)
    out = jnp.dot(cat, wo_ref[...], preferred_element_type=jnp.float32) + bo_ref[0]   # (G*T, H)

    # ---- lane-dense store: pack P consecutive slabs along the last dim (P*H lanes) ----
    out4 = out.reshape(G // P, P, T, H)
    packed = jnp.concatenate([out4[:, j] for j in range(P)], axis=-1)  # (G//P, T, P*H)
    o_ref[...] = packed.astype(o_ref.dtype)


def make_positional_encoding(T, H):
    pos = jnp.arange(T, dtype=jnp.float32)[:, None]
    div = jnp.exp(jnp.arange(0, H, 2, dtype=jnp.float32) * (-jnp.log(10000.0) / H))
    pe = jnp.zeros((T, H), dtype=jnp.float32)
    pe = pe.at[:, 0::2].set(jnp.sin(pos * div))
    pe = pe.at[:, 1::2].set(jnp.cos(pos * div))
    return pe


def init_params(key, input_size, hidden_size, num_heads):
    ks = jax.random.split(key, 10)
    s = 0.02
    H, nh = hidden_size, num_heads
    return dict(
        we=jax.random.normal(ks[0], (input_size, H), jnp.float32) * s,
        be=jax.random.normal(ks[1], (1, H), jnp.float32) * s,
        wq=jax.random.normal(ks[2], (H, H * nh), jnp.float32) * s,
        bq=jax.random.normal(ks[3], (1, H * nh), jnp.float32) * s,
        wk=jax.random.normal(ks[4], (H, H * nh), jnp.float32) * s,
        bk=jax.random.normal(ks[5], (1, H * nh), jnp.float32) * s,
        wv=jax.random.normal(ks[6], (H, H * nh), jnp.float32) * s,
        bv=jax.random.normal(ks[7], (1, H * nh), jnp.float32) * s,
        wo=jax.random.normal(ks[8], (H * nh, H), jnp.float32) * s,
        bo=jax.random.normal(ks[9], (1, H), jnp.float32) * s,
    )


def _pick_group_size(num_slabs, t, d, h, nh,
                     budget_bytes=6 * 1024 * 1024, max_group=64):
    """Largest divisor of num_slabs fitting a conservative VMEM activation budget.

    Budget is sized to fit v5e's 16 MiB scoped-VMEM default and v7x's 64 MiB physical
    VMEM; on v6e (128 MiB) budget_bytes/max_group can be raised (and vmem_limit_bytes
    set below).  Prefers >= 2 grid steps so both v7x TensorCores get work.
    """
    per_slab = 4 * t * (d + 2 * h + 2 * 3 * nh * h + 2 * nh * t + 2 * nh * h)
    cap = max(1, min(max_group, budget_bytes // max(per_slab, 1)))
    divs = [g for g in range(1, num_slabs + 1) if num_slabs % g == 0 and g <= cap]
    pref = [g for g in divs if num_slabs // g >= 2]
    return max(pref) if pref else max(divs)


def _pick_pack(group, h):
    """Largest divisor of `group` such that pack*h <= 128 lanes (lane-dense store)."""
    best = 1
    for p in range(1, group + 1):
        if group % p == 0 and p * h <= 128:
            best = p
    return best


def temporal_attention(x, params, *, hidden_size, num_heads, window_size):
    """x: (B, T, N, D_in) as in the PyTorch forward; returns (B, N, T, hidden)."""
    B, T, N, D = x.shape
    assert T == window_size
    H, nh = hidden_size, num_heads
    BN = B * N
    inv_scale = 1.0 / (float(H) ** 0.5)

    xp = jnp.transpose(x, (0, 2, 1, 3)).reshape(BN, T, D)             # (B*N, T, D)

    # Grid-invariant constants (precomputed once; no iota/where/divide inside the kernel).
    pe = make_positional_encoding(T, H)                               # (T, H)
    mask_bias = jnp.where(jnp.triu(jnp.ones((T, T), dtype=bool), k=1),
                          -1e30, 0.0).astype(jnp.float32)             # (T, T)

    # Fused QKV weight; fold 1/scale into the Q columns so the kernel never divides.
    wqkv = jnp.concatenate([params["wq"] * inv_scale, params["wk"], params["wv"]], axis=1)
    bqkv = jnp.concatenate([params["bq"] * inv_scale, params["bk"], params["bv"]], axis=1)

    # bf16 MXU path (accumulation stays f32 via preferred_element_type in the kernel).
    we = params["we"].astype(jnp.bfloat16)
    wqkv = wqkv.astype(jnp.bfloat16)
    wo = params["wo"].astype(jnp.bfloat16)
    be, bo = params["be"], params["bo"]

    G = _pick_group_size(BN, T, D, H, nh)                             # slabs per grid step
    P = _pick_pack(G, H)                                              # slabs packed per 128-lane store
    num_blocks = BN // G

    # Only override the scoped-VMEM default when a large G actually needs it.
    need = (2 * 4 * G * T * (D + H)                                   # double-buffered in/out blocks
            + 2 * 2 * (D * H + H * 3 * nh * H + nh * H * H)           # bf16 weights
            + 4 * G * T * (2 * H + 2 * 3 * nh * H + nh * T + nh * H)) # live activations (rough)
    vmem_limit = None
    if need > 12 * 1024 * 1024:
        vmem_limit = min(2 * need, 64 * 1024 * 1024)

    kernel = functools.partial(_temporal_attn_kernel,
                               group=G, pack=P, num_heads=nh, hidden_size=H)

    def const_spec(shape, mode):
        # Grid-invariant operand: constant index_map (+ single-buffering when supported).
        return pl.BlockSpec(shape, lambda i: (0,) * len(shape), pipeline_mode=mode)

    def run(weight_mode):
        return pl.pallas_call(
            kernel,
            out_shape=jax.ShapeDtypeStruct((BN // P, T, P * H), jnp.float32),
            grid_spec=pltpu.PrefetchScalarGridSpec(
                num_scalar_prefetch=0,
                grid=(num_blocks,),
                in_specs=[
                    pl.BlockSpec((G, T, D), lambda i: (i, 0, 0)),     # x slab block
                    const_spec((T, H), weight_mode),                  # pe
                    const_spec((T, T), weight_mode),                  # causal bias
                    const_spec((D, H), weight_mode),                  # encoder W
                    const_spec((1, H), weight_mode),                  # encoder b
                    const_spec((H, 3 * nh * H), weight_mode),         # fused QKV W
                    const_spec((1, 3 * nh * H), weight_mode),         # fused QKV b
                    const_spec((nh * H, H), weight_mode),             # out W
                    const_spec((1, H), weight_mode),                  # out b
                ],
                out_specs=pl.BlockSpec((G // P, T, P * H), lambda i: (i, 0, 0)),
            ),
            compiler_params=pltpu.CompilerParams(
                dimension_semantics=("parallel",),
                vmem_limit_bytes=vmem_limit),
        )(xp, pe, mask_bias, we, be, wqkv, bqkv, wo, bo)

    try:
        packed_out = run(pl.Buffered(1))      # single-buffer grid-invariant operands
    except Exception:
        packed_out = run(None)                # fallback if Buffered(1) is rejected

    # Undo the lane packing: (BN//P, T, P*H) -> (B, N, T, H).
    out = (packed_out.reshape(BN // P, T, P, H)
           .transpose(0, 2, 1, 3)
           .reshape(B, N, T, H))
    return out


def temporal_attention_ref(x, params, *, hidden_size, num_heads, window_size):
    """Pure-JAX f32 reference mirroring the PyTorch forward (eval mode)."""
    B, T, N, D = x.shape
    H, nh = hidden_size, num_heads
    scale = float(H) ** 0.5
    xp = jnp.transpose(x, (0, 2, 1, 3))                               # (B, N, T, D)
    h = xp @ params["we"] + params["be"][0]
    h = h + make_positional_encoding(T, H)
    def split_heads(y):                                               # (B,N,T,H*nh)->(B,N,nh,T,H)
        return jnp.transpose(y.reshape(B, N, T, nh, H), (0, 1, 3, 2, 4))
    q = split_heads(h @ params["wq"] + params["bq"][0])
    k = split_heads(h @ params["wk"] + params["bk"][0])
    v = split_heads(h @ params["wv"] + params["bv"][0])
    e = jnp.einsum("bnhtd,bnhsd->bnhts", q, k) / scale
    mask = jnp.triu(jnp.ones((T, T), dtype=bool), k=1)
    e = jnp.where(mask, -1e30, e)
    a = jax.nn.softmax(e, axis=-1)
    o = jnp.einsum("bnhts,bnhsd->bnhtd", a, v)
    o = jnp.transpose(o, (0, 1, 3, 2, 4)).reshape(B, N, T, nh * H)
    return o @ params["wo"] + params["bo"][0]


if __name__ == "__main__":
    B, N, D_in = 2, 4, 16
    hidden_size, num_heads, window_size = 32, 8, 8
    T = window_size

    key = jax.random.PRNGKey(0)
    kx, kp = jax.random.split(key)
    x = jax.random.normal(kx, (B, T, N, D_in), dtype=jnp.float32)
    params = init_params(kp, D_in, hidden_size, num_heads)

    out = temporal_attention(x, params, hidden_size=hidden_size,
                             num_heads=num_heads, window_size=window_size)
    out = jax.block_until_ready(out)

    ref = temporal_attention_ref(x, params, hidden_size=hidden_size,
                                 num_heads=num_heads, window_size=window_size)
    assert out.shape == (B, N, T, hidden_size)
    # Tolerance deliberately relaxed vs. the f32 reference: the kernel uses the bf16 MXU
    # path (f32 accumulation) and an approx EUP reciprocal for the softmax denominator.
    assert jnp.allclose(out, ref, atol=3e-3, rtol=3e-2), "mismatch vs reference"
    print("KERNEL_OK")
</pallas_src>

<mosaic_0001>
module attributes {stable_mosaic.version = 11 : i64} {
  func.func @_temporal_attn_kernel(%arg0: i32, %arg1: memref<4x8x16xf32, #tpu.memory_space<vmem>>, %arg2: memref<8x32xf32, #tpu.memory_space<vmem>>, %arg3: memref<8x8xf32, #tpu.memory_space<vmem>>, %arg4: memref<16x32xbf16, #tpu.memory_space<vmem>>, %arg5: memref<1x32xf32, #tpu.memory_space<vmem>>, %arg6: memref<32x768xbf16, #tpu.memory_space<vmem>>, %arg7: memref<1x768xf32, #tpu.memory_space<vmem>>, %arg8: memref<256x32xbf16, #tpu.memory_space<vmem>>, %arg9: memref<1x32xf32, #tpu.memory_space<vmem>>, %arg10: memref<1x8x128xf32, #tpu.memory_space<vmem>>) attributes {dimension_semantics = [#tpu.dimension_semantics<parallel>], iteration_bounds = array<i64: 2>, scalar_prefetch = 0 : i64, scratch_operands = 0 : i64, tpu.core_type = #tpu.core_type<tc>, window_params = [{transform_indices = @transform_0, window_bounds = array<i64: 4, 8, 16>}, {pipeline_mode = #tpu.pipeline_mode<synchronous>, transform_indices = @transform_1, window_bounds = array<i64: 8, 32>}, {pipeline_mode = #tpu.pipeline_mode<synchronous>, transform_indices = @transform_2, window_bounds = array<i64: 8, 8>}, {pipeline_mode = #tpu.pipeline_mode<synchronous>, transform_indices = @transform_3, window_bounds = array<i64: 16, 32>}, {pipeline_mode = #tpu.pipeline_mode<synchronous>, transform_indices = @transform_4, window_bounds = array<i64: 1, 32>}, {pipeline_mode = #tpu.pipeline_mode<synchronous>, transform_indices = @transform_5, window_bounds = array<i64: 32, 768>}, {pipeline_mode = #tpu.pipeline_mode<synchronous>, transform_indices = @transform_6, window_bounds = array<i64: 1, 768>}, {pipeline_mode = #tpu.pipeline_mode<synchronous>, transform_indices = @transform_7, window_bounds = array<i64: 256, 32>}, {pipeline_mode = #tpu.pipeline_mode<synchronous>, transform_indices = @transform_8, window_bounds = array<i64: 1, 32>}, {transform_indices = @transform_9, window_bounds = array<i64: 1, 8, 128>}]} {
    %c0 = arith.constant 0 : index
    %c0_0 = arith.constant 0 : index
    %c0_1 = arith.constant 0 : index
    %0 = vector.load %arg1[%c0, %c0_0, %c0_1] : memref<4x8x16xf32, #tpu.memory_space<vmem>>, vector<4x8x16xf32>
    %1 = vector.shape_cast %0 : vector<4x8x16xf32> to vector<32x16xf32>
    %2 = arith.truncf %1 : vector<32x16xf32> to vector<32x16xbf16>
    %c0_2 = arith.constant 0 : index
    %c0_3 = arith.constant 0 : index
    %3 = vector.load %arg4[%c0_2, %c0_3] : memref<16x32xbf16, #tpu.memory_space<vmem>>, vector<16x32xbf16>
    %cst = arith.constant dense<0.000000e+00> : vector<32x32xf32>
    %4 = tpu.matmul %2, %3, %cst {dimension_numbers = #tpu.dot_dimension_numbers<[1], [0], [0], [1], [0, 0, 1, 1], [], []>} : vector<32x16xbf16>, vector<16x32xbf16>, vector<32x32xf32> -> vector<32x32xf32>
    %c0_4 = arith.constant 0 : index
    %c0_5 = arith.constant 0 : index
    %5 = vector.load %arg5[%c0_4, %c0_5] : memref<1x32xf32, #tpu.memory_space<vmem>>, vector<1x32xf32>
    %6 = vector.shape_cast %5 : vector<1x32xf32> to vector<32xf32>
    %7 = vector.shape_cast %6 : vector<32xf32> to vector<1x32xf32>
    %8 = vector.broadcast %7 : vector<1x32xf32> to vector<32x32xf32>
    %9 = arith.addf %4, %8 : vector<32x32xf32>
    %10 = vector.shape_cast %9 : vector<32x32xf32> to vector<4x8x32xf32>
    %c0_6 = arith.constant 0 : index
    %c0_7 = arith.constant 0 : index
    %11 = vector.load %arg2[%c0_6, %c0_7] : memref<8x32xf32, #tpu.memory_space<vmem>>, vector<8x32xf32>
    %12 = vector.shape_cast %11 : vector<8x32xf32> to vector<1x8x32xf32>
    %13 = vector.broadcast %12 : vector<1x8x32xf32> to vector<4x8x32xf32>
    %14 = arith.addf %10, %13 : vector<4x8x32xf32>
    %15 = vector.shape_cast %14 : vector<4x8x32xf32> to vector<32x32xf32>
    %16 = arith.truncf %15 : vector<32x32xf32> to vector<32x32xbf16>
    %c0_8 = arith.constant 0 : index
    %c0_9 = arith.constant 0 : index
    %17 = vector.load %arg6[%c0_8, %c0_9] : memref<32x768xbf16, #tpu.memory_space<vmem>>, vector<32x768xbf16>
    %cst_10 = arith.constant dense<0.000000e+00> : vector<32x768xf32>
    %18 = tpu.matmul %16, %17, %cst_10 {dimension_numbers = #tpu.dot_dimension_numbers<[1], [0], [0], [1], [0, 0, 1, 1], [], []>} : vector<32x32xbf16>, vector<32x768xbf16>, vector<32x768xf32> -> vector<32x768xf32>
    %c0_11 = arith.constant 0 : index
    %c0_12 = arith.constant 0 : index
    %19 = vector.load %arg7[%c0_11, %c0_12] : memref<1x768xf32, #tpu.memory_space<vmem>>, vector<1x768xf32>
    %20 = vector.shape_cast %19 : vector<1x768xf32> to vector<768xf32>
    %21 = vector.shape_cast %20 : vector<768xf32> to vector<1x768xf32>
    %22 = vector.broadcast %21 : vector<1x768xf32> to vector<32x768xf32>
    %23 = arith.addf %18, %22 : vector<32x768xf32>
    %24 = vector.shape_cast %23 : vector<32x768xf32> to vector<4x8x768xf32>
    %25 = vector.extract_strided_slice %24 {offsets = [0, 0, 0], sizes = [4, 8, 32], strides = [1, 1, 1]} : vector<4x8x768xf32> to vector<4x8x32xf32>
    %26 = vector.extract_strided_slice %24 {offsets = [0, 0, 32], sizes = [4, 8, 32], strides = [1, 1, 1]} : vector<4x8x768xf32> to vector<4x8x32xf32>
    %27 = vector.extract_strided_slice %24 {offsets = [0, 0, 64], sizes = [4, 8, 32], strides = [1, 1, 1]} : vector<4x8x768xf32> to vector<4x8x32xf32>
    %28 = vector.extract_strided_slice %24 {offsets = [0, 0, 96], sizes = [4, 8, 32], strides = [1, 1, 1]} : vector<4x8x768xf32> to vector<4x8x32xf32>
    %29 = vector.extract_strided_slice %24 {offsets = [0, 0, 128], sizes = [4, 8, 32], strides = [1, 1, 1]} : vector<4x8x768xf32> to vector<4x8x32xf32>
    %30 = vector.extract_strided_slice %24 {offsets = [0, 0, 160], sizes = [4, 8, 32], strides = [1, 1, 1]} : vector<4x8x768xf32> to vector<4x8x32xf32>
    %31 = vector.extract_strided_slice %24 {offsets = [0, 0, 192], sizes = [4, 8, 32], strides = [1, 1, 1]} : vector<4x8x768xf32> to vector<4x8x32xf32>
    %32 = vector.extract_strided_slice %24 {offsets = [0, 0, 224], sizes = [4, 8, 32], strides = [1, 1, 1]} : vector<4x8x768xf32> to vector<4x8x32xf32>
    %33 = tpu.concatenate %25, %26, %27, %28, %29, %30, %31, %32 in 0 : vector<4x8x32xf32>, vector<4x8x32xf32>, vector<4x8x32xf32>, vector<4x8x32xf32>, vector<4x8x32xf32>, vector<4x8x32xf32>, vector<4x8x32xf32>, vector<4x8x32xf32> -> vector<32x8x32xf32>
    %34 = vector.extract_strided_slice %24 {offsets = [0, 0, 256], sizes = [4, 8, 32], strides = [1, 1, 1]} : vector<4x8x768xf32> to vector<4x8x32xf32>
    %35 = vector.extract_strided_slice %24 {offsets = [0, 0, 288], sizes = [4, 8, 32], strides = [1, 1, 1]} : vector<4x8x768xf32> to vector<4x8x32xf32>
    %36 = vector.extract_strided_slice %24 {offsets = [0, 0, 320], sizes = [4, 8, 32], strides = [1, 1, 1]} : vector<4x8x768xf32> to vector<4x8x32xf32>
    %37 = vector.extract_strided_slice %24 {offsets = [0, 0, 352], sizes = [4, 8, 32], strides = [1, 1, 1]} : vector<4x8x768xf32> to vector<4x8x32xf32>
    %38 = vector.extract_strided_slice %24 {offsets = [0, 0, 384], sizes = [4, 8, 32], strides = [1, 1, 1]} : vector<4x8x768xf32> to vector<4x8x32xf32>
    %39 = vector.extract_strided_slice %24 {offsets = [0, 0, 416], sizes = [4, 8, 32], strides = [1, 1, 1]} : vector<4x8x768xf32> to vector<4x8x32xf32>
    %40 = vector.extract_strided_slice %24 {offsets = [0, 0, 448], sizes = [4, 8, 32], strides = [1, 1, 1]} : vector<4x8x768xf32> to vector<4x8x32xf32>
    %41 = vector.extract_strided_slice %24 {offsets = [0, 0, 480], sizes = [4, 8, 32], strides = [1, 1, 1]} : vector<4x8x768xf32> to vector<4x8x32xf32>
    %42 = tpu.concatenate %34, %35, %36, %37, %38, %39, %40, %41 in 0 : vector<4x8x32xf32>, vector<4x8x32xf32>, vector<4x8x32xf32>, vector<4x8x32xf32>, vector<4x8x32xf32>, vector<4x8x32xf32>, vector<4x8x32xf32>, vector<4x8x32xf32> -> vector<32x8x32xf32>
    %43 = vector.extract_strided_slice %24 {offsets = [0, 0, 512], sizes = [4, 8, 32], strides = [1, 1, 1]} : vector<4x8x768xf32> to vector<4x8x32xf32>
    %44 = vector.extract_strided_slice %24 {offsets = [0, 0, 544], sizes = [4, 8, 32], strides = [1, 1, 1]} : vector<4x8x768xf32> to vector<4x8x32xf32>
    %45 = vector.extract_strided_slice %24 {offsets = [0, 0, 576], sizes = [4, 8, 32], strides = [1, 1, 1]} : vector<4x8x768xf32> to vector<4x8x32xf32>
    %46 = vector.extract_strided_slice %24 {offsets = [0, 0, 608], sizes = [4, 8, 32], strides = [1, 1, 1]} : vector<4x8x768xf32> to vector<4x8x32xf32>
    %47 = vector.extract_strided_slice %24 {offsets = [0, 0, 640], sizes = [4, 8, 32], strides = [1, 1, 1]} : vector<4x8x768xf32> to vector<4x8x32xf32>
    %48 = vector.extract_strided_slice %24 {offsets = [0, 0, 672], sizes = [4, 8, 32], strides = [1, 1, 1]} : vector<4x8x768xf32> to vector<4x8x32xf32>
    %49 = vector.extract_strided_slice %24 {offsets = [0, 0, 704], sizes = [4, 8, 32], strides = [1, 1, 1]} : vector<4x8x768xf32> to vector<4x8x32xf32>
    %50 = vector.extract_strided_slice %24 {offsets = [0, 0, 736], sizes = [4, 8, 32], strides = [1, 1, 1]} : vector<4x8x768xf32> to vector<4x8x32xf32>
    %51 = tpu.concatenate %43, %44, %45, %46, %47, %48, %49, %50 in 0 : vector<4x8x32xf32>, vector<4x8x32xf32>, vector<4x8x32xf32>, vector<4x8x32xf32>, vector<4x8x32xf32>, vector<4x8x32xf32>, vector<4x8x32xf32>, vector<4x8x32xf32> -> vector<32x8x32xf32>
    %52 = arith.truncf %33 : vector<32x8x32xf32> to vector<32x8x32xbf16>
    %53 = arith.truncf %42 : vector<32x8x32xf32> to vector<32x8x32xbf16>
    "tpu.trace_start"() <{level = 10 : i32, message = "btd,bsd->bts"}> : () -> ()
    %cst_13 = arith.constant dense<0.000000e+00> : vector<32x8x8xf32>
    %54 = tpu.matmul %52, %53, %cst_13 {dimension_numbers = #tpu.dot_dimension_numbers<[2], [2], [1], [1], [0, 0, 0, 1, 1, 1], [0], [0]>} : vector<32x8x32xbf16>, vector<32x8x32xbf16>, vector<32x8x8xf32> -> vector<32x8x8xf32>
    "tpu.trace_stop"() : () -> ()
    %c0_14 = arith.constant 0 : index
    %c0_15 = arith.constant 0 : index
    %55 = vector.load %arg3[%c0_14, %c0_15] : memref<8x8xf32, #tpu.memory_space<vmem>>, vector<8x8xf32>
    %56 = vector.shape_cast %55 : vector<8x8xf32> to vector<1x8x8xf32>
    %57 = vector.broadcast %56 : vector<1x8x8xf32> to vector<32x8x8xf32>
    %58 = arith.addf %54, %57 : vector<32x8x8xf32>
    %cst_16 = arith.constant dense<0xFF800000> : vector<32x8xf32>
    %59 = vector.multi_reduction <maximumf>, %58, %cst_16 [2] : vector<32x8x8xf32> to vector<32x8xf32>
    %60 = vector.shape_cast %59 : vector<32x8xf32> to vector<32x8x1xf32>
    %61 = vector.broadcast %60 : vector<32x8x1xf32> to vector<32x8x8xf32>
    %62 = arith.subf %58, %61 : vector<32x8x8xf32>
    %63 = math.exp %62 : vector<32x8x8xf32>
    %cst_17 = arith.constant dense<0.000000e+00> : vector<32x8xf32>
    %64 = vector.multi_reduction <add>, %63, %cst_17 [2] : vector<32x8x8xf32> to vector<32x8xf32>
    %65 = vector.shape_cast %64 : vector<32x8xf32> to vector<32x8x1xf32>
    %66 = tpu.reciprocal %65 {approx = true} : vector<32x8x1xf32> -> vector<32x8x1xf32>
    %67 = vector.broadcast %66 : vector<32x8x1xf32> to vector<32x8x8xf32>
    %68 = arith.mulf %63, %67 : vector<32x8x8xf32>
    %69 = arith.truncf %68 : vector<32x8x8xf32> to vector<32x8x8xbf16>
    %70 = arith.truncf %51 : vector<32x8x32xf32> to vector<32x8x32xbf16>
    "tpu.trace_start"() <{level = 10 : i32, message = "bts,bsd->btd"}> : () -> ()
    %cst_18 = arith.constant dense<0.000000e+00> : vector<32x8x32xf32>
    %71 = tpu.matmul %69, %70, %cst_18 {dimension_numbers = #tpu.dot_dimension_numbers<[2], [1], [1], [2], [0, 0, 0, 1, 1, 2], [0], [0]>} : vector<32x8x8xbf16>, vector<32x8x32xbf16>, vector<32x8x32xf32> -> vector<32x8x32xf32>
    "tpu.trace_stop"() : () -> ()
    %72 = vector.extract_strided_slice %71 {offsets = [0, 0, 0], sizes = [4, 8, 32], strides = [1, 1, 1]} : vector<32x8x32xf32> to vector<4x8x32xf32>
    %73 = vector.extract_strided_slice %71 {offsets = [4, 0, 0], sizes = [4, 8, 32], strides = [1, 1, 1]} : vector<32x8x32xf32> to vector<4x8x32xf32>
    %74 = vector.extract_strided_slice %71 {offsets = [8, 0, 0], sizes = [4, 8, 32], strides = [1, 1, 1]} : vector<32x8x32xf32> to vector<4x8x32xf32>
    %75 = vector.extract_strided_slice %71 {offsets = [12, 0, 0], sizes = [4, 8, 32], strides = [1, 1, 1]} : vector<32x8x32xf32> to vector<4x8x32xf32>
    %76 = vector.extract_strided_slice %71 {offsets = [16, 0, 0], sizes = [4, 8, 32], strides = [1, 1, 1]} : vector<32x8x32xf32> to vector<4x8x32xf32>
    %77 = vector.extract_strided_slice %71 {offsets = [20, 0, 0], sizes = [4, 8, 32], strides = [1, 1, 1]} : vector<32x8x32xf32> to vector<4x8x32xf32>
    %78 = vector.extract_strided_slice %71 {offsets = [24, 0, 0], sizes = [4, 8, 32], strides = [1, 1, 1]} : vector<32x8x32xf32> to vector<4x8x32xf32>
    %79 = vector.extract_strided_slice %71 {offsets = [28, 0, 0], sizes = [4, 8, 32], strides = [1, 1, 1]} : vector<32x8x32xf32> to vector<4x8x32xf32>
    %80 = tpu.concatenate %72, %73, %74, %75, %76, %77, %78, %79 in 2 : vector<4x8x32xf32>, vector<4x8x32xf32>, vector<4x8x32xf32>, vector<4x8x32xf32>, vector<4x8x32xf32>, vector<4x8x32xf32>, vector<4x8x32xf32>, vector<4x8x32xf32> -> vector<4x8x256xf32>
    %81 = vector.shape_cast %80 : vector<4x8x256xf32> to vector<32x256xf32>
    %82 = arith.truncf %81 : vector<32x256xf32> to vector<32x256xbf16>
    %c0_19 = arith.constant 0 : index
    %c0_20 = arith.constant 0 : index
    %83 = vector.load %arg8[%c0_19, %c0_20] : memref<256x32xbf16, #tpu.memory_space<vmem>>, vector<256x32xbf16>
    %cst_21 = arith.constant dense<0.000000e+00> : vector<32x32xf32>
    %84 = tpu.matmul %82, %83, %cst_21 {dimension_numbers = #tpu.dot_dimension_numbers<[1], [0], [0], [1], [0, 0, 1, 1], [], []>} : vector<32x256xbf16>, vector<256x32xbf16>, vector<32x32xf32> -> vector<32x32xf32>
    %c0_22 = arith.constant 0 : index
    %c0_23 = arith.constant 0 : index
    %85 = vector.load %arg9[%c0_22, %c0_23] : memref<1x32xf32, #tpu.memory_space<vmem>>, vector<1x32xf32>
    %86 = vector.shape_cast %85 : vector<1x32xf32> to vector<32xf32>
    %87 = vector.shape_cast %86 : vector<32xf32> to vector<1x32xf32>
    %88 = vector.broadcast %87 : vector<1x32xf32> to vector<32x32xf32>
    %89 = arith.addf %84, %88 : vector<32x32xf32>
    %90 = vector.shape_cast %89 : vector<32x32xf32> to vector<1x4x8x32xf32>
    %91 = vector.extract_strided_slice %90 {offsets = [0, 0, 0, 0], sizes = [1, 1, 8, 32], strides = [1, 1, 1, 1]} : vector<1x4x8x32xf32> to vector<1x1x8x32xf32>
    %92 = vector.shape_cast %91 : vector<1x1x8x32xf32> to vector<1x8x32xf32>
    %93 = vector.extract_strided_slice %90 {offsets = [0, 1, 0, 0], sizes = [1, 1, 8, 32], strides = [1, 1, 1, 1]} : vector<1x4x8x32xf32> to vector<1x1x8x32xf32>
    %94 = vector.shape_cast %93 : vector<1x1x8x32xf32> to vector<1x8x32xf32>
    %95 = vector.extract_strided_slice %90 {offsets = [0, 2, 0, 0], sizes = [1, 1, 8, 32], strides = [1, 1, 1, 1]} : vector<1x4x8x32xf32> to vector<1x1x8x32xf32>
    %96 = vector.shape_cast %95 : vector<1x1x8x32xf32> to vector<1x8x32xf32>
    %97 = vector.extract_strided_slice %90 {offsets = [0, 3, 0, 0], sizes = [1, 1, 8, 32], strides = [1, 1, 1, 1]} : vector<1x4x8x32xf32> to vector<1x1x8x32xf32>
    %98 = vector.shape_cast %97 : vector<1x1x8x32xf32> to vector<1x8x32xf32>
    %99 = tpu.concatenate %92, %94, %96, %98 in 2 : vector<1x8x32xf32>, vector<1x8x32xf32>, vector<1x8x32xf32>, vector<1x8x32xf32> -> vector<1x8x128xf32>
    %c0_24 = arith.constant 0 : index
    %c0_25 = arith.constant 0 : index
    %c0_26 = arith.constant 0 : index
    %100 = vector.load %arg10[%c0_24, %c0_25, %c0_26] : memref<1x8x128xf32, #tpu.memory_space<vmem>>, vector<1x8x128xf32>
    tpu.vector_store %arg10[%c0_24, %c0_25, %c0_26], %99 {strides = array<i32>} : memref<1x8x128xf32, #tpu.memory_space<vmem>>, vector<1x8x128xf32>,
    return
  }
  func.func @transform_0(%arg0: i32) -> (i32, i32, i32) {
    %c0_i32 = arith.constant 0 : i32
    %c0_i32_0 = arith.constant 0 : i32
    %c0_i32_1 = arith.constant 0 : i32
    return %arg0, %c0_i32, %c0_i32_0 : i32, i32, i32
  }
  func.func @transform_1(%arg0: i32) -> (i32, i32) {
    %c0_i32 = arith.constant 0 : i32
    %c0_i32_0 = arith.constant 0 : i32
    %c0_i32_1 = arith.constant 0 : i32
    return %c0_i32, %c0_i32_0 : i32, i32
  }
  func.func @transform_2(%arg0: i32) -> (i32, i32) {
    %c0_i32 = arith.constant 0 : i32
    %c0_i32_0 = arith.constant 0 : i32
    %c0_i32_1 = arith.constant 0 : i32
    return %c0_i32, %c0_i32_0 : i32, i32
  }
  func.func @transform_3(%arg0: i32) -> (i32, i32) {
    %c0_i32 = arith.constant 0 : i32
    %c0_i32_0 = arith.constant 0 : i32
    %c0_i32_1 = arith.constant 0 : i32
    return %c0_i32, %c0_i32_0 : i32, i32
  }
  func.func @transform_4(%arg0: i32) -> (i32, i32) {
    %c0_i32 = arith.constant 0 : i32
    %c0_i32_0 = arith.constant 0 : i32
    %c0_i32_1 = arith.constant 0 : i32
    return %c0_i32, %c0_i32_0 : i32, i32
  }
  func.func @transform_5(%arg0: i32) -> (i32, i32) {
    %c0_i32 = arith.constant 0 : i32
    %c0_i32_0 = arith.constant 0 : i32
    %c0_i32_1 = arith.constant 0 : i32
    return %c0_i32, %c0_i32_0 : i32, i32
  }
  func.func @transform_6(%arg0: i32) -> (i32, i32) {
    %c0_i32 = arith.constant 0 : i32
    %c0_i32_0 = arith.constant 0 : i32
    %c0_i32_1 = arith.constant 0 : i32
    return %c0_i32, %c0_i32_0 : i32, i32
  }
  func.func @transform_7(%arg0: i32) -> (i32, i32) {
    %c0_i32 = arith.constant 0 : i32
    %c0_i32_0 = arith.constant 0 : i32
    %c0_i32_1 = arith.constant 0 : i32
    return %c0_i32, %c0_i32_0 : i32, i32
  }
  func.func @transform_8(%arg0: i32) -> (i32, i32) {
    %c0_i32 = arith.constant 0 : i32
    %c0_i32_0 = arith.constant 0 : i32
    %c0_i32_1 = arith.constant 0 : i32
    return %c0_i32, %c0_i32_0 : i32, i32
  }
  func.func @transform_9(%arg0: i32) -> (i32, i32, i32) {
    %c0_i32 = arith.constant 0 : i32
    %c0_i32_0 = arith.constant 0 : i32
    %c0_i32_1 = arith.constant 0 : i32
    return %arg0, %c0_i32, %c0_i32_0 : i32, i32, i32
  }
}

module attributes {stable_mosaic.version = 11 : i64} {
  func.func @_temporal_attn_kernel(%arg0: i32, %arg1: memref<4x8x16xf32, #tpu.memory_space<vmem>>, %arg2: memref<8x32xf32, #tpu.memory_space<vmem>>, %arg3: memref<8x8xf32, #tpu.memory_space<vmem>>, %arg4: memref<16x32xbf16, #tpu.memory_space<vmem>>, %arg5: memref<1x32xf32, #tpu.memory_space<vmem>>, %arg6: memref<32x768xbf16, #tpu.memory_space<vmem>>, %arg7: memref<1x768xf32, #tpu.memory_space<vmem>>, %arg8: memref<256x32xbf16, #tpu.memory_space<vmem>>, %arg9: memref<1x32xf32, #tpu.memory_space<vmem>>, %arg10: memref<1x8x128xf32, #tpu.memory_space<vmem>>) attributes {dimension_semantics = [#tpu.dimension_semantics<parallel>], iteration_bounds = array<i64: 2>, scalar_prefetch = 0 : i64, scratch_operands = 0 : i64, tpu.core_type = #tpu.core_type<tc>, window_params = [{transform_indices = @transform_0, window_bounds = array<i64: 4, 8, 16>}, {pipeline_mode = #tpu.pipeline_mode<synchronous>, transform_indices = @transform_1, window_bounds = array<i64: 8, 32>}, {pipeline_mode = #tpu.pipeline_mode<synchronous>, transform_indices = @transform_2, window_bounds = array<i64: 8, 8>}, {pipeline_mode = #tpu.pipeline_mode<synchronous>, transform_indices = @transform_3, window_bounds = array<i64: 16, 32>}, {pipeline_mode = #tpu.pipeline_mode<synchronous>, transform_indices = @transform_4, window_bounds = array<i64: 1, 32>}, {pipeline_mode = #tpu.pipeline_mode<synchronous>, transform_indices = @transform_5, window_bounds = array<i64: 32, 768>}, {pipeline_mode = #tpu.pipeline_mode<synchronous>, transform_indices = @transform_6, window_bounds = array<i64: 1, 768>}, {pipeline_mode = #tpu.pipeline_mode<synchronous>, transform_indices = @transform_7, window_bounds = array<i64: 256, 32>}, {pipeline_mode = #tpu.pipeline_mode<synchronous>, transform_indices = @transform_8, window_bounds = array<i64: 1, 32>}, {transform_indices = @transform_9, window_bounds = array<i64: 1, 8, 128>}]} {
    %c0 = arith.constant 0 : index
    %c0_0 = arith.constant 0 : index
    %c0_1 = arith.constant 0 : index
    %0 = vector.load %arg1[%c0, %c0_0, %c0_1] : memref<4x8x16xf32, #tpu.memory_space<vmem>>, vector<4x8x16xf32>
    %1 = vector.shape_cast %0 : vector<4x8x16xf32> to vector<32x16xf32>
    %2 = arith.truncf %1 : vector<32x16xf32> to vector<32x16xbf16>
    %c0_2 = arith.constant 0 : index
    %c0_3 = arith.constant 0 : index
    %3 = vector.load %arg4[%c0_2, %c0_3] : memref<16x32xbf16, #tpu.memory_space<vmem>>, vector<16x32xbf16>
    %cst = arith.constant dense<0.000000e+00> : vector<32x32xf32>
    %4 = tpu.matmul %2, %3, %cst {dimension_numbers = #tpu.dot_dimension_numbers<[1], [0], [0], [1], [0, 0, 1, 1], [], []>} : vector<32x16xbf16>, vector<16x32xbf16>, vector<32x32xf32> -> vector<32x32xf32>
    %c0_4 = arith.constant 0 : index
    %c0_5 = arith.constant 0 : index
    %5 = vector.load %arg5[%c0_4, %c0_5] : memref<1x32xf32, #tpu.memory_space<vmem>>, vector<1x32xf32>
    %6 = vector.shape_cast %5 : vector<1x32xf32> to vector<32xf32>
    %7 = vector.shape_cast %6 : vector<32xf32> to vector<1x32xf32>
    %8 = vector.broadcast %7 : vector<1x32xf32> to vector<32x32xf32>
    %9 = arith.addf %4, %8 : vector<32x32xf32>
    %10 = vector.shape_cast %9 : vector<32x32xf32> to vector<4x8x32xf32>
    %c0_6 = arith.constant 0 : index
    %c0_7 = arith.constant 0 : index
    %11 = vector.load %arg2[%c0_6, %c0_7] : memref<8x32xf32, #tpu.memory_space<vmem>>, vector<8x32xf32>
    %12 = vector.shape_cast %11 : vector<8x32xf32> to vector<1x8x32xf32>
    %13 = vector.broadcast %12 : vector<1x8x32xf32> to vector<4x8x32xf32>
    %14 = arith.addf %10, %13 : vector<4x8x32xf32>
    %15 = vector.shape_cast %14 : vector<4x8x32xf32> to vector<32x32xf32>
    %16 = arith.truncf %15 : vector<32x32xf32> to vector<32x32xbf16>
    %c0_8 = arith.constant 0 : index
    %c0_9 = arith.constant 0 : index
    %17 = vector.load %arg6[%c0_8, %c0_9] : memref<32x768xbf16, #tpu.memory_space<vmem>>, vector<32x768xbf16>
    %cst_10 = arith.constant dense<0.000000e+00> : vector<32x768xf32>
    %18 = tpu.matmul %16, %17, %cst_10 {dimension_numbers = #tpu.dot_dimension_numbers<[1], [0], [0], [1], [0, 0, 1, 1], [], []>} : vector<32x32xbf16>, vector<32x768xbf16>, vector<32x768xf32> -> vector<32x768xf32>
    %c0_11 = arith.constant 0 : index
    %c0_12 = arith.constant 0 : index
    %19 = vector.load %arg7[%c0_11, %c0_12] : memref<1x768xf32, #tpu.memory_space<vmem>>, vector<1x768xf32>
    %20 = vector.shape_cast %19 : vector<1x768xf32> to vector<768xf32>
    %21 = vector.shape_cast %20 : vector<768xf32> to vector<1x768xf32>
    %22 = vector.broadcast %21 : vector<1x768xf32> to vector<32x768xf32>
    %23 = arith.addf %18, %22 : vector<32x768xf32>
    %24 = vector.shape_cast %23 : vector<32x768xf32> to vector<4x8x768xf32>
    %25 = vector.extract_strided_slice %24 {offsets = [0, 0, 0], sizes = [4, 8, 32], strides = [1, 1, 1]} : vector<4x8x768xf32> to vector<4x8x32xf32>
    %26 = vector.extract_strided_slice %24 {offsets = [0, 0, 32], sizes = [4, 8, 32], strides = [1, 1, 1]} : vector<4x8x768xf32> to vector<4x8x32xf32>
    %27 = vector.extract_strided_slice %24 {offsets = [0, 0, 64], sizes = [4, 8, 32], strides = [1, 1, 1]} : vector<4x8x768xf32> to vector<4x8x32xf32>
    %28 = vector.extract_strided_slice %24 {offsets = [0, 0, 96], sizes = [4, 8, 32], strides = [1, 1, 1]} : vector<4x8x768xf32> to vector<4x8x32xf32>
    %29 = vector.extract_strided_slice %24 {offsets = [0, 0, 128], sizes = [4, 8, 32], strides = [1, 1, 1]} : vector<4x8x768xf32> to vector<4x8x32xf32>
    %30 = vector.extract_strided_slice %24 {offsets = [0, 0, 160], sizes = [4, 8, 32], strides = [1, 1, 1]} : vector<4x8x768xf32> to vector<4x8x32xf32>
    %31 = vector.extract_strided_slice %24 {offsets = [0, 0, 192], sizes = [4, 8, 32], strides = [1, 1, 1]} : vector<4x8x768xf32> to vector<4x8x32xf32>
    %32 = vector.extract_strided_slice %24 {offsets = [0, 0, 224], sizes = [4, 8, 32], strides = [1, 1, 1]} : vector<4x8x768xf32> to vector<4x8x32xf32>
    %33 = tpu.concatenate %25, %26, %27, %28, %29, %30, %31, %32 in 0 : vector<4x8x32xf32>, vector<4x8x32xf32>, vector<4x8x32xf32>, vector<4x8x32xf32>, vector<4x8x32xf32>, vector<4x8x32xf32>, vector<4x8x32xf32>, vector<4x8x32xf32> -> vector<32x8x32xf32>
    %34 = vector.extract_strided_slice %24 {offsets = [0, 0, 256], sizes = [4, 8, 32], strides = [1, 1, 1]} : vector<4x8x768xf32> to vector<4x8x32xf32>
    %35 = vector.extract_strided_slice %24 {offsets = [0, 0, 288], sizes = [4, 8, 32], strides = [1, 1, 1]} : vector<4x8x768xf32> to vector<4x8x32xf32>
    %36 = vector.extract_strided_slice %24 {offsets = [0, 0, 320], sizes = [4, 8, 32], strides = [1, 1, 1]} : vector<4x8x768xf32> to vector<4x8x32xf32>
    %37 = vector.extract_strided_slice %24 {offsets = [0, 0, 352], sizes = [4, 8, 32], strides = [1, 1, 1]} : vector<4x8x768xf32> to vector<4x8x32xf32>
    %38 = vector.extract_strided_slice %24 {offsets = [0, 0, 384], sizes = [4, 8, 32], strides = [1, 1, 1]} : vector<4x8x768xf32> to vector<4x8x32xf32>
    %39 = vector.extract_strided_slice %24 {offsets = [0, 0, 416], sizes = [4, 8, 32], strides = [1, 1, 1]} : vector<4x8x768xf32> to vector<4x8x32xf32>
    %40 = vector.extract_strided_slice %24 {offsets = [0, 0, 448], sizes = [4, 8, 32], strides = [1, 1, 1]} : vector<4x8x768xf32> to vector<4x8x32xf32>
    %41 = vector.extract_strided_slice %24 {offsets = [0, 0, 480], sizes = [4, 8, 32], strides = [1, 1, 1]} : vector<4x8x768xf32> to vector<4x8x32xf32>
    %42 = tpu.concatenate %34, %35, %36, %37, %38, %39, %40, %41 in 0 : vector<4x8x32xf32>, vector<4x8x32xf32>, vector<4x8x32xf32>, vector<4x8x32xf32>, vector<4x8x32xf32>, vector<4x8x32xf32>, vector<4x8x32xf32>, vector<4x8x32xf32> -> vector<32x8x32xf32>
    %43 = vector.extract_strided_slice %24 {offsets = [0, 0, 512], sizes = [4, 8, 32], strides = [1, 1, 1]} : vector<4x8x768xf32> to vector<4x8x32xf32>
    %44 = vector.extract_strided_slice %24 {offsets = [0, 0, 544], sizes = [4, 8, 32], strides = [1, 1, 1]} : vector<4x8x768xf32> to vector<4x8x32xf32>
    %45 = vector.extract_strided_slice %24 {offsets = [0, 0, 576], sizes = [4, 8, 32], strides = [1, 1, 1]} : vector<4x8x768xf32> to vector<4x8x32xf32>
    %46 = vector.extract_strided_slice %24 {offsets = [0, 0, 608], sizes = [4, 8, 32], strides = [1, 1, 1]} : vector<4x8x768xf32> to vector<4x8x32xf32>
    %47 = vector.extract_strided_slice %24 {offsets = [0, 0, 640], sizes = [4, 8, 32], strides = [1, 1, 1]} : vector<4x8x768xf32> to vector<4x8x32xf32>
    %48 = vector.extract_strided_slice %24 {offsets = [0, 0, 672], sizes = [4, 8, 32], strides = [1, 1, 1]} : vector<4x8x768xf32> to vector<4x8x32xf32>
    %49 = vector.extract_strided_slice %24 {offsets = [0, 0, 704], sizes = [4, 8, 32], strides = [1, 1, 1]} : vector<4x8x768xf32> to vector<4x8x32xf32>
    %50 = vector.extract_strided_slice %24 {offsets = [0, 0, 736], sizes = [4, 8, 32], strides = [1, 1, 1]} : vector<4x8x768xf32> to vector<4x8x32xf32>
    %51 = tpu.concatenate %43, %44, %45, %46, %47, %48, %49, %50 in 0 : vector<4x8x32xf32>, vector<4x8x32xf32>, vector<4x8x32xf32>, vector<4x8x32xf32>, vector<4x8x32xf32>, vector<4x8x32xf32>, vector<4x8x32xf32>, vector<4x8x32xf32> -> vector<32x8x32xf32>
    %52 = arith.truncf %33 : vector<32x8x32xf32> to vector<32x8x32xbf16>
    %53 = arith.truncf %42 : vector<32x8x32xf32> to vector<32x8x32xbf16>
    "tpu.trace_start"() <{level = 10 : i32, message = "btd,bsd->bts"}> : () -> ()
    %cst_13 = arith.constant dense<0.000000e+00> : vector<32x8x8xf32>
    %54 = tpu.matmul %52, %53, %cst_13 {dimension_numbers = #tpu.dot_dimension_numbers<[2], [2], [1], [1], [0, 0, 0, 1, 1, 1], [0], [0]>} : vector<32x8x32xbf16>, vector<32x8x32xbf16>, vector<32x8x8xf32> -> vector<32x8x8xf32>
    "tpu.trace_stop"() : () -> ()
    %c0_14 = arith.constant 0 : index
    %c0_15 = arith.constant 0 : index
    %55 = vector.load %arg3[%c0_14, %c0_15] : memref<8x8xf32, #tpu.memory_space<vmem>>, vector<8x8xf32>
    %56 = vector.shape_cast %55 : vector<8x8xf32> to vector<1x8x8xf32>
    %57 = vector.broadcast %56 : vector<1x8x8xf32> to vector<32x8x8xf32>
    %58 = arith.addf %54, %57 : vector<32x8x8xf32>
    %cst_16 = arith.constant dense<0xFF800000> : vector<32x8xf32>
    %59 = vector.multi_reduction <maximumf>, %58, %cst_16 [2] : vector<32x8x8xf32> to vector<32x8xf32>
    %60 = vector.shape_cast %59 : vector<32x8xf32> to vector<32x8x1xf32>
    %61 = vector.broadcast %60 : vector<32x8x1xf32> to vector<32x8x8xf32>
    %62 = arith.subf %58, %61 : vector<32x8x8xf32>
    %63 = math.exp %62 : vector<32x8x8xf32>
    %cst_17 = arith.constant dense<0.000000e+00> : vector<32x8xf32>
    %64 = vector.multi_reduction <add>, %63, %cst_17 [2] : vector<32x8x8xf32> to vector<32x8xf32>
    %65 = vector.shape_cast %64 : vector<32x8xf32> to vector<32x8x1xf32>
    %66 = tpu.reciprocal %65 {approx = true} : vector<32x8x1xf32> -> vector<32x8x1xf32>
    %67 = vector.broadcast %66 : vector<32x8x1xf32> to vector<32x8x8xf32>
    %68 = arith.mulf %63, %67 : vector<32x8x8xf32>
    %69 = arith.truncf %68 : vector<32x8x8xf32> to vector<32x8x8xbf16>
    %70 = arith.truncf %51 : vector<32x8x32xf32> to vector<32x8x32xbf16>
    "tpu.trace_start"() <{level = 10 : i32, message = "bts,bsd->btd"}> : () -> ()
    %cst_18 = arith.constant dense<0.000000e+00> : vector<32x8x32xf32>
    %71 = tpu.matmul %69, %70, %cst_18 {dimension_numbers = #tpu.dot_dimension_numbers<[2], [1], [1], [2], [0, 0, 0, 1, 1, 2], [0], [0]>} : vector<32x8x8xbf16>, vector<32x8x32xbf16>, vector<32x8x32xf32> -> vector<32x8x32xf32>
    "tpu.trace_stop"() : () -> ()
    %72 = vector.extract_strided_slice %71 {offsets = [0, 0, 0], sizes = [4, 8, 32], strides = [1, 1, 1]} : vector<32x8x32xf32> to vector<4x8x32xf32>
    %73 = vector.extract_strided_slice %71 {offsets = [4, 0, 0], sizes = [4, 8, 32], strides = [1, 1, 1]} : vector<32x8x32xf32> to vector<4x8x32xf32>
    %74 = vector.extract_strided_slice %71 {offsets = [8, 0, 0], sizes = [4, 8, 32], strides = [1, 1, 1]} : vector<32x8x32xf32> to vector<4x8x32xf32>
    %75 = vector.extract_strided_slice %71 {offsets = [12, 0, 0], sizes = [4, 8, 32], strides = [1, 1, 1]} : vector<32x8x32xf32> to vector<4x8x32xf32>
    %76 = vector.extract_strided_slice %71 {offsets = [16, 0, 0], sizes = [4, 8, 32], strides = [1, 1, 1]} : vector<32x8x32xf32> to vector<4x8x32xf32>
    %77 = vector.extract_strided_slice %71 {offsets = [20, 0, 0], sizes = [4, 8, 32], strides = [1, 1, 1]} : vector<32x8x32xf32> to vector<4x8x32xf32>
    %78 = vector.extract_strided_slice %71 {offsets = [24, 0, 0], sizes = [4, 8, 32], strides = [1, 1, 1]} : vector<32x8x32xf32> to vector<4x8x32xf32>
    %79 = vector.extract_strided_slice %71 {offsets = [28, 0, 0], sizes = [4, 8, 32], strides = [1, 1, 1]} : vector<32x8x32xf32> to vector<4x8x32xf32>
    %80 = tpu.concatenate %72, %73, %74, %75, %76, %77, %78, %79 in 2 : vector<4x8x32xf32>, vector<4x8x32xf32>, vector<4x8x32xf32>, vector<4x8x32xf32>, vector<4x8x32xf32>, vector<4x8x32xf32>, vector<4x8x32xf32>, vector<4x8x32xf32> -> vector<4x8x256xf32>
    %81 = vector.shape_cast %80 : vector<4x8x256xf32> to vector<32x256xf32>
    %82 = arith.truncf %81 : vector<32x256xf32> to vector<32x256xbf16>
    %c0_19 = arith.constant 0 : index
    %c0_20 = arith.constant 0 : index
    %83 = vector.load %arg8[%c0_19, %c0_20] : memref<256x32xbf16, #tpu.memory_space<vmem>>, vector<256x32xbf16>
    %cst_21 = arith.constant dense<0.000000e+00> : vector<32x32xf32>
    %84 = tpu.matmul %82, %83, %cst_21 {dimension_numbers = #tpu.dot_dimension_numbers<[1], [0], [0], [1], [0, 0, 1, 1], [], []>} : vector<32x256xbf16>, vector<256x32xbf16>, vector<32x32xf32> -> vector<32x32xf32>
    %c0_22 = arith.constant 0 : index
    %c0_23 = arith.constant 0 : index
    %85 = vector.load %arg9[%c0_22, %c0_23] : memref<1x32xf32, #tpu.memory_space<vmem>>, vector<1x32xf32>
    %86 = vector.shape_cast %85 : vector<1x32xf32> to vector<32xf32>
    %87 = vector.shape_cast %86 : vector<32xf32> to vector<1x32xf32>
    %88 = vector.broadcast %87 : vector<1x32xf32> to vector<32x32xf32>
    %89 = arith.addf %84, %88 : vector<32x32xf32>
    %90 = vector.shape_cast %89 : vector<32x32xf32> to vector<1x4x8x32xf32>
    %91 = vector.extract_strided_slice %90 {offsets = [0, 0, 0, 0], sizes = [1, 1, 8, 32], strides = [1, 1, 1, 1]} : vector<1x4x8x32xf32> to vector<1x1x8x32xf32>
    %92 = vector.shape_cast %91 : vector<1x1x8x32xf32> to vector<1x8x32xf32>
    %93 = vector.extract_strided_slice %90 {offsets = [0, 1, 0, 0], sizes = [1, 1, 8, 32], strides = [1, 1, 1, 1]} : vector<1x4x8x32xf32> to vector<1x1x8x32xf32>
    %94 = vector.shape_cast %93 : vector<1x1x8x32xf32> to vector<1x8x32xf32>
    %95 = vector.extract_strided_slice %90 {offsets = [0, 2, 0, 0], sizes = [1, 1, 8, 32], strides = [1, 1, 1, 1]} : vector<1x4x8x32xf32> to vector<1x1x8x32xf32>
    %96 = vector.shape_cast %95 : vector<1x1x8x32xf32> to vector<1x8x32xf32>
    %97 = vector.extract_strided_slice %90 {offsets = [0, 3, 0, 0], sizes = [1, 1, 8, 32], strides = [1, 1, 1, 1]} : vector<1x4x8x32xf32> to vector<1x1x8x32xf32>
    %98 = vector.shape_cast %97 : vector<1x1x8x32xf32> to vector<1x8x32xf32>
    %99 = tpu.concatenate %92, %94, %96, %98 in 2 : vector<1x8x32xf32>, vector<1x8x32xf32>, vector<1x8x32xf32>, vector<1x8x32xf32> -> vector<1x8x128xf32>
    %c0_24 = arith.constant 0 : index
    %c0_25 = arith.constant 0 : index
    %c0_26 = arith.constant 0 : index
    %100 = vector.load %arg10[%c0_24, %c0_25, %c0_26] : memref<1x8x128xf32, #tpu.memory_space<vmem>>, vector<1x8x128xf32>
    tpu.vector_store %arg10[%c0_24, %c0_25, %c0_26], %99 {strides = array<i32>} : memref<1x8x128xf32, #tpu.memory_space<vmem>>, vector<1x8x128xf32>,
    return
  }
  func.func @transform_0(%arg0: i32) -> (i32, i32, i32) {
    %c0_i32 = arith.constant 0 : i32
    %c0_i32_0 = arith.constant 0 : i32
    %c0_i32_1 = arith.constant 0 : i32
    return %arg0, %c0_i32, %c0_i32_0 : i32, i32, i32
  }
  func.func @transform_1(%arg0: i32) -> (i32, i32) {
    %c0_i32 = arith.constant 0 : i32
    %c0_i32_0 = arith.constant 0 : i32
    %c0_i32_1 = arith.constant 0 : i32
    return %c0_i32, %c0_i32_0 : i32, i32
  }
  func.func @transform_2(%arg0: i32) -> (i32, i32) {
    %c0_i32 = arith.constant 0 : i32
    %c0_i32_0 = arith.constant 0 : i32
    %c0_i32_1 = arith.constant 0 : i32
    return %c0_i32, %c0_i32_0 : i32, i32
  }
  func.func @transform_3(%arg0: i32) -> (i32, i32) {
    %c0_i32 = arith.constant 0 : i32
    %c0_i32_0 = arith.constant 0 : i32
    %c0_i32_1 = arith.constant 0 : i32
    return %c0_i32, %c0_i32_0 : i32, i32
  }
  func.func @transform_4(%arg0: i32) -> (i32, i32) {
    %c0_i32 = arith.constant 0 : i32
    %c0_i32_0 = arith.constant 0 : i32
    %c0_i32_1 = arith.constant 0 : i32
    return %c0_i32, %c0_i32_0 : i32, i32
  }
  func.func @transform_5(%arg0: i32) -> (i32, i32) {
    %c0_i32 = arith.constant 0 : i32
    %c0_i32_0 = arith.constant 0 : i32
    %c0_i32_1 = arith.constant 0 : i32
    return %c0_i32, %c0_i32_0 : i32, i32
  }
  func.func @transform_6(%arg0: i32) -> (i32, i32) {
    %c0_i32 = arith.constant 0 : i32
    %c0_i32_0 = arith.constant 0 : i32
    %c0_i32_1 = arith.constant 0 : i32
    return %c0_i32, %c0_i32_0 : i32, i32
  }
  func.func @transform_7(%arg0: i32) -> (i32, i32) {
    %c0_i32 = arith.constant 0 : i32
    %c0_i32_0 = arith.constant 0 : i32
    %c0_i32_1 = arith.constant 0 : i32
    return %c0_i32, %c0_i32_0 : i32, i32
  }
  func.func @transform_8(%arg0: i32) -> (i32, i32) {
    %c0_i32 = arith.constant 0 : i32
    %c0_i32_0 = arith.constant 0 : i32
    %c0_i32_1 = arith.constant 0 : i32
    return %c0_i32, %c0_i32_0 : i32, i32
  }
  func.func @transform_9(%arg0: i32) -> (i32, i32, i32) {
    %c0_i32 = arith.constant 0 : i32
    %c0_i32_0 = arith.constant 0 : i32
    %c0_i32_1 = arith.constant 0 : i32
    return %arg0, %c0_i32, %c0_i32_0 : i32, i32, i32
  }
}

</mosaic_0001>

<bundles_post_ra>
// kernel: tpu_custom_call.1
= control target key start
LH: loop header
LB: loop body
LE: loop exit
PB: predicated region body
PF: predicated region fallthrough
CT: control target
= control target key end

     0   :  { %s5037_s0 = inlined_call_operand.vmem [shape: f32[8,8,16], index: 0, kind: input, shape index: {}]   ;;  %s5038_s1 = inlined_call_operand.hbm [shape: f32[8,32], index: 1, kind: input, shape index: {}]   ;;  %s5039_s2 = inlined_call_operand.hbm [shape: f32[8,8], index: 2, kind: input, shape index: {}]   ;;  %s5040_s3 = inlined_call_operand.hbm [shape: bf16[16,32], index: 3, kind: input, shape index: {}]   ;;  %s5041_s4 = inlined_call_operand.vmem [shape: f32[1,32], index: 4, kind: input, shape index: {}]   ;;  %s5042_s5 = inlined_call_operand.vmem [shape: bf16[32,768], index: 5, kind: input, shape index: {}]   ;;  %s5043_s6 = inlined_call_operand.hbm [shape: f32[1,768], index: 6, kind: input, shape index: {}]   ;;  %s5044_s7 = inlined_call_operand.vmem [shape: bf16[256,32], index: 7, kind: input, shape index: {}]   ;;  %s5045_s8 = inlined_call_operand.vmem [shape: f32[1,32], index: 8, kind: input, shape index: {}]   ;;  %s5046_s9 = inlined_call_operand.hbm [shape: f32[2,8,128], index: 9, kind: output, shape index: {}]  }
   0x1   :  { %5050 = sst [smem:[#allocation18_spill]] %s5038_s1 }
   0x2   :  { %5051 = sst [smem:[#allocation19_spill]] %s5039_s2 }
   0x3   :  { %14 = vsyncpa [#allocation3], 0 }
   0x4   :  { %15 = vsyncpa [#allocation6], 0 }
   0x5   :  { %16 = vsyncpa [#allocation9], 0 }
   0x6   :  { %17 = vsyncpa [#allocation4], 0 }
   0x7   :  { %19 = vsyncpa [#allocation4 + $0x1], 0  ;;  %s3976_s30 = smov 0   ;;  %s3978_s10 = smov 0  }
   0x8   :  { %s3980_s11 = smov 0   ;;  %s3982_s12 = smov 0  }
   0x9 LB: > { %5052 = sst [smem:[#allocation15_spill]] %s3911_s11  ;;  %s3997_s13 = sadd.s32 4294967295, %s3915_s12   ;;  %s3915_s12 = sphi %s3982_s12, %s5061_s12   ;;  %s3911_s11 = sphi %s3980_s11, %s5063_s11   ;;  %s3907_s10 = sphi %s3978_s10, %s5065_s10   ;;  %s3903_s30 = sphi %s3976_s30, %s5064_s30  }
   0xa   : > { %s3020_s14 = sadd.s32 4294967294, %s3915_s12   ;;  %s4001_s15 = sadd.s32 1, %s3915_s12  }
   0xb   : > { %5053 = sst [smem:[#allocation16_spill]] %s4001_s15  ;;  %s226_s16 = sadd.s32 1, %s3911_s11 }
   0xc   : > { %s223_s17 = ssub.s32 %s3915_s12, %s4001_s15  ;;  %p236_p0 = scmp.ne.s32.totalorder %s3911_s11, %s3907_s10 }
   0xd   : > { %p224_p1 = scmp.eq.s32.totalorder %s223_s17, 0  ;;  %p237_p2 = scmp.eq.s32.totalorder %s3997_s13, 1 }
   0xe   : > { %p242_p3 = scmp.ne.s32.totalorder %s3907_s10, %s3903_s30  ;;  %p243_p4 = scmp.eq.s32.totalorder %s3020_s14, 1 }
   0xf   : > { %s4012_s18 = scalar_select %p224_p1, %s3911_s11, %s226_s16  }
  0x10   : > { %p4014_p5 = por %p237_p2, %p236_p0  ;;  %p4018_p6 = por %p243_p4, %p242_p3 }
  0x11   : > { %5054 = sst [smem:[#allocation17_spill]] %s4012_s18  ;;  %p3021_p7 = scmp.ge.s32.totalorder %s3915_s12, 1 }
  0x12   : > { %p250_p8 = scmp.lt.s32.totalorder %s3915_s12, 3  ;;  %p3301_p9 = scmp.eq.s32.totalorder %s3997_s13, 0 }
  0x13   : > { %s5058_s2 = sld [smem:[#allocation19_spill]]  ;;  %s3917_s25 = smov [#allocation5]  }
  0x14   : > { %p4025_p10 = pnand %p3021_p7, %p250_p8  ;;  %s276_s26 = sshll.u32 %s3917_s25, 4  ;;  %s277_s26 = int_to_ptr.vmem [resolvable:$true] %s276_s26 }
  0x15   : > { %s5059_s1 = sld [smem:[#allocation18_spill]]  ;;  %s285_s22 = sshll.u32 %s5040_s3, 4  ;;  %s286_s22 = int_to_ptr.hbm [resolvable:$true] %s285_s22 }
  0x16   : > { %p3284_p11 = pneg %p4025_p10  ;;  %s3918_s23 = smov [#allocation2]  }
  0x17   : > { %s264_s25 = sshll.u32 %s3918_s23, 4  ;;  %s3919_s27 = smov [#allocation7]   ;;  %s265_s25 = int_to_ptr.vmem [resolvable:$true] %s264_s25 }
  0x18   : > { %p4039_p12 = pnand %p3301_p9, %p3284_p11  ;;  %s287_s28 = sshll.u32 %s3919_s27, 4  ;;  %s288_s28 = int_to_ptr.vmem [resolvable:$true] %s287_s28 }
  0x19   : > { %s274_s24 = sshll.u32 %s5058_s2, 4  ;;  %s306_s18 = sshll.u32 %s5043_s6, 4  ;;  %s275_s24 = int_to_ptr.hbm [resolvable:$true] %s274_s24  ;;  %s307_s18 = int_to_ptr.hbm [resolvable:$true] %s306_s18 }
  0x1a   : > { %3290 = dma.hbm_to_vmem [thread:$0]  (!%p4039_p12), %s275_s24, 128, %s277_s26, [#allocation6]  }
  0x1b   : > { %s262_s29 = sshll.u32 %s5059_s1, 4  ;;  %s3920_s11 = smov 64   ;;  %s263_s29 = int_to_ptr.hbm [resolvable:$true] %s262_s29 }
  0x1c   : > { %3287 = dma.hbm_to_vmem [thread:$0]  (!%p4039_p12), %s263_s29, 128, %s265_s25, [#allocation3]  }
  0x1d   : > { %s3921_s15 = smov 4   ;;  %s3922_s16 = smov [#allocation8]  }
  0x1e   : > { %3293 = dma.hbm_to_vmem [thread:$0]  (!%p4039_p12), %s286_s22, 128, %s288_s28, [#allocation6], %s3920_s11, %s3920_s11, %s3921_s15  }
  0x1f   : > { %s308_s17 = sshll.u32 %s3922_s16, 4  ;;  %336 = sbr.rel (%p4025_p10) target bundleno = 1588 (0x634), region = 56  ;;  %s309_s17 = int_to_ptr.vmem [resolvable:$true] %s308_s17 }
  0x20   : > { %3296 = dma.hbm_to_vmem [thread:$0]  (!%p4039_p12), %s307_s18, 96, %s309_s17, [#allocation9]  }
  0x24   : > { %3886 = dma.done.wait (%p3301_p9), [#allocation3], 128  }
  0x25   : > { %3888 = vsyncadd (%p3301_p9), [#allocation3], 4294967168 }
  0x26   : > { %3890 = dma.done.wait (%p3301_p9), [#allocation6], 256  }
  0x27   : > { %3892 = vsyncadd (%p3301_p9), [#allocation6], 4294967040 }
  0x28   : > { %3894 = dma.done.wait (%p3301_p9), [#allocation9], 96  }
  0x29   : > { %3896 = vsyncadd (%p3301_p9), [#allocation9], 4294967200  ;;  %s3033_s1 = sshll.u32 %s3997_s13, 2  ;;  %v3233_v0 = vld [vmem:[#allocation7] sm:$0xff]  ;;  %vm413_vm0 = vcmask 130048   ;;  %v439_v40 = vld [vmem:[#allocation2] sm:$0xff] }
  0x2a   : > { %p389_p13 = scmp.lt.s32.totalorder %s3033_s1, 7  ;;  %427 = vmatpush.bf16.msra.mxu0 %v3233_v0  ;;  %v3067_v7 = vld [vmem:[%s5042_s5 + $0x30] sm:$0xf]  ;;  %v3243_v8 = vld [vmem:[%s5042_s5 + $0x44] sm:$0xf0]  ;;  %vm532_vm1 = vcmask 261120  }
  0x2b   : > { %v3240_v9 = vld [vmem:[%s5042_s5 + $0x34] sm:$0xf]  ;;  %v3068_v10 = vor.u32 %v3243_v8, %v3067_v7  ;;  %v3069_v11 = vld [vmem:[%s5042_s5 + $0x48] sm:$0xf0]  ;;  %v3043_v13 = vld [vmem:[%s5042_s5] sm:$0xf] }
  0x2c   : > { %s5067_s1 = smov (!%p389_p13, %s3033_s1), 7  ;;  %v3072_v12 = vor.u32 %v3240_v9, %v3069_v11  ;;  %v3237_v14 = vld [vmem:[%s5042_s5 + $0x14] sm:$0xf0]  ;;  %v3234_v15 = vld [vmem:[%s5042_s5 + $0x4] sm:$0xf]  ;;  %s3924_s21 = smov 32  }
  0x2d   : > { %s3034_s2 = sshll.u32 %s5067_s1, 3  ;;  %545 = vmatpush.bf16.msra.mxu1 %v3068_v10  ;;  %v3044_v16 = vor.u32 %v3237_v14, %v3043_v13  ;;  %v3045_v17 = vld [vmem:[%s5042_s5 + $0x18] sm:$0xf0]  ;;  %v3075_v19 = vld [vmem:[%s5042_s5 + $0x38] sm:$0xf]  ;;  %s3925_s24 = smov 96  }
  0x2e   : > { %s392_s18 = scalar_lea.vmem %s5037_s0, %s3034_s2  ;;  %564 = vmatpush.bf16.msrb.mxu0 %v3072_v12  ;;  %3262 = vmatpush.bf16.msra.mxu2 %v3072_v12  ;;  %v3048_v18 = vor.u32 %v3234_v15, %v3045_v17  ;;  %v3244_v20 = vld [vmem:[%s5042_s5 + $0x4c] sm:$0xf0]  ;;  %v3241_v21 = vld [vmem:[%s5042_s5 + $0x3c] sm:$0xf]  ;;  %v3077_v23 = vld [vmem:[%s5042_s5 + $0x50] sm:$0xf0] }
  0x2f   : > { %v395_v1 = vld [vmem:[%s392_s18] sm:$0xff]  ;;  %v396_v2 = vld [vmem:[%s392_s18 + $0x8] sm:$0xff]  ;;  %v397_v4 = vld [vmem:[%s392_s18 + $0x10] sm:$0xff]  ;;  %v3076_v22 = vor.u32 %v3244_v20, %v3075_v19  ;;  %v3080_v24 = vor.u32 %v3241_v21, %v3077_v23  ;;  %vm1566_vm2 = vcmask 64512   ;;  %vm1986_vm3 = vcmask 1043456   ;;  %s385_s27 = sand.u32 1, %s3907_s10  }
  0x30   : > { %v399_v3 = vpack.c.bf16 %v396_v2, %v395_v1  ;;  %v398_v5 = vld [vmem:[%s392_s18 + $0x18] sm:$0xff]  ;;  %v3051_v25 = vld [vmem:[%s5042_s5 + $0x8] sm:$0xf]  ;;  %v3238_v26 = vld [vmem:[%s5042_s5 + $0x1c] sm:$0xf0]  ;;  %s3923_s18 = smov 64  }
  0x31   : > { %v400_v6 = vpack.c.bf16 %v398_v5, %v397_v4  ;;  %546 = vmatpush.bf16.msra.mxu1 %v3044_v16  ;;  %3264 = vmatpush.bf16.msra.mxu3 %v3076_v22  ;;  %v3235_v27 = vld [vmem:[%s5042_s5 + $0xc] sm:$0xf]  ;;  %v3052_v28 = vor.u32 %v3238_v26, %v3051_v25  ;;  %v3053_v29 = vld [vmem:[%s5042_s5 + $0x20] sm:$0xf0]  ;;  %v3085_v33 = vld [vmem:[%s5042_s5 + $0x58] sm:$0xf0] }
  0x32   : > { %3039 = vmatmul.msk.bf16.vlgmr.msra.gmra.mxu0 %vm413_vm0, %v399_v3  ;;  %3263 = vmatpush.bf16.msra.mxu2 %v3048_v18  ;;  %v3056_v30 = vor.u32 %v3235_v27, %v3053_v29  ;;  %v3242_v32 = vld [vmem:[%s5042_s5 + $0x44] sm:$0xf]  ;;  %v3236_v34 = vld [vmem:[%s5042_s5 + $0x14] sm:$0xf]  ;;  %v3061_v36 = vld [vmem:[%s5042_s5 + $0x28] sm:$0xf0] }
  0x33   : > { %565 = vmatpush.bf16.msrb.mxu0 %v3048_v18  ;;  %v3088_v35 = vor.u32 %v3242_v32, %v3085_v33  ;;  %v3591_v37 = vld [vmem:[%s5041_s4] ss:$0 sm:$0xff]  ;;  %v3064_v38 = vor.u32 %v3236_v34, %v3061_v36  ;;  %v3245_v48 = vld [vmem:[%s5042_s5 + $0x54] sm:$0xf0]  ;;  %v3059_v49 = vld [vmem:[%s5042_s5 + $0x10] sm:$0xf] }
  0x34   : > { %v3083_v47 = vld [vmem:[%s5042_s5 + $0x40] sm:$0xf]  ;;  %v3239_v51 = vld [vmem:[%s5042_s5 + $0x24] sm:$0xf0]  ;;  %v4162_v60 = vld [vmem:[#allocation8] sm:$0x3f] }
  0x35   : > { %583 = vmatpush.bf16.msrb.mxu1 %v3076_v22  ;;  %3265 = vmatpush.bf16.msra.mxu3 %v3052_v28  ;;  %v3084_v50 = vor.u32 %v3245_v48, %v3083_v47  ;;  %v3060_v52 = vor.u32 %v3239_v51, %v3059_v49  ;;  %v460_v61 = vperm.slane %v4162_v60, 0  ;;  %v462_v5 = vperm.slane %v4162_v60, 2  ;;  %s3032_s28 = sshll.u32 %s385_s27, 3  ;;  %s3230_s16 = sshll.u32 %s3997_s13, 3 }
  0x36   : > { %640 = vmatpush.bf16.msrb.mxu2 %v3088_v35  ;;  %v465_v34 = vperm.slane %v4162_v60, 5  ;;  %vm2692_vm4 = vcmask 523264   ;;  %vm2697_vm5 = vcmask 785408   ;;  %s2915_s2 = scalar_lea.hbm %s5046_s9, %s3230_s16  ;;  %s2905_s13 = scalar_lea.sflag [#allocation4], %s385_s27 }
  0x37   : > { %602 = vmatpush.bf16.msra.mxu0 %v3080_v24  ;;  %v461_v24 = vperm.slane %v4162_v60, 1  ;;  %s3861_s14 = scalar_lea.hbm %s5046_s9, 16 }
  0x39   : > { %584 = vmatpush.bf16.msrb.mxu1 %v3052_v28 }
  0x3a   : > { %641 = vmatpush.bf16.msrb.mxu2 %v3064_v38  ;;  %v463_v38 = vperm.slane %v4162_v60, 3 }
  0x3b   : > { %603 = vmatpush.bf16.msra.mxu0 %v3056_v30 }
  0x42   : > { %3040 = vmatmul.msk.bf16.gmra.mxu0 %vm413_vm0, %v400_v6 }
  0xaf   : > { %v429_v31 = vpop.f32.mrf.mxu0 }
  0xb0   : > { %v430_v39 = vadd.f32 %v3591_v37, %v429_v31 }
  0xb2   : > { %v440_v43 = vadd.f32 %v439_v40, %v430_v39 }
  0xb7   : > { %v431_v41 = vpop.f32.mrf.mxu0 }
  0xb8   : > { %v432_v42 = vadd.f32 %v3591_v37, %v431_v41 }
  0xba   : > { %v441_v44 = vadd.f32 %v439_v40, %v432_v42 }
  0xbc   : > { %v444_v45 = vpack.c.bf16 %v441_v44, %v440_v43 }
  0xbe   : > { %3089 = vmatmul.msk.bf16.vlgmr.msra.gmra.mxu1 %vm532_vm1, %v444_v45  ;;  %3091 = vmatmul.msk.bf16.vlgmr.msrb.gmra.mxu0 %vm532_vm1, %v444_v45 }
  0xbf   : > { %v434_v46 = vpop.f32.mrf.mxu0  ;;  %621 = vmatpush.bf16.msra.mxu1 %v3084_v50 }
  0xc0   : > { %v435_v53 = vadd.f32 %v3591_v37, %v434_v46 }
  0xc2   : > { %v442_v56 = vadd.f32 %v439_v40, %v435_v53 }
  0xc3   : > { %622 = vmatpush.bf16.msra.mxu1 %v3060_v52 }
  0xc7   : > { %v436_v54 = vpop.f32.mrf.mxu0 }
  0xc8   : > { %v437_v55 = vadd.f32 %v3591_v37, %v436_v54 }
  0xca   : > { %v443_v57 = vadd.f32 %v439_v40, %v437_v55 }
  0xcc   : > { %v445_v58 = vpack.c.bf16 %v443_v57, %v442_v56 }
  0xce   : > { %3090 = vmatmul.msk.bf16.gmra.mxu1 %vm532_vm1, %v445_v58  ;;  %3092 = vmatmul.msk.bf16.vlgmr.msra.gmra.mxu2 %vm532_vm1, %v445_v58 }
  0xcf   : > { %3094 = vmatmul.msk.bf16.vlgmr.msra.gmra.mxu3 %vm532_vm1, %v445_v58  ;;  %3095 = vmatmul.msk.bf16.vlgmr.msra.gmra.mxu0 %vm532_vm1, %v444_v45 }
  0xde   : > { %3093 = vmatmul.msk.bf16.vlgmr.msrb.gmra.mxu1 %vm532_vm1, %v444_v45  ;;  %3099 = vmatmul.msk.bf16.vlgmr.msrb.gmra.mxu2 %vm532_vm1, %v444_v45 }
  0xdf   : > { %3096 = vmatmul.msk.bf16.gmra.mxu0 %vm532_vm1, %v445_v58 }
  0xee   : > { %3097 = vmatmul.msk.bf16.vlgmr.msra.gmra.mxu1 %vm532_vm1, %v444_v45  ;;  %3100 = vmatmul.msk.bf16.gmra.mxu2 %vm532_vm1, %v445_v58 }
  0xfe   : > { %3098 = vmatmul.msk.bf16.gmra.mxu1 %vm532_vm1, %v445_v58 }
 0x13b   : > { %v548_v59 = vpop.f32.mrf.mxu1  ;;  %v567_v1 = vpop.f32.mrf.mxu0 }
 0x13c   : > { %v549_v63 = vadd.f32 %v548_v59, %v460_v61  ;;  %v4188_v31 = vadd.f32 %v567_v1, %v461_v24 }
 0x13e   : > { %v893_v39 = vpack.c.bf16 %v549_v63, %v549_v63 }
 0x143   : > { %v550_v62 = vpop.f32.mrf.mxu1  ;;  %v569_v4 = vpop.f32.mrf.mxu0 }
 0x144   : > { %v4165_v0 = vadd.f32 %v550_v62, %v460_v61  ;;  %v4186_v28 = vadd.f32 %v569_v4, %v461_v24  ;;  %v464_v4 = vperm.slane %v4162_v60, 4 }
 0x146   : > { %v4168_v2 = vpack.i.bf16 %v4165_v0, %v549_v63  ;;  %v3406_v35 = vpack.i.bf16 %v4186_v28, %v4188_v31  ;;  %v894_v54 = vpack.c.bf16 %v4165_v0, %v4165_v0 }
 0x148   : > { %3362 = vrot.lane.b32.xlu1 %v4168_v2, %s3923_s18 }
 0x14b   : > { %v553_v3 = vpop.f32.mrf.mxu1 }
 0x14c   : > { %v554_v12 = vadd.f32 %v553_v3, %v460_v61  ;;  %v605_v13 = vpop.f32.mrf.mxu0 }
 0x14d   : > { %v4206_v45 = vadd.f32 %v605_v13, %v463_v38 }
 0x14e   : > { %v895_v19 = vpack.c.bf16 %v554_v12, %v554_v12 }
 0x150   : > { %3377 = vrot.lane.b32.xlu1 %v4168_v2, %s3924_s21 }
 0x151   : > { %v4175_v6 = vpop.f32.mrf.mxu2 }
 0x152   : > { %v591_v7 = vpop.f32.mrf.mxu3  ;;  %v4245_v1 = vadd.f32 %v4175_v6, %v461_v24 }
 0x153   : > { %v592_v8 = vadd.f32 %v591_v7, %v462_v5  ;;  %v555_v9 = vpop.f32.mrf.mxu1 }
 0x154   : > { %v556_v26 = vadd.f32 %v555_v9, %v460_v61  ;;  %v607_v29 = vpop.f32.mrf.mxu0 }
 0x155   : > { %v927_v10 = vpack.c.bf16 %v592_v8, %v592_v8  ;;  %v4199_v41 = vadd.f32 %v607_v29, %v463_v38 }
 0x156   : > { %v896_v33 = vpack.c.bf16 %v556_v26, %v556_v26  ;;  %v3371_v53 = vpack.i.bf16 %v556_v26, %v554_v12 }
 0x157   : > { %v1000_v11 = vsel %vm532_vm1, %v927_v10, 0  ;;  %v3396_v49 = vpack.i.bf16 %v4199_v41, %v4206_v45 }
 0x158   : > { %1009 = vmatpush.bf16.xpose.msrb.mxu0 %v1000_v11 }
 0x159   : > { %v4178_v14 = vpop.f32.mrf.mxu2 }
 0x15a   : > { %v593_v15 = vpop.f32.mrf.mxu3  ;;  %v4242_v0 = vadd.f32 %v4178_v14, %v461_v24 }
 0x15b   : > { %v594_v16 = vadd.f32 %v593_v15, %v462_v5  ;;  %v586_v17 = vpop.f32.mrf.mxu1 }
 0x15c   : > { %v587_v18 = vadd.f32 %v586_v17, %v462_v5  ;;  %v610_v48 = vpop.f32.mrf.mxu0 }
 0x15d   : > { %v3366_v20 = vpack.i.bf16 %v594_v16, %v592_v8  ;;  %v928_v21 = vpack.c.bf16 %v594_v16, %v594_v16  ;;  %v4230_v59 = vadd.f32 %v610_v48, %v463_v38 }
 0x15e   : > { %v925_v22 = vpack.c.bf16 %v587_v18, %v587_v18 }
 0x15f   : > { %3367 = vrot.lane.b32.xlu2 %v3366_v20, %s3925_s24  ;;  %3103 = vmatmul.msk.bf16.vlgmr.msrb.gmra.mxu0 %vm532_vm1, %v895_v19  ;;  %v1019_v23 = vsel %vm532_vm1, %v928_v21, 0 }
 0x160   : > { %3392 = vrot.lane.b32.xlu1 %v3366_v20, %s3924_s21  ;;  %1028 = vmatpush.bf16.xpose.msrb.mxu1 %v1019_v23  ;;  %v962_v25 = vsel %vm532_vm1, %v925_v22, 0 }
 0x161   : > { %v643_v27 = vpop.f32.mrf.mxu2  ;;  %971 = vmatpush.bf16.xpose.msrb.mxu3 %v962_v25 }
 0x162   : > { %v4202_v43 = vadd.f32 %v643_v27, %v465_v34 }
 0x163   : > { %v588_v30 = vpop.f32.mrf.mxu1 }
 0x164   : > { %v589_v32 = vadd.f32 %v588_v30, %v462_v5  ;;  %v612_v55 = vpop.f32.mrf.mxu0 }
 0x165   : > { %v4226_v57 = vadd.f32 %v612_v55, %v463_v38 }
 0x166   : > { %v3351_v36 = vpack.i.bf16 %v589_v32, %v587_v18  ;;  %v926_v37 = vpack.c.bf16 %v589_v32, %v589_v32 }
 0x167   : > { %3382 = vrot.lane.b32.xlu2 %v3366_v20, %s3923_s18  ;;  %3104 = vmatmul.msk.bf16.vlgmr.msrb.gmra.mxu1 %vm532_vm1, %v896_v33  ;;  %v3456_v63 = vpack.i.bf16 %v4226_v57, %v4230_v59 }
 0x168   : > { %3407 = vrot.lane.b32.xlu1 %v3406_v35, %s3925_s24  ;;  %3352 = vrot.lane.b32.xlu0 %v3351_v36, %s3925_s24  ;;  %v981_v40 = vsel %vm532_vm1, %v926_v37, 0 }
 0x169   : > { %3101 = vmatmul.msk.bf16.vlgmr.msrb.gmra.mxu3 %vm532_vm1, %v893_v39  ;;  %v645_v42 = vpop.f32.mrf.mxu2 }
 0x16a   : > { %v4204_v44 = vadd.f32 %v645_v42, %v465_v34  ;;  %990 = vmatpush.bf16.xpose.msra.mxu3 %v981_v40 }
 0x16b   : > { %v624_v46 = vpop.f32.mrf.mxu1 }
 0x16c   : > { %v4210_v47 = vpack.i.bf16 %v4204_v44, %v4202_v43  ;;  %v4266_v8 = vadd.f32 %v624_v46, %v464_v4 }
 0x16f   : > { %3397 = vrot.lane.b32.xlu2 %v3396_v49, %s3925_s24 }
 0x170   : > { %3432 = vrot.lane.b32.xlu1 %v3406_v35, %s3924_s21  ;;  %3357 = vrot.lane.b32.xlu0 %v4168_v2, %s3925_s24  ;;  %v3441_v2 = vpack.i.bf16 %v4242_v0, %v4245_v1 }
 0x171   : > { %v648_v50 = vpop.f32.mrf.mxu2 }
 0x172   : > { %v4218_v51 = vadd.f32 %v648_v50, %v465_v34 }
 0x173   : > { %v626_v52 = vpop.f32.mrf.mxu1 }
 0x174   : > { %v4264_v60 = vadd.f32 %v626_v52, %v464_v4 }
 0x176   : > { %v3476_v9 = vpack.i.bf16 %v4264_v60, %v4266_v8 }
 0x177   : > { %3412 = vrot.lane.b32.xlu2 %v3396_v49, %s3923_s18 }
 0x178   : > { %3447 = vrot.lane.b32.xlu1 %v3351_v36, %s3923_s18  ;;  %3372 = vrot.lane.b32.xlu0 %v3371_v53, %s3925_s24 }
 0x179   : > { %3102 = vmatmul.msk.bf16.vlgmr.msra.gmra.mxu3 %vm532_vm1, %v894_v54  ;;  %v650_v56 = vpop.f32.mrf.mxu2 }
 0x17a   : > { %v4228_v58 = vadd.f32 %v650_v56, %v465_v34 }
 0x17b   : > { %v629_v62 = vpop.f32.mrf.mxu1 }
 0x17c   : > { %v4234_v61 = vpack.i.bf16 %v4228_v58, %v4218_v51  ;;  %v4255_v7 = vadd.f32 %v629_v62, %v464_v4 }
 0x17f   : > { %3422 = vrot.lane.b32.xlu2 %v3396_v49, %s3924_s21 }
 0x180   : > { %3457 = vrot.lane.b32.xlu1 %v3456_v63, %s3925_s24  ;;  %3387 = vrot.lane.b32.xlu0 %v3371_v53, %s3923_s18 }
 0x183   : > { %v631_v3 = vpop.f32.mrf.mxu1 }
 0x184   : > { %v4253_v5 = vadd.f32 %v631_v3, %v464_v4 }
 0x186   : > { %v3486_v6 = vpack.i.bf16 %v4253_v5, %v4255_v7 }
 0x187   : > { %3442 = vrot.lane.b32.xlu2 %v3441_v2, %s3924_s21 }
 0x188   : > { %3467 = vrot.lane.b32.xlu1 %v3456_v63, %s3924_s21  ;;  %3402 = vrot.lane.b32.xlu0 %v3371_v53, %s3924_s21 }
 0x18f   : > { %3452 = vrot.lane.b32.xlu2 %v3351_v36, %s3924_s21  ;;  %v4292_v36 = vld [vmem:[#allocation5] sm:$0xff] }
 0x190   : > { %3487 = vrot.lane.b32.xlu1 %v3486_v6, %s3925_s24  ;;  %3417 = vrot.lane.b32.xlu0 %v3406_v35, %s3923_s18 }
 0x197   : > { %3462 = vrot.lane.b32.xlu2 %v3456_v63, %s3923_s18 }
 0x198   : > { %3427 = vrot.lane.b32.xlu0 %v3441_v2, %s3925_s24 }
 0x19f   : > { %3477 = vrot.lane.b32.xlu2 %v3476_v9, %s3923_s18 }
 0x1a0   : > { %3437 = vrot.lane.b32.xlu0 %v3441_v2, %s3923_s18 }
 0x1a7   : > { %3492 = vrot.lane.b32.xlu2 %v3486_v6, %s3923_s18 }
 0x1a8   : > { %3472 = vrot.lane.b32.xlu0 %v3476_v9, %s3925_s24 }
 0x1b0   : > { %3482 = vrot.lane.b32.xlu0 %v3476_v9, %s3924_s21 }
 0x1b8   : > { %3497 = vrot.lane.b32.xlu0 %v3486_v6, %s3924_s21 }
 0x1b9   : > { %v3368_v10 = vpop.permute.xlu2 %3367 }
 0x1ba   : > { %v3370_v11 = vunpack.i.h.bf16 %v3368_v10  ;;  %v3369_v12 = vunpack.i.l.bf16 %v3368_v10  ;;  %v4278_v17 = vpop.permute.xlu1 %3362 }
 0x1bc   : > { %v932_v13 = vpack.c.bf16 %v3370_v11, %v3370_v11  ;;  %v931_v14 = vpack.c.bf16 %v3369_v12, %v3369_v12 }
 0x1be   : > { %v1076_v15 = vsel %vm532_vm1, %v931_v14, 0  ;;  %v1095_v16 = vsel %vm532_vm1, %v932_v13, 0 }
 0x1bf   : > { %1085 = vmatpush.bf16.xpose.msra.mxu0 %v1076_v15  ;;  %1104 = vmatpush.bf16.xpose.msra.mxu1 %v1095_v16 }
 0x1c1   : > { %v3383_v18 = vpop.permute.xlu2 %3382 }
 0x1c2   : > { %v3385_v19 = vunpack.i.h.bf16 %v3383_v18  ;;  %v3384_v20 = vunpack.i.l.bf16 %v3383_v18  ;;  %v4284_v26 = vpop.permute.xlu1 %3377 }
 0x1c4   : > { %v936_v21 = vpack.c.bf16 %v3385_v19, %v3385_v19  ;;  %v935_v22 = vpack.c.bf16 %v3384_v20, %v3384_v20 }
 0x1c6   : > { %v1152_v23 = vsel %vm532_vm1, %v935_v22, 0  ;;  %v1171_v24 = vsel %vm532_vm1, %v936_v21, 0 }
 0x1c7   : > { %1161 = vmatpush.bf16.xpose.msrb.mxu0 %v1152_v23  ;;  %1180 = vmatpush.bf16.xpose.msrb.mxu1 %v1171_v24 }
 0x1c9   : > { %v4282_v25 = vpop.permute.xlu2 %3397 }
 0x1d1   : > { %v4286_v27 = vpop.permute.xlu2 %3412 }
 0x1d2   : > { %v3393_v29 = vpop.permute.xlu1 %3392 }
 0x1d3   : > { %v3395_v3 = vunpack.i.h.bf16 %v3393_v29  ;;  %v3394_v4 = vunpack.i.l.bf16 %v3393_v29 }
 0x1d5   : > { %v940_v19 = vpack.c.bf16 %v3395_v3, %v3395_v3  ;;  %v939_v20 = vpack.c.bf16 %v3394_v4, %v3394_v4 }
 0x1d9   : > { %v4288_v30 = vpop.permute.xlu2 %3422 }
 0x1da   : > { %v4290_v32 = vpop.permute.xlu1 %3407  ;;  %v3353_v33 = vpop.permute.xlu0 %3352 }
 0x1db   : > { %v3355_v34 = vunpack.i.h.bf16 %v3353_v33  ;;  %v3354_v35 = vunpack.i.l.bf16 %v3353_v33 }
 0x1dc   : > { %v1011_v37 = vpop.f32.mrf.mxu0 }
 0x1dd   : > { %v930_v38 = vpack.c.bf16 %v3355_v34, %v3355_v34  ;;  %v929_v39 = vpack.c.bf16 %v3354_v35, %v3354_v35  ;;  %v4295_v40 = vadd.f32 %v1011_v37, %v4292_v36 }
 0x1df   : > { %v1038_v42 = vsel %vm532_vm1, %v929_v39, 0  ;;  %v1057_v46 = vsel %vm532_vm1, %v930_v38, 0  ;;  %v1573_v49 = vsel %vm1566_vm2, %v4295_v40, -inf }
 0x1e0   : > { %1047 = vmatpush.bf16.xpose.msra.mxu2 %v1038_v42  ;;  %1066 = vmatpush.bf16.xpose.msrb.mxu3 %v1057_v46 }
 0x1e1   : > { %v4299_v48 = vpop.permute.xlu2 %3442 }
 0x1e2   : > { %v4303_v50 = vpop.permute.xlu1 %3432  ;;  %1574 = vmax.xlane.f32.xlu0 %v1573_v49  ;;  %v3358_v52 = vpop.permute.xlu0 %3357 }
 0x1e3   : > { %v3360_v53 = vunpack.i.h.bf16 %v3358_v52  ;;  %v3359_v54 = vunpack.i.l.bf16 %v3358_v52  ;;  %v3365_v52 = vunpack.i.h.bf16 %v4278_v17 }
 0x1e4   : > { %v1013_v55 = vpop.f32.mrf.mxu0  ;;  %v1030_v56 = vpop.f32.mrf.mxu1 }
 0x1e5   : > { %v898_v62 = vpack.c.bf16 %v3360_v53, %v3360_v53  ;;  %v897_v63 = vpack.c.bf16 %v3359_v54, %v3359_v54  ;;  %v4306_v2 = vadd.f32 %v1030_v56, %v4292_v36  ;;  %v3364_v53 = vunpack.i.l.bf16 %v4278_v17 }
 0x1e6   : > { %v1228_v54 = vsel %vm532_vm1, %v939_v20, 0  ;;  %v1247_v55 = vsel %vm532_vm1, %v940_v19, 0  ;;  %v941_v56 = vpack.c.bf16 %v4206_v45, %v4206_v45  ;;  %v902_v3 = vpack.c.bf16 %v3365_v52, %v3365_v52 }
 0x1e7   : > { %3105 = vmatmul.msk.bf16.vlgmr.msra.gmra.mxu2 %vm532_vm1, %v897_v63  ;;  %3106 = vmatmul.msk.bf16.vlgmr.msrb.gmra.mxu3 %vm532_vm1, %v898_v62  ;;  %v1576_v6 = vsel %vm1566_vm2, %v4306_v2, -inf  ;;  %v942_v62 = vpack.c.bf16 %v4199_v41, %v4199_v41  ;;  %v901_v4 = vpack.c.bf16 %v3364_v53, %v3364_v53  ;;  %v943_v45 = vpack.c.bf16 %v4230_v59, %v4230_v59 }
 0x1e8   : > { %1577 = vmax.xlane.f32.xlu1 %v1576_v6  ;;  %v1266_v17 = vsel %vm532_vm1, %v941_v56, 0  ;;  %v944_v41 = vpack.c.bf16 %v4226_v57, %v4226_v57  ;;  %v3380_v20 = vunpack.i.h.bf16 %v4284_v26  ;;  %v3414_v56 = vunpack.i.l.bf16 %v4286_v27 }
 0x1e9   : > { %v3453_v9 = vpop.permute.xlu2 %3452  ;;  %v1304_v19 = vsel %vm532_vm1, %v943_v45, 0 }
 0x1ea   : > { %v3455_v10 = vunpack.i.h.bf16 %v3453_v9  ;;  %v3454_v11 = vunpack.i.l.bf16 %v3453_v9  ;;  %v3448_v12 = vpop.permute.xlu1 %3447  ;;  %v3373_v13 = vpop.permute.xlu0 %3372  ;;  %v1285_v9 = vsel %vm532_vm1, %v942_v62, 0  ;;  %v1323_v59 = vsel %vm532_vm1, %v944_v41, 0 }
 0x1eb   : > { %v3450_v14 = vunpack.i.h.bf16 %v3448_v12  ;;  %v3449_v15 = vunpack.i.l.bf16 %v3448_v12  ;;  %v3375_v16 = vunpack.i.h.bf16 %v3373_v13  ;;  %v3374_v18 = vunpack.i.l.bf16 %v3373_v13 }
 0x1ec   : > { %v938_v21 = vpack.c.bf16 %v3455_v10, %v3455_v10  ;;  %v937_v22 = vpack.c.bf16 %v3454_v11, %v3454_v11  ;;  %v973_v23 = vpop.f32.mrf.mxu3  ;;  %v1032_v24 = vpop.f32.mrf.mxu1 }
 0x1ed   : > { %v934_v29 = vpack.c.bf16 %v3450_v14, %v3450_v14  ;;  %v933_v33 = vpack.c.bf16 %v3449_v15, %v3449_v15  ;;  %v900_v34 = vpack.c.bf16 %v3375_v16, %v3375_v16  ;;  %v899_v35 = vpack.c.bf16 %v3374_v18, %v3374_v18 }
 0x1ee   : > { %v4313_v37 = vadd.f32 %v973_v23, %v4292_v36  ;;  %v1190_v38 = vsel %vm532_vm1, %v937_v22, 0  ;;  %v1209_v39 = vsel %vm532_vm1, %v938_v21, 0  ;;  %v3400_v16 = vunpack.i.h.bf16 %v4282_v25 }
 0x1ef   : > { %v1114_v42 = vsel %vm532_vm1, %v933_v33, 0  ;;  %v1133_v46 = vsel %vm532_vm1, %v934_v29, 0  ;;  %3107 = vmatmul.msk.bf16.vlgmr.msra.gmra.mxu0 %vm532_vm1, %v899_v35  ;;  %3108 = vmatmul.msk.bf16.vlgmr.msra.gmra.mxu1 %vm532_vm1, %v900_v34  ;;  %v3399_v18 = vunpack.i.l.bf16 %v4282_v25  ;;  %v3379_v21 = vunpack.i.l.bf16 %v4284_v26 }
 0x1f0   : > { %1123 = vmatpush.bf16.xpose.msrb.mxu2 %v1114_v42  ;;  %1142 = vmatpush.bf16.xpose.msra.mxu3 %v1133_v46  ;;  %v1567_v49 = vsel %vm1566_vm2, %v4313_v37, -inf  ;;  %v946_v22 = vpack.c.bf16 %v3400_v16, %v3400_v16  ;;  %v906_v29 = vpack.c.bf16 %v3380_v20, %v3380_v20  ;;  %v3424_v16 = vunpack.i.l.bf16 %v4288_v30 }
 0x1f1   : > { %1237 = vmatpush.bf16.xpose.msra.mxu0 %v1228_v54  ;;  %1256 = vmatpush.bf16.xpose.msra.mxu1 %v1247_v55  ;;  %v945_v25 = vpack.c.bf16 %v3399_v18, %v3399_v18  ;;  %v905_v33 = vpack.c.bf16 %v3379_v21, %v3379_v21  ;;  %v3415_v55 = vunpack.i.h.bf16 %v4286_v27 }
 0x1f2   : > { %1568 = vmax.xlane.f32.xlu0 %v1567_v49  ;;  %v3388_v6 = vpop.permute.xlu0 %3387  ;;  %v3458_v23 = vpop.permute.xlu1 %3457  ;;  %v1361_v42 = vsel %vm532_vm1, %v946_v22, 0 }
 0x1f3   : > { %v3390_v10 = vunpack.i.h.bf16 %v3388_v6  ;;  %v3389_v11 = vunpack.i.l.bf16 %v3388_v6  ;;  %v3460_v35 = vunpack.i.h.bf16 %v3458_v23  ;;  %v3463_v6 = vpop.permute.xlu2 %3462 }
 0x1f4   : > { %v975_v63 = vpop.f32.mrf.mxu3  ;;  %v3465_v27 = vunpack.i.h.bf16 %v3463_v6 }
 0x1f5   : > { %v904_v13 = vpack.c.bf16 %v3390_v10, %v3390_v10  ;;  %v903_v14 = vpack.c.bf16 %v3389_v11, %v3389_v11  ;;  %v948_v49 = vpack.c.bf16 %v3460_v35, %v3460_v35  ;;  %v3464_v10 = vunpack.i.l.bf16 %v3463_v6 }
 0x1f6   : > { %v952_v41 = vpack.c.bf16 %v3465_v27, %v3465_v27 }
 0x1f7   : > { %3109 = vmatmul.msk.bf16.vlgmr.msrb.gmra.mxu2 %vm532_vm1, %v901_v4  ;;  %3110 = vmatmul.msk.bf16.vlgmr.msra.gmra.mxu3 %vm532_vm1, %v902_v3  ;;  %v1399_v63 = vsel %vm532_vm1, %v948_v49, 0  ;;  %v950_v3 = vpack.c.bf16 %v3415_v55, %v3415_v55  ;;  %v949_v4 = vpack.c.bf16 %v3414_v56, %v3414_v56 }
 0x1f8   : > { %1199 = vmatpush.bf16.xpose.msra.mxu2 %v1190_v38  ;;  %1218 = vmatpush.bf16.xpose.msrb.mxu3 %v1209_v39  ;;  %v3459_v38 = vunpack.i.l.bf16 %v3458_v23  ;;  %v1342_v39 = vsel %vm532_vm1, %v945_v25, 0 }
 0x1f9   : > { %v1418_v11 = vsel %vm532_vm1, %v949_v4, 0  ;;  %v1437_v45 = vsel %vm532_vm1, %v950_v3, 0 }
 0x1fa   : > { %v3403_v34 = vpop.permute.xlu0 %3402  ;;  %v947_v52 = vpack.c.bf16 %v3459_v38, %v3459_v38  ;;  %v3468_v20 = vpop.permute.xlu1 %3467 }
 0x1fb   : > { %v3405_v26 = vunpack.i.h.bf16 %v3403_v34  ;;  %v3404_v46 = vunpack.i.l.bf16 %v3403_v34  ;;  %v3470_v25 = vunpack.i.h.bf16 %v3468_v20  ;;  %v3469_v23 = vunpack.i.l.bf16 %v3468_v20 }
 0x1fc   : > { %v992_v12 = vpop.f32.mrf.mxu3  ;;  %v1380_v62 = vsel %vm532_vm1, %v947_v52, 0 }
 0x1fd   : > { %v4340_v15 = vadd.f32 %v992_v12, %v4292_v36  ;;  %v908_v53 = vpack.c.bf16 %v3405_v26, %v3405_v26  ;;  %v907_v54 = vpack.c.bf16 %v3404_v46, %v3404_v46  ;;  %v951_v12 = vpack.c.bf16 %v3464_v10, %v3464_v10 }
 0x1fe   : > { %v956_v34 = vpack.c.bf16 %v3470_v25, %v3470_v25  ;;  %v955_v35 = vpack.c.bf16 %v3469_v23, %v3469_v23 }
 0x1ff   : > { %3111 = vmatmul.msk.bf16.vlgmr.msrb.gmra.mxu0 %vm532_vm1, %v903_v14  ;;  %3112 = vmatmul.msk.bf16.vlgmr.msrb.gmra.mxu1 %vm532_vm1, %v904_v13  ;;  %v1570_v57 = vsel %vm1566_vm2, %v4340_v15, -inf  ;;  %v3425_v14 = vunpack.i.h.bf16 %v4288_v30  ;;  %v1456_v18 = vsel %vm532_vm1, %v951_v12, 0 }
 0x200   : > { %1275 = vmatpush.bf16.xpose.msrb.mxu2 %v1266_v17  ;;  %1294 = vmatpush.bf16.xpose.msra.mxu3 %v1285_v9  ;;  %v909_v17 = vpack.c.bf16 %v4188_v31, %v4188_v31  ;;  %v910_v9 = vpack.c.bf16 %v4186_v28, %v4186_v28  ;;  %v911_v31 = vpack.c.bf16 %v4245_v1, %v4245_v1  ;;  %v3409_v1 = vunpack.i.l.bf16 %v4290_v32 }
 0x201   : > { %1313 = vmatpush.bf16.xpose.msrb.mxu0 %v1304_v19  ;;  %1332 = vmatpush.bf16.xpose.msrb.mxu1 %v1323_v59  ;;  %v912_v28 = vpack.c.bf16 %v4242_v0, %v4242_v0  ;;  %v1475_v19 = vsel %vm532_vm1, %v952_v41, 0  ;;  %v3410_v59 = vunpack.i.h.bf16 %v4290_v32  ;;  %v953_v0 = vpack.c.bf16 %v3424_v16, %v3424_v16 }
 0x202   : > { %1571 = vmax.xlane.f32.xlu1 %v1570_v57  ;;  %v3418_v13 = vpop.permute.xlu0 %3417  ;;  %v954_v57 = vpack.c.bf16 %v3425_v14, %v3425_v14  ;;  %v913_v22 = vpack.c.bf16 %v3409_v1, %v3409_v1  ;;  %v1551_v26 = vsel %vm532_vm1, %v956_v34, 0  ;;  %v3434_v41 = vunpack.i.l.bf16 %v4303_v50 }
 0x203   : > { %v914_v21 = vpack.c.bf16 %v3410_v59, %v3410_v59  ;;  %v3420_v46 = vunpack.i.h.bf16 %v3418_v13  ;;  %v3419_v49 = vunpack.i.l.bf16 %v3418_v13  ;;  %v3488_v13 = vpop.permute.xlu1 %3487  ;;  %v3445_v59 = vunpack.i.h.bf16 %v4299_v48 }
 0x204   : > { %v994_v24 = vpop.f32.mrf.mxu3  ;;  %v3490_v14 = vunpack.i.h.bf16 %v3488_v13  ;;  %v3489_v16 = vunpack.i.l.bf16 %v3488_v13 }
 0x205   : > { %v1494_v24 = vsel %vm532_vm1, %v953_v0, 0  ;;  %v918_v55 = vpack.c.bf16 %v3420_v46, %v3420_v46  ;;  %v917_v56 = vpack.c.bf16 %v3419_v49, %v3419_v49  ;;  %v924_v0 = vpack.c.bf16 %v3445_v59, %v3445_v59 }
 0x206   : > { %v1958_v1 = vpack.c.bf16 %v3490_v14, %v3490_v14 }
 0x207   : > { %3113 = vmatmul.msk.bf16.vlgmr.msra.gmra.mxu2 %vm532_vm1, %v905_v33  ;;  %3114 = vmatmul.msk.bf16.vlgmr.msrb.gmra.mxu3 %vm532_vm1, %v906_v29  ;;  %v1513_v29 = vsel %vm532_vm1, %v954_v57, 0  ;;  %v1957_v57 = vpack.c.bf16 %v3489_v16, %v3489_v16 }
 0x208   : > { %1351 = vmatpush.bf16.xpose.msra.mxu2 %v1342_v39  ;;  %1370 = vmatpush.bf16.xpose.msrb.mxu3 %v1361_v42  ;;  %v1532_v42 = vsel %vm532_vm1, %v955_v35, 0 }
 0x20a   : > { %v3428_v30 = vpop.permute.xlu0 %3427 }
 0x20b   : > { %v3430_v33 = vunpack.i.h.bf16 %v3428_v30  ;;  %v3429_v32 = vunpack.i.l.bf16 %v3428_v30 }
 0x20d   : > { %v916_v38 = vpack.c.bf16 %v3430_v33, %v3430_v33  ;;  %v915_v39 = vpack.c.bf16 %v3429_v32, %v3429_v32 }
 0x20f   : > { %3115 = vmatmul.msk.bf16.vlgmr.msra.gmra.mxu0 %vm532_vm1, %v907_v54  ;;  %3116 = vmatmul.msk.bf16.vlgmr.msra.gmra.mxu1 %vm532_vm1, %v908_v53  ;;  %v1951_v53 = vpack.c.bf16 %v4266_v8, %v4266_v8  ;;  %v1952_v54 = vpack.c.bf16 %v4264_v60, %v4264_v60  ;;  %v1953_v8 = vpack.c.bf16 %v4255_v7, %v4255_v7  ;;  %v3435_v7 = vunpack.i.h.bf16 %v4303_v50 }
 0x210   : > { %1389 = vmatpush.bf16.xpose.msra.mxu0 %v1380_v62  ;;  %1408 = vmatpush.bf16.xpose.msra.mxu1 %v1399_v63  ;;  %v1954_v60 = vpack.c.bf16 %v4253_v5, %v4253_v5  ;;  %v3444_v50 = vunpack.i.l.bf16 %v4299_v48 }
 0x211   : > { %v1988_v62 = vsel %vm1986_vm3, %v1951_v53, 0  ;;  %v2007_v63 = vsel %vm1986_vm3, %v1952_v54, 0 }
 0x212   : > { %v3438_v52 = vpop.permute.xlu0 %3437  ;;  %v923_v20 = vpack.c.bf16 %v3444_v50, %v3444_v50 }
 0x213   : > { %v3440_v3 = vunpack.i.h.bf16 %v3438_v52  ;;  %v3439_v4 = vunpack.i.l.bf16 %v3438_v52 }
 0x217   : > { %3117 = vmatmul.msk.bf16.vlgmr.msrb.gmra.mxu2 %vm532_vm1, %v909_v17  ;;  %3118 = vmatmul.msk.bf16.vlgmr.msra.gmra.mxu3 %vm532_vm1, %v910_v9  ;;  %v920_v17 = vpack.c.bf16 %v3440_v3, %v3440_v3  ;;  %v919_v9 = vpack.c.bf16 %v3439_v4, %v3439_v4 }
 0x218   : > { %1427 = vmatpush.bf16.xpose.msrb.mxu2 %v1418_v11  ;;  %1446 = vmatpush.bf16.xpose.msra.mxu3 %v1437_v45  ;;  %v2026_v11 = vsel %vm1986_vm3, %v1953_v8, 0  ;;  %v2045_v45 = vsel %vm1986_vm3, %v1954_v60, 0 }
 0x21a   : > { %v3473_v6 = vpop.permute.xlu0 %3472 }
 0x21b   : > { %v3475_v27 = vunpack.i.h.bf16 %v3473_v6  ;;  %v3474_v10 = vunpack.i.l.bf16 %v3473_v6 }
 0x21d   : > { %v1956_v5 = vpack.c.bf16 %v3475_v27, %v3475_v27  ;;  %v1955_v12 = vpack.c.bf16 %v3474_v10, %v3474_v10 }
 0x21f   : > { %3119 = vmatmul.msk.bf16.vlgmr.msrb.gmra.mxu0 %vm532_vm1, %v911_v31  ;;  %3120 = vmatmul.msk.bf16.vlgmr.msrb.gmra.mxu1 %vm532_vm1, %v912_v28  ;;  %v922_v31 = vpack.c.bf16 %v3435_v7, %v3435_v7  ;;  %v921_v28 = vpack.c.bf16 %v3434_v41, %v3434_v41 }
 0x220   : > { %1465 = vmatpush.bf16.xpose.msrb.mxu0 %v1456_v18  ;;  %1484 = vmatpush.bf16.xpose.msrb.mxu1 %v1475_v19  ;;  %v2064_v18 = vsel %vm1986_vm3, %v1955_v12, 0  ;;  %v2083_v19 = vsel %vm1986_vm3, %v1956_v5, 0 }
 0x222   : > { %v4418_v30 = vpop.permute.xlu0 %3482 }
 0x227   : > { %3121 = vmatmul.msk.bf16.vlgmr.msra.gmra.mxu2 %vm532_vm1, %v913_v22  ;;  %3122 = vmatmul.msk.bf16.vlgmr.msrb.gmra.mxu3 %vm532_vm1, %v914_v21  ;;  %v2102_v21 = vsel %vm1986_vm3, %v1957_v57, 0  ;;  %v2121_v22 = vsel %vm1986_vm3, %v1958_v1, 0 }
 0x228   : > { %1503 = vmatpush.bf16.xpose.msra.mxu2 %v1494_v24  ;;  %1522 = vmatpush.bf16.xpose.msrb.mxu3 %v1513_v29 }
 0x22a   : > { %v4420_v25 = vpop.permute.xlu0 %3497 }
 0x22f   : > { %3123 = vmatmul.msk.bf16.vlgmr.msra.gmra.mxu0 %vm532_vm1, %v915_v39  ;;  %3124 = vmatmul.msk.bf16.vlgmr.msra.gmra.mxu1 %vm532_vm1, %v916_v38 }
 0x230   : > { %1541 = vmatpush.bf16.xpose.msra.mxu0 %v1532_v42  ;;  %1560 = vmatpush.bf16.xpose.msra.mxu1 %v1551_v26 }
 0x237   : > { %3125 = vmatmul.msk.bf16.vlgmr.msrb.gmra.mxu2 %vm532_vm1, %v917_v56  ;;  %3126 = vmatmul.msk.bf16.vlgmr.msra.gmra.mxu3 %vm532_vm1, %v918_v55 }
 0x238   : > { %1997 = vmatpush.bf16.msrb.mxu2 %v1988_v62  ;;  %2016 = vmatpush.bf16.msra.mxu3 %v2007_v63 }
 0x23f   : > { %3127 = vmatmul.msk.bf16.vlgmr.msrb.gmra.mxu0 %vm532_vm1, %v919_v9  ;;  %3128 = vmatmul.msk.bf16.vlgmr.msrb.gmra.mxu1 %vm532_vm1, %v920_v17 }
 0x240   : > { %2035 = vmatpush.bf16.msrb.mxu0 %v2026_v11  ;;  %2054 = vmatpush.bf16.msrb.mxu1 %v2045_v45 }
 0x247   : > { %3129 = vmatmul.msk.bf16.vlgmr.msra.gmra.mxu2 %vm532_vm1, %v921_v28  ;;  %3130 = vmatmul.msk.bf16.vlgmr.msrb.gmra.mxu3 %vm532_vm1, %v922_v31 }
 0x248   : > { %2073 = vmatpush.bf16.msra.mxu2 %v2064_v18  ;;  %2092 = vmatpush.bf16.msrb.mxu3 %v2083_v19 }
 0x24f   : > { %3131 = vmatmul.msk.bf16.vlgmr.msra.gmra.mxu0 %vm532_vm1, %v923_v20  ;;  %3132 = vmatmul.msk.bf16.vlgmr.msra.gmra.mxu1 %vm532_vm1, %v924_v0 }
 0x250   : > { %2111 = vmatpush.bf16.msra.mxu0 %v2102_v21  ;;  %2130 = vmatpush.bf16.msra.mxu1 %v2121_v22 }
 0x255   : > { %v1575_v23 = vpop.xlane.xlu0 %1574 }
 0x256   : > { %v1665_v48 = vsub.f32 %v4295_v40, %v1575_v23 }
 0x258   : > { %v1699_v24 = vmul.f32 1.442695, %v1665_v48 }
 0x25a   : > { %3593 = vpow2.f32 %v1699_v24 }
 0x25b   : > { %v1578_v32 = vpop.xlane.xlu1 %1577 }
 0x25c   : > { %v1666_v42 = vsub.f32 %v4306_v2, %v1578_v32 }
 0x25e   : > { %v1701_v46 = vmul.f32 1.442695, %v1666_v42 }
 0x260   : > { %v4437_v54 = vpop.eup %3593  ;;  %3595 = vpow2.f32 %v1701_v46 }
 0x261   : > { %v1765_v3 = vsel %vm1566_vm2, %v4437_v54, 0.0 }
 0x265   : > { %v1569_v12 = vpop.xlane.xlu0 %1568 }
 0x266   : > { %v4447_v17 = vpop.eup %3595  ;;  %v1663_v16 = vsub.f32 %v4313_v37, %v1569_v12 }
 0x267   : > { %v1768_v11 = vsel %vm1566_vm2, %v4447_v17, 0.0 }
 0x268   : > { %v1695_v19 = vmul.f32 1.442695, %v1663_v16 }
 0x26a   : > { %v1049_v29 = vpop.f32.mrf.mxu2  ;;  %v1068_v33 = vpop.f32.mrf.mxu3 }
 0x26b   : > { %v4435_v53 = vadd.f32 %v1049_v29, %v4292_v36  ;;  %v4461_v13 = vadd.f32 %v1068_v33, %v4292_v36 }
 0x26c   : > { %v1087_v34 = vpop.f32.mrf.mxu0  ;;  %v1106_v35 = vpop.f32.mrf.mxu1 }
 0x26d   : > { %v4424_v38 = vadd.f32 %v1087_v34, %v4292_v36  ;;  %v4427_v39 = vadd.f32 %v1106_v35, %v4292_v36  ;;  %v1579_v63 = vsel %vm1566_vm2, %v4435_v53, -inf  ;;  %v1582_v18 = vsel %vm1566_vm2, %v4461_v13, -inf }
 0x26f   : > { %v1588_v26 = vsel %vm1566_vm2, %v4427_v39, -inf  ;;  %v1585_v40 = vsel %vm1566_vm2, %v4424_v38, -inf }
 0x270   : > { %1589 = vmax.xlane.f32.xlu2 %v1588_v26  ;;  %1586 = vmax.xlane.f32.xlu1 %v1585_v40 }
 0x272   : > { %v1051_v49 = vpop.f32.mrf.mxu2  ;;  %v1070_v52 = vpop.f32.mrf.mxu3 }
 0x274   : > { %v1089_v56 = vpop.f32.mrf.mxu0  ;;  %v1108_v62 = vpop.f32.mrf.mxu1 }
 0x275   : > { %v1572_v55 = vpop.xlane.xlu1 %1571 }
 0x276   : > { %v1664_v2 = vsub.f32 %v4340_v15, %v1572_v55 }
 0x278   : > { %v1697_v4 = vmul.f32 1.442695, %v1664_v2  ;;  %1580 = vmax.xlane.f32.xlu2 %v1579_v63  ;;  %1766 = vadd.xlane.f32.xlu1 %v1765_v3 }
 0x27a   : > { %v1125_v8 = vpop.f32.mrf.mxu2  ;;  %v1144_v60 = vpop.f32.mrf.mxu3  ;;  %3597 = vpow2.f32 %v1697_v4 }
 0x27b   : > { %v4445_v6 = vadd.f32 %v1144_v60, %v4292_v36  ;;  %3599 = vpow2.f32 %v1695_v19  ;;  %v4493_v46 = vadd.f32 %v1125_v8, %v4292_v36 }
 0x27c   : > { %v1163_v15 = vpop.f32.mrf.mxu0  ;;  %v1182_v27 = vpop.f32.mrf.mxu1 }
 0x27d   : > { %v4450_v9 = vadd.f32 %v1163_v15, %v4292_v36  ;;  %v1594_v10 = vsel %vm1566_vm2, %v4445_v6, -inf  ;;  %v4469_v1 = vadd.f32 %v1182_v27, %v4292_v36  ;;  %v1591_v62 = vsel %vm1566_vm2, %v4493_v46, -inf }
 0x27e   : > { %1595 = vmax.xlane.f32.xlu0 %v1594_v10 }
 0x27f   : > { %v1597_v45 = vsel %vm1566_vm2, %v4450_v9, -inf  ;;  %v1600_v22 = vsel %vm1566_vm2, %v4469_v1, -inf }
 0x280   : > { %1769 = vadd.xlane.f32.xlu2 %v1768_v11  ;;  %1598 = vmax.xlane.f32.xlu1 %v1597_v45  ;;  %v4458_v7 = vpop.eup %3597 }
 0x281   : > { %v1762_v14 = vsel %vm1566_vm2, %v4458_v7, 0.0  ;;  %v4486_v33 = vpop.eup %3599 }
 0x282   : > { %v1127_v41 = vpop.f32.mrf.mxu2  ;;  %v1146_v5 = vpop.f32.mrf.mxu3  ;;  %v1759_v42 = vsel %vm1566_vm2, %v4486_v33, 0.0 }
 0x284   : > { %v1165_v31 = vpop.f32.mrf.mxu0  ;;  %v1184_v28 = vpop.f32.mrf.mxu1 }
 0x286   : > { %1763 = vadd.xlane.f32.xlu0 %v1762_v14 }
 0x288   : > { %1583 = vmax.xlane.f32.xlu2 %v1582_v18 }
 0x28a   : > { %v1201_v59 = vpop.f32.mrf.mxu2  ;;  %v1220_v50 = vpop.f32.mrf.mxu3 }
 0x28b   : > { %v4472_v57 = vadd.f32 %v1201_v59, %v4292_v36  ;;  %v4484_v29 = vadd.f32 %v1220_v50, %v4292_v36 }
 0x28c   : > { %v1239_v0 = vpop.f32.mrf.mxu0  ;;  %v1258_v21 = vpop.f32.mrf.mxu1 }
 0x28d   : > { %v4475_v20 = vadd.f32 %v1239_v0, %v4292_v36  ;;  %v1603_v37 = vsel %vm1566_vm2, %v4472_v57, -inf  ;;  %v1606_v35 = vsel %vm1566_vm2, %v4484_v29, -inf  ;;  %v4508_v8 = vadd.f32 %v1258_v21, %v4292_v36 }
 0x28e   : > { %1604 = vmax.xlane.f32.xlu0 %v1603_v37 }
 0x28f   : > { %v1609_v23 = vsel %vm1566_vm2, %v4475_v20, -inf  ;;  %v1612_v10 = vsel %vm1566_vm2, %v4508_v8, -inf }
 0x290   : > { %1601 = vmax.xlane.f32.xlu2 %v1600_v22  ;;  %1610 = vmax.xlane.f32.xlu1 %v1609_v23 }
 0x292   : > { %v1203_v48 = vpop.f32.mrf.mxu2  ;;  %v1222_v24 = vpop.f32.mrf.mxu3 }
 0x294   : > { %v1241_v32 = vpop.f32.mrf.mxu0  ;;  %v1260_v34 = vpop.f32.mrf.mxu1 }
 0x298   : > { %1607 = vmax.xlane.f32.xlu1 %v1606_v35  ;;  %1760 = vadd.xlane.f32.xlu2 %v1759_v42 }
 0x29a   : > { %v1277_v26 = vpop.f32.mrf.mxu2  ;;  %v1296_v40 = vpop.f32.mrf.mxu3 }
 0x29b   : > { %v4496_v49 = vadd.f32 %v1277_v26, %v4292_v36  ;;  %v4511_v60 = vadd.f32 %v1296_v40, %v4292_v36 }
 0x29c   : > { %v1315_v52 = vpop.f32.mrf.mxu0  ;;  %v1334_v55 = vpop.f32.mrf.mxu1 }
 0x29d   : > { %v1615_v56 = vsel %vm1566_vm2, %v4496_v49, -inf  ;;  %v4501_v2 = vadd.f32 %v1334_v55, %v4292_v36  ;;  %v1618_v11 = vsel %vm1566_vm2, %v4511_v60, -inf  ;;  %v4518_v5 = vadd.f32 %v1315_v52, %v4292_v36 }
 0x29e   : > { %1616 = vmax.xlane.f32.xlu0 %v1615_v56 }
 0x29f   : > { %v1624_v63 = vsel %vm1566_vm2, %v4501_v2, -inf  ;;  %v1621_v18 = vsel %vm1566_vm2, %v4518_v5, -inf }
 0x2a0   : > { %1592 = vmax.xlane.f32.xlu2 %v1591_v62  ;;  %1625 = vmax.xlane.f32.xlu1 %v1624_v63 }
 0x2a2   : > { %v1279_v3 = vpop.f32.mrf.mxu2  ;;  %v1298_v4 = vpop.f32.mrf.mxu3 }
 0x2a4   : > { %v1317_v15 = vpop.f32.mrf.mxu0  ;;  %v1336_v27 = vpop.f32.mrf.mxu1 }
 0x2a8   : > { %1613 = vmax.xlane.f32.xlu2 %v1612_v10  ;;  %1619 = vmax.xlane.f32.xlu1 %v1618_v11 }
 0x2aa   : > { %v1353_v45 = vpop.f32.mrf.mxu2  ;;  %v1372_v41 = vpop.f32.mrf.mxu3 }
 0x2ab   : > { %v4521_v12 = vadd.f32 %v1353_v45, %v4292_v36  ;;  %v4553_v62 = vadd.f32 %v1372_v41, %v4292_v36 }
 0x2ac   : > { %v1391_v31 = vpop.f32.mrf.mxu0  ;;  %v1410_v14 = vpop.f32.mrf.mxu1 }
 0x2ad   : > { %v4524_v28 = vadd.f32 %v1391_v31, %v4292_v36  ;;  %v1627_v19 = vsel %vm1566_vm2, %v4521_v12, -inf  ;;  %v4533_v0 = vadd.f32 %v1410_v14, %v4292_v36  ;;  %v1630_v4 = vsel %vm1566_vm2, %v4553_v62, -inf }
 0x2af   : > { %v1633_v16 = vsel %vm1566_vm2, %v4524_v28, -inf  ;;  %v1636_v22 = vsel %vm1566_vm2, %v4533_v0, -inf }
 0x2b0   : > { %1634 = vmax.xlane.f32.xlu0 %v1633_v16  ;;  %1622 = vmax.xlane.f32.xlu2 %v1621_v18 }
 0x2b1   : > { %1628 = vmax.xlane.f32.xlu1 %v1627_v19  ;;  %v4576_v19 = vpop.permute.xlu2 %3477 }
 0x2b2   : > { %v1355_v59 = vpop.f32.mrf.mxu2  ;;  %v1374_v50 = vpop.f32.mrf.mxu3 }
 0x2b4   : > { %v1393_v21 = vpop.f32.mrf.mxu0  ;;  %v1412_v37 = vpop.f32.mrf.mxu1 }
 0x2b8   : > { %1637 = vmax.xlane.f32.xlu0 %v1636_v22 }
 0x2b9   : > { %v3493_v22 = vpop.permute.xlu2 %3492 }
 0x2ba   : > { %v1429_v23 = vpop.f32.mrf.mxu2  ;;  %v1448_v48 = vpop.f32.mrf.mxu3 }
 0x2bb   : > { %v4538_v24 = vadd.f32 %v1448_v48, %v4292_v36  ;;  %v4558_v10 = vadd.f32 %v1429_v23, %v4292_v36 }
 0x2bc   : > { %v1467_v32 = vpop.f32.mrf.mxu0  ;;  %v1486_v35 = vpop.f32.mrf.mxu1 }
 0x2bd   : > { %v4541_v34 = vadd.f32 %v1467_v32, %v4292_v36  ;;  %v4544_v42 = vadd.f32 %v1486_v35, %v4292_v36  ;;  %v1642_v26 = vsel %vm1566_vm2, %v4538_v24, -inf  ;;  %v1639_v18 = vsel %vm1566_vm2, %v4558_v10, -inf }
 0x2bf   : > { %v1645_v40 = vsel %vm1566_vm2, %v4541_v34, -inf  ;;  %v1648_v52 = vsel %vm1566_vm2, %v4544_v42, -inf }
 0x2c0   : > { %1643 = vmax.xlane.f32.xlu0 %v1642_v26  ;;  %1646 = vmax.xlane.f32.xlu2 %v1645_v40 }
 0x2c1   : > { %1649 = vmax.xlane.f32.xlu1 %v1648_v52 }
 0x2c2   : > { %v1431_v55 = vpop.f32.mrf.mxu2  ;;  %v1450_v56 = vpop.f32.mrf.mxu3 }
 0x2c4   : > { %v1469_v63 = vpop.f32.mrf.mxu0  ;;  %v1488_v3 = vpop.f32.mrf.mxu1 }
 0x2c8   : > { %1631 = vmax.xlane.f32.xlu2 %v1630_v4  ;;  %v3494_v4 = vunpack.i.l.bf16 %v3493_v22 }
 0x2ca   : > { %v1505_v15 = vpop.f32.mrf.mxu2  ;;  %v1524_v27 = vpop.f32.mrf.mxu3 }
 0x2cb   : > { %v4561_v11 = vadd.f32 %v1505_v15, %v4292_v36  ;;  %v4564_v45 = vadd.f32 %v1524_v27, %v4292_v36 }
 0x2cc   : > { %v4566_v31 = vpop.f32.mrf.mxu0  ;;  %v4568_v41 = vpop.f32.mrf.mxu1 }
 0x2cd   : > { %v1654_v14 = vsel %vm1566_vm2, %v4564_v45, -inf  ;;  %v1651_v16 = vsel %vm1566_vm2, %v4561_v11, -inf }
 0x2ce   : > { %1655 = vmax.xlane.f32.xlu1 %v1654_v14  ;;  %1652 = vmax.xlane.f32.xlu0 %v1651_v16 }
 0x2d0   : > { %1640 = vmax.xlane.f32.xlu2 %v1639_v18 }
 0x2d2   : > { %v1507_v59 = vpop.f32.mrf.mxu2  ;;  %v1526_v50 = vpop.f32.mrf.mxu3 }
 0x2d4   : > { %v1545_v21 = vpop.f32.mrf.mxu0  ;;  %v1564_v37 = vpop.f32.mrf.mxu1 }
 0x2e3   : > { %v1590_v23 = vpop.xlane.xlu2 %1589  ;;  %v1587_v48 = vpop.xlane.xlu1 %1586 }
 0x2e4   : > { %v1669_v32 = vsub.f32 %v4424_v38, %v1587_v48  ;;  %v1670_v26 = vsub.f32 %v4427_v39, %v1590_v23  ;;  %v1961_v39 = vpack.c.bf16 %v3494_v4, %v3494_v4  ;;  %v3495_v23 = vunpack.i.h.bf16 %v3493_v22 }
 0x2e6   : > { %v1707_v35 = vmul.f32 1.442695, %v1669_v32  ;;  %v1709_v40 = vmul.f32 1.442695, %v1670_v26  ;;  %v2178_v48 = vsel %vm1986_vm3, %v1961_v39, 0  ;;  %v1962_v26 = vpack.c.bf16 %v3495_v23, %v3495_v23 }
 0x2e8   : > { %3601 = vpow2.f32 %v1707_v35 }
 0x2eb   : > { %v1581_v52 = vpop.xlane.xlu2 %1580  ;;  %v1767_v55 = vpop.xlane.xlu1 %1766 }
 0x2ec   : > { %v1667_v56 = vsub.f32 %v4435_v53, %v1581_v52  ;;  %3603 = vrcp.f32 %v1767_v55  ;;  %v3480_v55 = vunpack.i.h.bf16 %v4576_v19 }
 0x2ed   : > { %3605 = vpow2.f32 %v1709_v40 }
 0x2ee   : > { %v1703_v63 = vmul.f32 1.442695, %v1667_v56  ;;  %v4581_v3 = vpop.eup %3601 }
 0x2ef   : > { %v1777_v15 = vsel %vm1566_vm2, %v4581_v3, 0.0 }
 0x2f0   : > { %3607 = vpow2.f32 %v1703_v63  ;;  %1778 = vadd.xlane.f32.xlu1 %v1777_v15  ;;  %v2197_v15 = vsel %vm1986_vm3, %v1962_v26, 0 }
 0x2f1   : > { %v1596_v38 = vpop.xlane.xlu0 %1595 }
 0x2f2   : > { %v3604_v27 = vpop.eup %3603 }
 0x2f3   : > { %v1889_v14 = vmul.f32 %v3604_v27, %v4437_v54  ;;  %v1770_v16 = vpop.xlane.xlu2 %1769  ;;  %v1599_v18 = vpop.xlane.xlu1 %1598 }
 0x2f4   : > { %3609 = vrcp.f32 %v1770_v16  ;;  %v1673_v53 = vsub.f32 %v4450_v9, %v1599_v18  ;;  %v4587_v59 = vpop.eup %3605 }
 0x2f5   : > { %v1921_v50 = vpack.c.bf16 %v1889_v14, %v1889_v14  ;;  %v1780_v54 = vsel %vm1566_vm2, %v4587_v59, 0.0  ;;  %v4609_v14 = vadd.f32 %v4568_v41, %v4292_v36 }
 0x2f6   : > { %v4589_v21 = vpop.eup %3607  ;;  %v1715_v37 = vmul.f32 1.442695, %v1673_v53 }
 0x2f7   : > { %3135 = vmatmul.msk.bf16.vlgmr.msrb.gmra.mxu0 %vm1566_vm2, %v1921_v50  ;;  %v1771_v32 = vsel %vm1566_vm2, %v4589_v21, 0.0 }
 0x2f8   : > { %3611 = vpow2.f32 %v1715_v37  ;;  %2187 = vmatpush.bf16.msrb.mxu0 %v2178_v48  ;;  %1772 = vadd.xlane.f32.xlu2 %v1771_v32  ;;  %v1672_v37 = vsub.f32 %v4445_v6, %v1596_v38  ;;  %v4624_v48 = vadd.f32 %v4566_v31, %v4292_v36  ;;  %v3479_v38 = vunpack.i.l.bf16 %v4576_v19 }
 0x2f9   : > { %1781 = vadd.xlane.f32.xlu1 %v1780_v54  ;;  %v1764_v9 = vpop.xlane.xlu0 %1763 }
 0x2fa   : > { %v3610_v35 = vpop.eup %3609  ;;  %3613 = vrcp.f32 %v1764_v9  ;;  %v1713_v41 = vmul.f32 1.442695, %v1672_v37  ;;  %v1657_v9 = vsel %vm1566_vm2, %v4624_v48, -inf }
 0x2fb   : > { %v1890_v22 = vmul.f32 %v3610_v35, %v4447_v17  ;;  %v1584_v40 = vpop.xlane.xlu2 %1583  ;;  %v1960_v17 = vpack.c.bf16 %v3480_v55, %v3480_v55 }
 0x2fc   : > { %v1668_v52 = vsub.f32 %v4461_v13, %v1584_v40 }
 0x2fd   : > { %v1922_v56 = vpack.c.bf16 %v1890_v22, %v1890_v22  ;;  %v2159_v53 = vsel %vm1986_vm3, %v1960_v17, 0  ;;  %v1959_v22 = vpack.c.bf16 %v3479_v38, %v3479_v38 }
 0x2fe   : > { %v4600_v63 = vpop.eup %3611  ;;  %v1705_v4 = vmul.f32 1.442695, %v1668_v52 }
 0x2ff   : > { %3136 = vmatmul.msk.bf16.vlgmr.msrb.gmra.mxu1 %vm1566_vm2, %v1922_v56  ;;  %v1789_v27 = vsel %vm1566_vm2, %v4600_v63, 0.0 }
 0x300   : > { %v3614_v39 = vpop.eup %3613  ;;  %3615 = vpow2.f32 %v1705_v4  ;;  %2206 = vmatpush.bf16.msrb.mxu1 %v2197_v15  ;;  %1790 = vadd.xlane.f32.xlu2 %v1789_v27 }
 0x301   : > { %v1888_v13 = vmul.f32 %v3614_v39, %v4458_v7  ;;  %v1660_v7 = vsel %vm1566_vm2, %v4609_v14, -inf  ;;  %v1605_v32 = vpop.xlane.xlu0 %1604 }
 0x302   : > { %v1675_v6 = vsub.f32 %v4472_v57, %v1605_v32  ;;  %v2140_v57 = vsel %vm1986_vm3, %v1959_v22, 0 }
 0x303   : > { %v1920_v16 = vpack.c.bf16 %v1888_v13, %v1888_v13  ;;  %v4611_v18 = vpop.xlane.xlu2 %1601  ;;  %v1611_v15 = vpop.xlane.xlu1 %1610 }
 0x304   : > { %v1719_v26 = vmul.f32 1.442695, %v1675_v6 }
 0x305   : > { %3134 = vmatmul.msk.bf16.vlgmr.msra.gmra.mxu3 %vm1566_vm2, %v1920_v16 }
 0x306   : > { %v4615_v50 = vpop.eup %3615  ;;  %2168 = vmatpush.bf16.msra.mxu3 %v2159_v53 }
 0x307   : > { %v1774_v23 = vsel %vm1566_vm2, %v4615_v50, 0.0 }
 0x308   : > { %1775 = vadd.xlane.f32.xlu0 %v1774_v23  ;;  %1661 = vmax.xlane.f32.xlu2 %v1660_v7 }
 0x30b   : > { %v1761_v54 = vpop.xlane.xlu2 %1760  ;;  %v1608_v37 = vpop.xlane.xlu1 %1607 }
 0x30c   : > { %3617 = vrcp.f32 %v1761_v54 }
 0x30d   : > { %3619 = vpow2.f32 %v1713_v41 }
 0x30e   : > { %3621 = vpow2.f32 %v1719_v26 }
 0x310   : > { %1658 = vmax.xlane.f32.xlu0 %v1657_v9 }
 0x311   : > { %v4639_v52 = vpop.xlane.xlu0 %1616 }
 0x312   : > { %v3618_v35 = vpop.eup %3617  ;;  %3502 = vrot.lane.b32.xlu1 %v4210_v47, %s3925_s24 }
 0x313   : > { %v1887_v36 = vmul.f32 %v3618_v35, %v4486_v33  ;;  %v4633_v31 = vpop.eup %3619  ;;  %v1593_v56 = vpop.xlane.xlu2 %1592 }
 0x314   : > { %v1786_v19 = vsel %vm1566_vm2, %v4633_v31, 0.0  ;;  %v4641_v55 = vpop.eup %3621  ;;  %v1671_v13 = vsub.f32 %v4493_v46, %v1593_v56  ;;  %v1626_v35 = vpop.xlane.xlu1 %1625  ;;  %v1676_v56 = vsub.f32 %v4484_v29, %v1608_v37 }
 0x315   : > { %v1919_v40 = vpack.c.bf16 %v1887_v36, %v1887_v36  ;;  %v1795_v33 = vsel %vm1566_vm2, %v4641_v55, 0.0 }
 0x316   : > { %v1711_v23 = vmul.f32 1.442695, %v1671_v13  ;;  %v1682_v13 = vsub.f32 %v4501_v2, %v1626_v35 }
 0x317   : > { %3133 = vmatmul.msk.bf16.vlgmr.msrb.gmra.mxu2 %vm1566_vm2, %v1919_v40 }
 0x318   : > { %2149 = vmatpush.bf16.msrb.mxu2 %v2140_v57  ;;  %1787 = vadd.xlane.f32.xlu0 %v1786_v19 }
 0x31b   : > { %v1614_v39 = vpop.xlane.xlu2 %1613 }
 0x320   : > { %3507 = vrot.lane.b32.xlu2 %v4210_v47, %s3923_s18  ;;  %1796 = vadd.xlane.f32.xlu0 %v1795_v33  ;;  %v1620_v33 = vpop.xlane.xlu1 %1619 }
 0x323   : > { %v1635_v4 = vpop.xlane.xlu0 %1634  ;;  %v1623_v32 = vpop.xlane.xlu2 %1622 }
 0x324   : > { %v1685_v27 = vsub.f32 %v4524_v28, %v1635_v4  ;;  %v1677_v28 = vsub.f32 %v4475_v20, %v1611_v15  ;;  %v1678_v20 = vsub.f32 %v4508_v8, %v1614_v39 }
 0x326   : > { %v1739_v17 = vmul.f32 1.442695, %v1685_v27  ;;  %v1723_v46 = vmul.f32 1.442695, %v1677_v28 }
 0x328   : > { %3623 = vpow2.f32 %v1739_v17 }
 0x32b   : > { %v1638_v16 = vpop.xlane.xlu0 %1637 }
 0x32c   : > { %v1686_v53 = vsub.f32 %v4533_v0, %v1638_v16  ;;  %v1674_v0 = vsub.f32 %v4469_v1, %v4611_v18  ;;  %v1725_v1 = vmul.f32 1.442695, %v1678_v20  ;;  %v1681_v18 = vsub.f32 %v4518_v5, %v1623_v32 }
 0x32d   : > { %v1721_v5 = vmul.f32 1.442695, %v1676_v56 }
 0x32e   : > { %v1741_v7 = vmul.f32 1.442695, %v1686_v53  ;;  %v4650_v41 = vpop.eup %3623  ;;  %v1717_v36 = vmul.f32 1.442695, %v1674_v0  ;;  %v1731_v4 = vmul.f32 1.442695, %v1681_v18  ;;  %v1680_v0 = vsub.f32 %v4511_v60, %v1620_v33 }
 0x32f   : > { %v1825_v54 = vsel %vm1566_vm2, %v4650_v41, 0.0  ;;  %v1733_v53 = vmul.f32 1.442695, %v1682_v13 }
 0x330   : > { %3625 = vpow2.f32 %v1741_v7  ;;  %1826 = vadd.xlane.f32.xlu0 %v1825_v54  ;;  %v1629_v7 = vpop.xlane.xlu1 %1628 }
 0x331   : > { %3627 = vpow2.f32 %v1711_v23  ;;  %v1683_v60 = vsub.f32 %v4521_v12, %v1629_v7 }
 0x332   : > { %3629 = vpow2.f32 %v1723_v46 }
 0x333   : > { %v4663_v26 = vpop.xlane.xlu2 %1646  ;;  %v4665_v22 = vpop.xlane.xlu0 %1643  ;;  %3631 = vpow2.f32 %v1717_v36  ;;  %v1735_v33 = vmul.f32 1.442695, %v1683_v60 }
 0x334   : > { %3633 = vpow2.f32 %v1725_v1 }
 0x335   : > { %3635 = vpow2.f32 %v1731_v4 }
 0x336   : > { %v4655_v6 = vpop.eup %3625 }
 0x337   : > { %v1828_v38 = vsel %vm1566_vm2, %v4655_v6, 0.0  ;;  %v4661_v9 = vpop.eup %3627 }
 0x338   : > { %1829 = vadd.xlane.f32.xlu0 %v1828_v38  ;;  %v1783_v40 = vsel %vm1566_vm2, %v4661_v9, 0.0  ;;  %v4671_v57 = vpop.eup %3629  ;;  %v4702_v20 = vpop.xlane.xlu1 %1649 }
 0x339   : > { %v1801_v27 = vsel %vm1566_vm2, %v4671_v57, 0.0  ;;  %v4677_v17 = vpop.eup %3631 }
 0x33a   : > { %v4680_v16 = vpop.eup %3633  ;;  %v1792_v29 = vsel %vm1566_vm2, %v4677_v17, 0.0 }
 0x33b   : > { %v1632_v15 = vpop.xlane.xlu2 %1631  ;;  %v1804_v37 = vsel %vm1566_vm2, %v4680_v16, 0.0  ;;  %v4688_v23 = vpop.eup %3635 }
 0x33c   : > { %1784 = vadd.xlane.f32.xlu1 %v1783_v40 }
 0x341   : > { %v1653_v19 = vpop.xlane.xlu0 %1652 }
 0x342   : > { %v1691_v8 = vsub.f32 %v4561_v11, %v1653_v19  ;;  %v1679_v11 = vsub.f32 %v4496_v49, %v4639_v52  ;;  %v1813_v52 = vsel %vm1566_vm2, %v4688_v23, 0.0  ;;  %v4713_v19 = vpop.xlane.xlu1 %1655 }
 0x343   : > { %v1641_v32 = vpop.xlane.xlu2 %1640 }
 0x344   : > { %v1751_v39 = vmul.f32 1.442695, %v1691_v8  ;;  %1802 = vadd.xlane.f32.xlu1 %v1801_v27  ;;  %v1727_v54 = vmul.f32 1.442695, %v1679_v11  ;;  %v1687_v46 = vsub.f32 %v4558_v10, %v1641_v32  ;;  %v1729_v10 = vmul.f32 1.442695, %v1680_v0 }
 0x345   : > { %v1684_v27 = vsub.f32 %v4553_v62, %v1632_v15  ;;  %v1688_v11 = vsub.f32 %v4538_v24, %v4665_v22  ;;  %v3484_v24 = vunpack.i.l.bf16 %v4418_v30 }
 0x346   : > { %3637 = vpow2.f32 %v1751_v39  ;;  %v1743_v38 = vmul.f32 1.442695, %v1687_v46 }
 0x347   : > { %3639 = vpow2.f32 %v1721_v5  ;;  %v1737_v5 = vmul.f32 1.442695, %v1684_v27  ;;  %v1745_v32 = vmul.f32 1.442695, %v1688_v11 }
 0x348   : > { %3641 = vpow2.f32 %v1733_v53 }
 0x349   : > { %1793 = vadd.xlane.f32.xlu2 %v1792_v29  ;;  %3643 = vpow2.f32 %v1727_v54  ;;  %v3499_v29 = vunpack.i.l.bf16 %v4420_v25 }
 0x34a   : > { %3645 = vpow2.f32 %v1743_v38  ;;  %v1963_v38 = vpack.c.bf16 %v3484_v24, %v3484_v24 }
 0x34b   : > { %3647 = vpow2.f32 %v1729_v10  ;;  %v1965_v15 = vpack.c.bf16 %v3499_v29, %v3499_v29 }
 0x34c   : > { %1805 = vadd.xlane.f32.xlu1 %v1804_v37  ;;  %v4690_v2 = vpop.eup %3637  ;;  %3649 = vpow2.f32 %v1735_v33 }
 0x34d   : > { %v1843_v28 = vsel %vm1566_vm2, %v4690_v2, 0.0  ;;  %v4695_v49 = vpop.eup %3639  ;;  %v2254_v46 = vsel %vm1986_vm3, %v1965_v15, 0 }
 0x34e   : > { %1844 = vadd.xlane.f32.xlu0 %v1843_v28  ;;  %v1798_v35 = vsel %vm1566_vm2, %v4695_v49, 0.0  ;;  %v4704_v36 = vpop.eup %3641  ;;  %v3500_v28 = vunpack.i.h.bf16 %v4420_v25 }
 0x34f   : > { %v4706_v40 = vpop.eup %3643  ;;  %v1816_v1 = vsel %vm1566_vm2, %v4704_v36, 0.0 }
 0x350   : > { %v1807_v18 = vsel %vm1566_vm2, %v4706_v40, 0.0  ;;  %v4715_v56 = vpop.eup %3645  ;;  %v1966_v60 = vpack.c.bf16 %v3500_v28, %v3500_v28 }
 0x351   : > { %1814 = vadd.xlane.f32.xlu2 %v1813_v52  ;;  %v4717_v4 = vpop.eup %3647  ;;  %v1831_v8 = vsel %vm1566_vm2, %v4715_v56, 0.0 }
 0x352   : > { %v1810_v12 = vsel %vm1566_vm2, %v4717_v4, 0.0  ;;  %v4726_v13 = vpop.eup %3649 }
 0x353   : > { %v1819_v62 = vsel %vm1566_vm2, %v4726_v13, 0.0 }
 0x354   : > { %1799 = vadd.xlane.f32.xlu1 %v1798_v35 }
 0x359   : > { %1817 = vadd.xlane.f32.xlu2 %v1816_v1 }
 0x35c   : > { %1808 = vadd.xlane.f32.xlu1 %v1807_v18 }
 0x361   : > { %1832 = vadd.xlane.f32.xlu2 %v1831_v8 }
 0x362   : > { %3517 = vrot.lane.b32.xlu0 %v4210_v47, %s3924_s21 }
 0x363   : > { %v1779_v39 = vpop.xlane.xlu1 %1778 }
 0x364   : > { %1811 = vadd.xlane.f32.xlu1 %v1810_v12  ;;  %3651 = vrcp.f32 %v1779_v39  ;;  %v1690_v12 = vsub.f32 %v4544_v42, %v4702_v20 }
 0x365   : > { %3653 = vpow2.f32 %v1737_v5 }
 0x366   : > { %v1749_v15 = vmul.f32 1.442695, %v1690_v12 }
 0x36a   : > { %v3652_v53 = vpop.eup %3651  ;;  %3522 = vrot.lane.b32.xlu0 %v4234_v61, %s3923_s18 }
 0x36b   : > { %v1773_v47 = vpop.xlane.xlu2 %1772  ;;  %v1893_v37 = vmul.f32 %v3652_v53, %v4581_v3  ;;  %v4737_v22 = vpop.eup %3653  ;;  %v1689_v3 = vsub.f32 %v4541_v34, %v4663_v26  ;;  %v2216_v34 = vsel %vm1986_vm3, %v1963_v38, 0 }
 0x36c   : > { %v1782_v7 = vpop.xlane.xlu1 %1781  ;;  %3655 = vrcp.f32 %v1773_v47  ;;  %1820 = vadd.xlane.f32.xlu1 %v1819_v62  ;;  %v1822_v1 = vsel %vm1566_vm2, %v4737_v22, 0.0  ;;  %v1969_v47 = vpack.c.bf16 %v4218_v51, %v4218_v51 }
 0x36d   : > { %3657 = vrcp.f32 %v1782_v7  ;;  %v1925_v54 = vpack.c.bf16 %v1893_v37, %v1893_v37  ;;  %v1747_v8 = vmul.f32 1.442695, %v1689_v3  ;;  %v3485_v37 = vunpack.i.h.bf16 %v4418_v30 }
 0x36e   : > { %3659 = vpow2.f32 %v1745_v32 }
 0x36f   : > { %3139 = vmatmul.msk.bf16.vlgmr.msra.gmra.mxu0 %vm1566_vm2, %v1925_v54  ;;  %v1964_v32 = vpack.c.bf16 %v3485_v37, %v3485_v37 }
 0x370   : > { %2263 = vmatpush.bf16.msra.mxu0 %v2254_v46 }
 0x371   : > { %v2235_v38 = vsel %vm1986_vm3, %v1964_v32, 0 }
 0x372   : > { %v3656_v52 = vpop.eup %3655 }
 0x373   : > { %v3658_v0 = vpop.eup %3657  ;;  %v1891_v35 = vmul.f32 %v3656_v52, %v4589_v21  ;;  %v1791_v10 = vpop.xlane.xlu2 %1790  ;;  %v2273_v21 = vsel %vm1986_vm3, %v1966_v60, 0 }
 0x374   : > { %v1894_v25 = vmul.f32 %v3658_v0, %v4587_v59  ;;  %3661 = vrcp.f32 %v1791_v10  ;;  %1823 = vadd.xlane.f32.xlu1 %v1822_v1  ;;  %v4748_v18 = vpop.f32.mrf.mxu0  ;;  %v4752_v26 = vpop.eup %3659  ;;  %v1692_v1 = vsub.f32 %v4564_v45, %v4713_v19 }
 0x375   : > { %v1923_v33 = vpack.c.bf16 %v1891_v35, %v1891_v35  ;;  %3663 = vpow2.f32 %v1747_v8  ;;  %v1834_v5 = vsel %vm1566_vm2, %v4752_v26, 0.0 }
 0x376   : > { %v1926_v27 = vpack.c.bf16 %v1894_v25, %v1894_v25 }
 0x377   : > { %3137 = vmatmul.msk.bf16.vlgmr.msra.gmra.mxu2 %vm1566_vm2, %v1923_v33 }
 0x378   : > { %3140 = vmatmul.msk.bf16.vlgmr.msra.gmra.mxu1 %vm1566_vm2, %v1926_v27  ;;  %2225 = vmatpush.bf16.msra.mxu2 %v2216_v34  ;;  %v1968_v34 = vpack.c.bf16 %v4204_v44, %v4204_v44 }
 0x379   : > { %2282 = vmatpush.bf16.msra.mxu1 %v2273_v21  ;;  %3512 = vrot.lane.b32.xlu2 %v4234_v61, %s3925_s24  ;;  %v1753_v21 = vmul.f32 1.442695, %v1692_v1 }
 0x37a   : > { %v3662_v59 = vpop.eup %3661  ;;  %v2311_v45 = vsel %vm1986_vm3, %v1968_v34, 0 }
 0x37b   : > { %v1897_v39 = vmul.f32 %v3662_v59, %v4600_v63  ;;  %v1776_v29 = vpop.xlane.xlu0 %1775  ;;  %v4768_v42 = vpop.eup %3663  ;;  %v2330_v63 = vsel %vm1986_vm3, %v1969_v47, 0 }
 0x37c   : > { %1835 = vadd.xlane.f32.xlu1 %v1834_v5  ;;  %3665 = vrcp.f32 %v1776_v29  ;;  %v2039_v11 = vpop.f32.mrf.mxu0  ;;  %v4763_v53 = vpop.f32.mrf.mxu1  ;;  %v1837_v51 = vsel %vm1566_vm2, %v4768_v42, 0.0 }
 0x37d   : > { %v1929_v62 = vpack.c.bf16 %v1897_v39, %v1897_v39  ;;  %v1662_v20 = vpop.xlane.xlu2 %1661  ;;  %3667 = vpow2.f32 %v1749_v15 }
 0x37e   : > { %v1694_v54 = vsub.f32 %v4609_v14, %v1662_v20  ;;  %v1967_v20 = vpack.c.bf16 %v4202_v43, %v4202_v43 }
 0x37f   : > { %3143 = vmatmul.msk.bf16.vlgmr.msrb.gmra.mxu0 %vm1566_vm2, %v1929_v62 }
 0x380   : > { %2339 = vmatpush.bf16.msrb.mxu0 %v2330_v63  ;;  %v1757_v0 = vmul.f32 1.442695, %v1694_v54  ;;  %v2292_v32 = vsel %vm1986_vm3, %v1967_v20, 0 }
 0x382   : > { %v3666_v7 = vpop.eup %3665 }
 0x383   : > { %v1892_v24 = vmul.f32 %v3666_v7, %v4615_v50  ;;  %v1659_v28 = vpop.xlane.xlu0 %1658  ;;  %v4779_v35 = vpop.eup %3667 }
 0x384   : > { %1838 = vadd.xlane.f32.xlu1 %v1837_v51  ;;  %v1693_v30 = vsub.f32 %v4624_v48, %v1659_v28  ;;  %v2058_v46 = vpop.f32.mrf.mxu1  ;;  %v1840_v50 = vsel %vm1566_vm2, %v4779_v35, 0.0  ;;  %v3503_v5 = vpop.permute.xlu1 %3502 }
 0x385   : > { %v1924_v52 = vpack.c.bf16 %v1892_v24, %v1892_v24  ;;  %v4808_v47 = vpop.permute.xlu2 %3507  ;;  %v3504_v46 = vunpack.i.l.bf16 %v3503_v5 }
 0x386   : > { %v1755_v3 = vmul.f32 1.442695, %v1693_v30 }
 0x387   : > { %3138 = vmatmul.msk.bf16.vlgmr.msrb.gmra.mxu3 %vm1566_vm2, %v1924_v52 }
 0x388   : > { %2244 = vmatpush.bf16.msrb.mxu3 %v2235_v38  ;;  %v4781_v14 = vpop.f32.mrf.mxu3  ;;  %3669 = vpow2.f32 %v1755_v3  ;;  %v1970_v3 = vpack.c.bf16 %v4228_v58, %v4228_v58 }
 0x389   : > { %3671 = vpow2.f32 %v1757_v0 }
 0x38a   : > { %v2349_v1 = vsel %vm1986_vm3, %v1970_v3, 0 }
 0x38b   : > { %v1788_v10 = vpop.xlane.xlu0 %1787 }
 0x38c   : > { %1841 = vadd.xlane.f32.xlu1 %v1840_v50  ;;  %3673 = vrcp.f32 %v1788_v10 }
 0x38d   : > { %3675 = vpow2.f32 %v1753_v21 }
 0x38e   : > { %v4785_v48 = vpop.eup %3669 }
 0x38f   : > { %v4789_v25 = vpop.eup %3671  ;;  %v1849_v27 = vsel %vm1566_vm2, %v4785_v48, 0.0 }
 0x390   : > { %v2020_v60 = vpop.f32.mrf.mxu3  ;;  %v1852_v59 = vsel %vm1566_vm2, %v4789_v25, 0.0 }
 0x392   : > { %v3674_v33 = vpop.eup %3673 }
 0x393   : > { %v1896_v8 = vmul.f32 %v3674_v33, %v4633_v31  ;;  %v4802_v19 = vpop.eup %3675  ;;  %v1797_v11 = vpop.xlane.xlu0 %1796  ;;  %v3505_v33 = vunpack.i.h.bf16 %v3503_v5 }
 0x394   : > { %1850 = vadd.xlane.f32.xlu1 %v1849_v27  ;;  %1853 = vadd.xlane.f32.xlu0 %v1852_v59  ;;  %v1846_v44 = vsel %vm1566_vm2, %v4802_v19, 0.0 }
 0x395   : > { %v1928_v12 = vpack.c.bf16 %v1896_v8, %v1896_v8  ;;  %v1972_v59 = vpack.c.bf16 %v3505_v33, %v3505_v33 }
 0x397   : > { %3142 = vmatmul.msk.bf16.vlgmr.msra.gmra.mxu3 %vm1566_vm2, %v1928_v12 }
 0x398   : > { %2320 = vmatpush.bf16.msra.mxu3 %v2311_v45 }
 0x39a   : > { %v4800_v31 = vpop.f32.mrf.mxu2 }
 0x3a2   : > { %v2001_v39 = vpop.f32.mrf.mxu2  ;;  %1847 = vadd.xlane.f32.xlu2 %v1846_v44 }
 0x3a3   : > { %v1827_v7 = vpop.xlane.xlu0 %1826 }
 0x3ab   : > { %v4821_v38 = vpop.xlane.xlu0 %1829 }
 0x3ad   : > { %3527 = vrot.lane.b32.xlu1 %v4234_v61, %s3924_s21 }
 0x3af   : > { %v1785_v29 = vpop.xlane.xlu1 %1784 }
 0x3b0   : > { %3677 = vrcp.f32 %v1785_v29  ;;  %v3509_v29 = vunpack.i.l.bf16 %v4808_v47 }
 0x3b6   : > { %v3678_v62 = vpop.eup %3677 }
 0x3b7   : > { %v1895_v15 = vmul.f32 %v3678_v62, %v4661_v9  ;;  %v1803_v37 = vpop.xlane.xlu1 %1802 }
 0x3b8   : > { %3679 = vrcp.f32 %v1803_v37  ;;  %v1975_v37 = vpack.c.bf16 %v3509_v29, %v3509_v29 }
 0x3b9   : > { %v1927_v63 = vpack.c.bf16 %v1895_v15, %v1895_v15  ;;  %3681 = vrcp.f32 %v1797_v11  ;;  %v2387_v11 = vsel %vm1986_vm3, %v1972_v59, 0 }
 0x3bb   : > { %3141 = vmatmul.msk.bf16.vlgmr.msrb.gmra.mxu2 %vm1566_vm2, %v1927_v63 }
 0x3bc   : > { %2301 = vmatpush.bf16.msrb.mxu2 %v2292_v32  ;;  %v1794_v61 = vpop.xlane.xlu2 %1793  ;;  %v3510_v32 = vunpack.i.h.bf16 %v4808_v47 }
 0x3bd   : > { %3683 = vrcp.f32 %v1794_v61  ;;  %v2444_v61 = vsel %vm1986_vm3, %v1975_v37, 0 }
 0x3be   : > { %v3680_v54 = vpop.eup %3679 }
 0x3bf   : > { %v1901_v24 = vmul.f32 %v3680_v54, %v4671_v57  ;;  %v1806_v51 = vpop.xlane.xlu1 %1805  ;;  %v3682_v28 = vpop.eup %3681  ;;  %v1971_v57 = vpack.c.bf16 %v3504_v46, %v3504_v46 }
 0x3c0   : > { %v1899_v0 = vmul.f32 %v3682_v28, %v4641_v55 }
 0x3c1   : > { %v1933_v9 = vpack.c.bf16 %v1901_v24, %v1901_v24  ;;  %v2368_v58 = vsel %vm1986_vm3, %v1971_v57, 0  ;;  %v4827_v8 = vpop.xlane.xlu0 %1844 }
 0x3c2   : > { %v1931_v60 = vpack.c.bf16 %v1899_v0, %v1899_v0 }
 0x3c3   : > { %v3684_v30 = vpop.eup %3683  ;;  %3147 = vmatmul.msk.bf16.vlgmr.msra.gmra.mxu0 %vm1566_vm2, %v1933_v9 }
 0x3c4   : > { %v1898_v43 = vmul.f32 %v3684_v30, %v4677_v17  ;;  %v1815_v52 = vpop.xlane.xlu2 %1814 }
 0x3c5   : > { %3685 = vrcp.f32 %v1815_v52 }
 0x3c6   : > { %v1930_v50 = vpack.c.bf16 %v1898_v43, %v1898_v43 }
 0x3c7   : > { %v1800_v10 = vpop.xlane.xlu1 %1799 }
 0x3c8   : > { %3687 = vrcp.f32 %v1800_v10  ;;  %3144 = vmatmul.msk.bf16.vlgmr.msrb.gmra.mxu1 %vm1566_vm2, %v1930_v50 }
 0x3c9   : > { %3689 = vrcp.f32 %v1806_v51  ;;  %2358 = vmatpush.bf16.msrb.mxu1 %v2349_v1 }
 0x3cb   : > { %v3686_v17 = vpop.eup %3685  ;;  %3145 = vmatmul.msk.bf16.vlgmr.msra.gmra.mxu2 %vm1566_vm2, %v1931_v60 }
 0x3cc   : > { %2377 = vmatpush.bf16.msra.mxu2 %v2368_v58  ;;  %v1818_v55 = vpop.xlane.xlu2 %1817  ;;  %v1905_v27 = vmul.f32 %v3686_v17, %v4688_v23 }
 0x3ce   : > { %v3688_v34 = vpop.eup %3687  ;;  %v1937_v44 = vpack.c.bf16 %v1905_v27, %v1905_v27 }
 0x3cf   : > { %v3690_v21 = vpop.eup %3689  ;;  %v1900_v12 = vmul.f32 %v3688_v34, %v4695_v49  ;;  %v1809_v45 = vpop.xlane.xlu1 %1808 }
 0x3d0   : > { %3691 = vrcp.f32 %v1809_v45  ;;  %v1902_v5 = vmul.f32 %v3690_v21, %v4680_v16 }
 0x3d1   : > { %v1932_v39 = vpack.c.bf16 %v1900_v12, %v1900_v12  ;;  %3693 = vrcp.f32 %v1827_v7 }
 0x3d2   : > { %v1934_v49 = vpack.c.bf16 %v1902_v5, %v1902_v5 }
 0x3d3   : > { %3146 = vmatmul.msk.bf16.vlgmr.msrb.gmra.mxu3 %vm1566_vm2, %v1932_v39  ;;  %3151 = vmatmul.msk.bf16.vlgmr.msrb.gmra.mxu0 %vm1566_vm2, %v1937_v44 }
 0x3d4   : > { %2396 = vmatpush.bf16.msrb.mxu3 %v2387_v11  ;;  %v1833_v23 = vpop.xlane.xlu2 %1832  ;;  %v4836_v62 = vpop.permute.xlu0 %3517 }
 0x3d5   : > { %v3520_v44 = vunpack.i.h.bf16 %v4836_v62 }
 0x3d6   : > { %v3692_v15 = vpop.eup %3691 }
 0x3d7   : > { %v1903_v20 = vmul.f32 %v3692_v15, %v4706_v40  ;;  %v1812_v63 = vpop.xlane.xlu1 %1811  ;;  %v3694_v54 = vpop.eup %3693  ;;  %v1976_v40 = vpack.c.bf16 %v3510_v32, %v3510_v32  ;;  %v1980_v11 = vpack.c.bf16 %v3520_v44, %v3520_v44 }
 0x3d8   : > { %3695 = vrcp.f32 %v1812_v63  ;;  %3148 = vmatmul.msk.bf16.vlgmr.msra.gmra.mxu1 %vm1566_vm2, %v1934_v49  ;;  %v1909_v43 = vmul.f32 %v3694_v54, %v4650_v41 }
 0x3d9   : > { %3697 = vrcp.f32 %v1818_v55  ;;  %v1935_v16 = vpack.c.bf16 %v1903_v20, %v1903_v20  ;;  %v2463_v58 = vsel %vm1986_vm3, %v1976_v40, 0 }
 0x3da   : > { %v1941_v41 = vpack.c.bf16 %v1909_v43, %v1909_v43 }
 0x3db   : > { %3149 = vmatmul.msk.bf16.vlgmr.msrb.gmra.mxu2 %vm1566_vm2, %v1935_v16 }
 0x3dc   : > { %2453 = vmatpush.bf16.msrb.mxu2 %v2444_v61  ;;  %v3513_v24 = vpop.permute.xlu2 %3512  ;;  %v3523_v9 = vpop.permute.xlu0 %3522 }
 0x3dd   : > { %v3515_v7 = vunpack.i.h.bf16 %v3513_v24  ;;  %v3514_v51 = vunpack.i.l.bf16 %v3513_v24  ;;  %v3524_v30 = vunpack.i.l.bf16 %v3523_v9  ;;  %v3525_v50 = vunpack.i.h.bf16 %v3523_v9 }
 0x3de   : > { %v3696_v28 = vpop.eup %3695 }
 0x3df   : > { %v3698_v46 = vpop.eup %3697  ;;  %v1904_v52 = vmul.f32 %v3696_v28, %v4717_v4  ;;  %v1974_v3 = vpack.c.bf16 %v3515_v7, %v3515_v7  ;;  %v1973_v47 = vpack.c.bf16 %v3514_v51, %v3514_v51  ;;  %v1821_v0 = vpop.xlane.xlu1 %1820  ;;  %v1977_v57 = vpack.c.bf16 %v3524_v30, %v3524_v30 }
 0x3e0   : > { %3699 = vrcp.f32 %v1821_v0  ;;  %v1906_v17 = vmul.f32 %v3698_v46, %v4704_v36  ;;  %v3519_v4 = vunpack.i.l.bf16 %v4836_v62  ;;  %v1978_v55 = vpack.c.bf16 %v3525_v50, %v3525_v50 }
 0x3e1   : > { %v1936_v10 = vpack.c.bf16 %v1904_v52, %v1904_v52  ;;  %v2406_v1 = vsel %vm1986_vm3, %v1973_v47, 0  ;;  %v2425_v60 = vsel %vm1986_vm3, %v1974_v3, 0  ;;  %v2482_v33 = vsel %vm1986_vm3, %v1977_v57, 0 }
 0x3e2   : > { %2415 = vmatpush.bf16.msra.mxu0 %v2406_v1  ;;  %2434 = vmatpush.bf16.msra.mxu1 %v2425_v60  ;;  %v1938_v34 = vpack.c.bf16 %v1906_v17, %v1906_v17  ;;  %v1979_v21 = vpack.c.bf16 %v3519_v4, %v3519_v4  ;;  %v2501_v12 = vsel %vm1986_vm3, %v1978_v55, 0  ;;  %v2539_v62 = vsel %vm1986_vm3, %v1980_v11, 0 }
 0x3e3   : > { %3150 = vmatmul.msk.bf16.vlgmr.msra.gmra.mxu3 %vm1566_vm2, %v1936_v10 }
 0x3e4   : > { %2472 = vmatpush.bf16.msra.mxu3 %v2463_v58  ;;  %v2520_v39 = vsel %vm1986_vm3, %v1979_v21, 0 }
 0x3e5   : > { %3155 = vmatmul.msk.bf16.vlgmr.msra.gmra.mxu0 %vm1566_vm2, %v1941_v41 }
 0x3e6   : > { %2491 = vmatpush.bf16.msrb.mxu0 %v2482_v33  ;;  %v3700_v27 = vpop.eup %3699 }
 0x3e7   : > { %v1907_v36 = vmul.f32 %v3700_v27, %v4726_v13  ;;  %v1824_v59 = vpop.xlane.xlu1 %1823 }
 0x3e8   : > { %3701 = vrcp.f32 %v1824_v59  ;;  %3152 = vmatmul.msk.bf16.vlgmr.msrb.gmra.mxu1 %vm1566_vm2, %v1938_v34 }
 0x3e9   : > { %3703 = vrcp.f32 %v4821_v38  ;;  %v1939_v45 = vpack.c.bf16 %v1907_v36, %v1907_v36  ;;  %2510 = vmatpush.bf16.msrb.mxu1 %v2501_v12 }
 0x3ea   : > { %3705 = vrcp.f32 %v1833_v23 }
 0x3eb   : > { %3153 = vmatmul.msk.bf16.vlgmr.msra.gmra.mxu2 %vm1566_vm2, %v1939_v45 }
 0x3ec   : > { %2529 = vmatpush.bf16.msra.mxu2 %v2520_v39  ;;  %v4860_v5 = vpop.f32.mrf.mxu0 }
 0x3ee   : > { %v3702_v13 = vpop.eup %3701 }
 0x3ef   : > { %v3704_v29 = vpop.eup %3703  ;;  %v1908_v15 = vmul.f32 %v3702_v13, %v4737_v22  ;;  %v1836_v49 = vpop.xlane.xlu1 %1835 }
 0x3f0   : > { %v3706_v38 = vpop.eup %3705  ;;  %v1910_v20 = vmul.f32 %v3704_v29, %v4655_v6  ;;  %3707 = vrcp.f32 %v1836_v49 }
 0x3f1   : > { %v1940_v37 = vpack.c.bf16 %v1908_v15, %v1908_v15  ;;  %v1911_v23 = vmul.f32 %v3706_v38, %v4715_v56 }
 0x3f2   : > { %v1942_v32 = vpack.c.bf16 %v1910_v20, %v1910_v20 }
 0x3f3   : > { %3154 = vmatmul.msk.bf16.vlgmr.msrb.gmra.mxu3 %vm1566_vm2, %v1940_v37  ;;  %v1943_v6 = vpack.c.bf16 %v1911_v23, %v1911_v23 }
 0x3f4   : > { %2548 = vmatpush.bf16.msrb.mxu3 %v2539_v62  ;;  %v2115_v63 = vpop.f32.mrf.mxu0 }
 0x3f5   : > { %v4867_v16 = vpop.f32.mrf.mxu1 }
 0x3f6   : > { %v3561_v22 = vpack.i.bf16 %v4867_v16, %v4860_v5  ;;  %v3708_v54 = vpop.eup %3707  ;;  %v3253_v5 = vld [vmem:[%s5044_s7 + $0x38] sm:$0xff] }
 0x3f7   : > { %v1839_v61 = vpop.xlane.xlu1 %1838  ;;  %v1912_v56 = vmul.f32 %v3708_v54, %v4752_v26 }
 0x3f8   : > { %3709 = vrcp.f32 %v1839_v61  ;;  %3156 = vmatmul.msk.bf16.vlgmr.msra.gmra.mxu1 %vm1566_vm2, %v1942_v32 }
 0x3f9   : > { %3711 = vrcp.f32 %v4827_v8  ;;  %v1944_v30 = vpack.c.bf16 %v1912_v56, %v1912_v56 }
 0x3fa   : > { %v2075_v24 = vpop.f32.mrf.mxu2 }
 0x3fb   : > { %3157 = vmatmul.msk.bf16.vlgmr.msrb.gmra.mxu2 %vm1566_vm2, %v1943_v6 }
 0x3fc   : > { %v4875_v51 = vpop.f32.mrf.mxu0  ;;  %2850 = vmatpush.bf16.msrb.mxu2 %v3253_v5 }
 0x3fd   : > { %v2134_v7 = vpop.f32.mrf.mxu1 }
 0x3fe   : > { %v3710_v9 = vpop.eup %3709 }
 0x3ff   : > { %v1913_v28 = vmul.f32 %v3710_v9, %v4768_v42  ;;  %v1842_v40 = vpop.xlane.xlu1 %1841  ;;  %v3712_v43 = vpop.eup %3711 }
 0x400   : > { %3713 = vrcp.f32 %v1842_v40  ;;  %v1915_v8 = vmul.f32 %v3712_v43, %v4690_v2 }
 0x401   : > { %v1945_v46 = vpack.c.bf16 %v1913_v28, %v1913_v28 }
 0x402   : > { %v2077_v52 = vpop.f32.mrf.mxu2  ;;  %v1947_v0 = vpack.c.bf16 %v1915_v8, %v1915_v8 }
 0x403   : > { %3158 = vmatmul.msk.bf16.vlgmr.msra.gmra.mxu3 %vm1566_vm2, %v1944_v30  ;;  %3159 = vmatmul.msk.bf16.vlgmr.msrb.gmra.mxu0 %vm1566_vm2, %v1945_v46 }
 0x404   : > { %v2191_v3 = vpop.f32.mrf.mxu0 }
 0x406   : > { %v3714_v26 = vpop.eup %3713 }
 0x407   : > { %v1914_v47 = vmul.f32 %v3714_v26, %v4779_v35  ;;  %v1851_v1 = vpop.xlane.xlu1 %1850  ;;  %v1854_v17 = vpop.xlane.xlu0 %1853 }
 0x409   : > { %v1946_v50 = vpack.c.bf16 %v1914_v47, %v1914_v47 }
 0x40a   : > { %v2094_v57 = vpop.f32.mrf.mxu3 }
 0x40b   : > { %v3531_v42 = vpack.i.bf16 %v2094_v57, %v2075_v24  ;;  %3160 = vmatmul.msk.bf16.vlgmr.msrb.gmra.mxu1 %vm1566_vm2, %v1946_v50  ;;  %3161 = vmatmul.msk.bf16.vlgmr.msra.gmra.mxu2 %vm1566_vm2, %v1947_v0 }
 0x40d   : > { %3532 = vrot.lane.b32.xlu2 %v3531_v42, %s3924_s21 }
 0x412   : > { %v2096_v10 = vpop.f32.mrf.mxu3 }
 0x415   : > { %v1848_v60 = vpop.xlane.xlu2 %1847 }
 0x416   : > { %3715 = vrcp.f32 %v1848_v60 }
 0x417   : > { %3717 = vrcp.f32 %v1851_v1 }
 0x418   : > { %3719 = vrcp.f32 %v1854_v17 }
 0x41a   : > { %v2170_v2 = vpop.f32.mrf.mxu3 }
 0x41c   : > { %v3716_v33 = vpop.eup %3715 }
 0x41d   : > { %v1916_v35 = vmul.f32 %v3716_v33, %v4802_v19  ;;  %v3718_v41 = vpop.eup %3717 }
 0x41e   : > { %v3720_v4 = vpop.eup %3719  ;;  %v1917_v21 = vmul.f32 %v3718_v41, %v4785_v48 }
 0x41f   : > { %v1948_v58 = vpack.c.bf16 %v1916_v35, %v1916_v35  ;;  %v3528_v55 = vpop.permute.xlu1 %3527  ;;  %v1918_v36 = vmul.f32 %v3720_v4, %v4789_v25 }
 0x420   : > { %v3530_v27 = vunpack.i.h.bf16 %v3528_v55  ;;  %v3529_v34 = vunpack.i.l.bf16 %v3528_v55  ;;  %v1949_v19 = vpack.c.bf16 %v1917_v21, %v1917_v21 }
 0x421   : > { %3162 = vmatmul.msk.bf16.vlgmr.msrb.gmra.mxu3 %vm1566_vm2, %v1948_v58  ;;  %v1950_v13 = vpack.c.bf16 %v1918_v36, %v1918_v36  ;;  %v3252_v58 = vld [vmem:[%s5044_s7 + $0x30] sm:$0xff] }
 0x422   : > { %v1982_v59 = vpack.c.bf16 %v3530_v27, %v3530_v27  ;;  %v1981_v12 = vpack.c.bf16 %v3529_v34, %v3529_v34  ;;  %v2172_v45 = vpop.f32.mrf.mxu3  ;;  %2851 = vmatpush.bf16.msrb.mxu2 %v3252_v58  ;;  %v3250_v27 = vld [vmem:[%s5044_s7 + $0x20] sm:$0xff]  ;;  %v3249_v34 = vld [vmem:[%s5044_s7 + $0x18] sm:$0xff]  ;;  %v3248_v36 = vld [vmem:[%s5044_s7 + $0x10] sm:$0xff] }
 0x424   : > { %v2558_v44 = vsel %vm1986_vm3, %v1981_v12, 0  ;;  %v2577_v39 = vsel %vm1986_vm3, %v1982_v59, 0 }
 0x425   : > { %2567 = vmatpush.bf16.msra.mxu0 %v2558_v44  ;;  %2586 = vmatpush.bf16.msra.mxu1 %v2577_v39  ;;  %v3247_v44 = vld [vmem:[%s5044_s7 + $0x8] sm:$0xff] }
 0x428   : > { %3163 = vmatmul.msk.bf16.vlgmr.msra.gmra.mxu0 %vm1566_vm2, %v1949_v19  ;;  %3164 = vmatmul.msk.bf16.vlgmr.msra.gmra.mxu1 %vm1566_vm2, %v1950_v13 }
 0x43e   : > { %v2151_v29 = vpop.f32.mrf.mxu2 }
 0x43f   : > { %v3536_v11 = vpack.i.bf16 %v2170_v2, %v2151_v29 }
 0x440   : > { %v2265_v48 = vpop.f32.mrf.mxu0 }
 0x441   : > { %3537 = vrot.lane.b32.xlu1 %v3536_v11, %s3923_s18  ;;  %v3246_v11 = vld [vmem:[%s5044_s7] sm:$0xff] }
 0x445   : > { %v2208_v25 = vpop.f32.mrf.mxu1 }
 0x446   : > { %v2153_v15 = vpop.f32.mrf.mxu2  ;;  %v3566_v41 = vpack.i.bf16 %v2208_v25, %v4875_v51  ;;  %v3251_v51 = vld [vmem:[%s5044_s7 + $0x28] sm:$0xff] }
 0x447   : > { %2852 = vmatpush.bf16.msrb.mxu2 %v3251_v51 }
 0x448   : > { %v2267_v49 = vpop.f32.mrf.mxu0 }
 0x44b   : > { %2853 = vmatpush.bf16.msrb.mxu2 %v3250_v27 }
 0x44d   : > { %v2210_v37 = vpop.f32.mrf.mxu1 }
 0x44e   : > { %v2227_v38 = vpop.f32.mrf.mxu2 }
 0x44f   : > { %2854 = vmatpush.bf16.msrb.mxu2 %v3249_v34 }
 0x450   : > { %v4894_v20 = vpop.f32.mrf.mxu0 }
 0x453   : > { %2855 = vmatpush.bf16.msrb.mxu2 %v3248_v36 }
 0x455   : > { %v2284_v62 = vpop.f32.mrf.mxu1 }
 0x456   : > { %v2229_v23 = vpop.f32.mrf.mxu2  ;;  %v2246_v63 = vpop.f32.mrf.mxu3  ;;  %v3571_v1 = vpack.i.bf16 %v2284_v62, %v2265_v48 }
 0x457   : > { %v3541_v32 = vpack.i.bf16 %v2246_v63, %v2227_v38  ;;  %2856 = vmatpush.bf16.msrb.mxu2 %v3247_v44 }
 0x458   : > { %v2343_v61 = vpop.f32.mrf.mxu0 }
 0x459   : > { %3542 = vrot.lane.b32.xlu1 %v3541_v32, %s3925_s24 }
 0x45b   : > { %2857 = vmatpush.bf16.msrb.mxu2 %v3246_v11 }
 0x45d   : > { %v2286_v6 = vpop.f32.mrf.mxu1 }
 0x45e   : > { %v2248_v54 = vpop.f32.mrf.mxu3  ;;  %v4897_v24 = vpop.f32.mrf.mxu2 }
 0x462   : > { %v2417_v56 = vpop.f32.mrf.mxu0 }
 0x465   : > { %v4899_v7 = vpop.f32.mrf.mxu1 }
 0x466   : > { %v2305_v9 = vpop.f32.mrf.mxu2  ;;  %v4901_v28 = vpop.f32.mrf.mxu3 }
 0x467   : > { %v3533_v25 = vpop.permute.xlu2 %3532 }
 0x468   : > { %v3535_v15 = vunpack.i.h.bf16 %v3533_v25  ;;  %v3534_v49 = vunpack.i.l.bf16 %v3533_v25 }
 0x46a   : > { %v2419_v40 = vpop.f32.mrf.mxu0  ;;  %v2689_v23 = vsel %vm532_vm1, %v4781_v14, %v3535_v15  ;;  %v2688_v63 = vsel %vm532_vm1, %v4800_v31, %v3534_v49  ;;  %v3260_v14 = vld [vmem:[%s5044_s7 + $0x70] sm:$0xff]  ;;  %v3259_v31 = vld [vmem:[%s5044_s7 + $0x68] sm:$0xff] }
 0x46d   : > { %v2362_v30 = vpop.f32.mrf.mxu1 }
 0x46e   : > { %v2324_v46 = vpop.f32.mrf.mxu3  ;;  %v2379_v43 = vpop.f32.mrf.mxu2  ;;  %v3261_v30 = vld [vmem:[%s5044_s7 + $0x78] sm:$0xff] }
 0x46f   : > { %2869 = vmatpush.bf16.msra.mxu3 %v3261_v30 }
 0x473   : > { %2870 = vmatpush.bf16.msra.mxu3 %v3260_v14 }
 0x475   : > { %v2436_v52 = vpop.f32.mrf.mxu1 }
 0x476   : > { %v2381_v8 = vpop.f32.mrf.mxu2  ;;  %v2398_v3 = vpop.f32.mrf.mxu3  ;;  %v3576_v55 = vpack.i.bf16 %v2436_v52, %v2417_v56  ;;  %v3257_v52 = vld [vmem:[%s5044_s7 + $0x58] sm:$0xff] }
 0x477   : > { %v3546_v26 = vpack.i.bf16 %v2398_v3, %v2379_v43  ;;  %2871 = vmatpush.bf16.msra.mxu3 %v3259_v31  ;;  %v3258_v43 = vld [vmem:[%s5044_s7 + $0x60] sm:$0xff]  ;;  %v3256_v8 = vld [vmem:[%s5044_s7 + $0x50] sm:$0xff] }
 0x479   : > { %3547 = vrot.lane.b32.xlu2 %v3546_v26, %s3924_s21  ;;  %v3255_v26 = vld [vmem:[%s5044_s7 + $0x48] sm:$0xff] }
 0x47b   : > { %2872 = vmatpush.bf16.msra.mxu3 %v3258_v43 }
 0x47d   : > { %v2438_v47 = vpop.f32.mrf.mxu1 }
 0x47e   : > { %v2400_v0 = vpop.f32.mrf.mxu3  ;;  %v2455_v50 = vpop.f32.mrf.mxu2 }
 0x47f   : > { %2873 = vmatpush.bf16.msra.mxu3 %v3257_v52  ;;  %v3254_v0 = vld [vmem:[%s5044_s7 + $0x40] sm:$0xff] }
 0x480   : > { %v2493_v57 = vpop.f32.mrf.mxu0 }
 0x481   : > { %3562 = vrot.lane.b32.xlu2 %v3561_v22, %s3924_s21 }
 0x483   : > { %2874 = vmatpush.bf16.msra.mxu3 %v3256_v8 }
 0x486   : > { %v2457_v42 = vpop.f32.mrf.mxu2  ;;  %v2474_v10 = vpop.f32.mrf.mxu3 }
 0x487   : > { %v3551_v60 = vpack.i.bf16 %v2474_v10, %v2455_v50  ;;  %2875 = vmatpush.bf16.msra.mxu3 %v3255_v26 }
 0x488   : > { %v2495_v17 = vpop.f32.mrf.mxu0  ;;  %v2512_v2 = vpop.f32.mrf.mxu1 }
 0x489   : > { %3572 = vrot.lane.b32.xlu2 %v3571_v1, %s3925_s24  ;;  %3552 = vrot.lane.b32.xlu1 %v3551_v60, %s3923_s18  ;;  %v3581_v4 = vpack.i.bf16 %v2512_v2, %v2493_v57 }
 0x48b   : > { %2876 = vmatpush.bf16.msra.mxu3 %v3254_v0 }
 0x48e   : > { %v2476_v33 = vpop.f32.mrf.mxu3  ;;  %v2531_v35 = vpop.f32.mrf.mxu2 }
 0x490   : > { %v2514_v16 = vpop.f32.mrf.mxu1 }
 0x491   : > { %3567 = vrot.lane.b32.xlu1 %v3566_v41, %s3923_s18  ;;  %3582 = vrot.lane.b32.xlu2 %v3581_v4, %s3923_s18 }
 0x496   : > { %v2533_v22 = vpop.f32.mrf.mxu2 }
 0x499   : > { %3577 = vrot.lane.b32.xlu1 %v3576_v55, %s3924_s21 }
 0x4a4   : > { %v2550_v21 = vpop.f32.mrf.mxu3 }
 0x4a5   : > { %v3556_v59 = vpack.i.bf16 %v2550_v21, %v2531_v35  ;;  %v2569_v12 = vpop.f32.mrf.mxu0  ;;  %v2588_v45 = vpop.f32.mrf.mxu1 }
 0x4a6   : > { %v3586_v19 = vpack.i.bf16 %v2588_v45, %v2569_v12 }
 0x4a7   : > { %3557 = vrot.lane.b32.xlu0 %v3556_v59, %s3925_s24 }
 0x4ac   : > { %v2552_v39 = vpop.f32.mrf.mxu3 }
 0x4ad   : > { %v2571_v13 = vpop.f32.mrf.mxu0  ;;  %v2590_v29 = vpop.f32.mrf.mxu1 }
 0x4af   : > { %3587 = vrot.lane.b32.xlu0 %v3586_v19, %s3925_s24 }
 0x4b3   : > { %v3538_v48 = vpop.permute.xlu1 %3537 }
 0x4b4   : > { %v3540_v37 = vunpack.i.h.bf16 %v3538_v48  ;;  %v3539_v38 = vunpack.i.l.bf16 %v3538_v48 }
 0x4b6   : > { %v2694_v6 = vsel %vm2692_vm4, %v2689_v23, %v3540_v37  ;;  %v2693_v54 = vsel %vm2692_vm4, %v2688_v63, %v3539_v38 }
 0x4cb   : > { %v3543_v62 = vpop.permute.xlu1 %3542 }
 0x4cc   : > { %v3545_v32 = vunpack.i.h.bf16 %v3543_v62  ;;  %v3544_v61 = vunpack.i.l.bf16 %v3543_v62 }
 0x4ce   : > { %v2699_v56 = vsel %vm2697_vm5, %v2694_v6, %v3545_v32  ;;  %v2698_v9 = vsel %vm2697_vm5, %v2693_v54, %v3544_v61 }
 0x4cf   : > { %v2714_v40 = vpack.c.bf16 %v2699_v56, %v2698_v9 }
 0x4d1   : > { %2858 = vmatmul.bf16.vlgmr.msrb.gmra.mxu2 %v2714_v40 }
 0x4d3   : > { %v3548_v46 = vpop.permute.xlu2 %3547 }
 0x4d4   : > { %v3550_v58 = vunpack.i.h.bf16 %v3548_v46  ;;  %v3549_v55 = vunpack.i.l.bf16 %v3548_v46 }
 0x4d6   : > { %v2702_v34 = vsel %vm532_vm1, %v4897_v24, %v3549_v55 }
 0x4db   : > { %v3563_v3 = vpop.permute.xlu2 %3562 }
 0x4dc   : > { %v3565_v50 = vunpack.i.h.bf16 %v3563_v3  ;;  %v3564_v57 = vunpack.i.l.bf16 %v3563_v3 }
 0x4de   : > { %v2691_v17 = vsel %vm532_vm1, %v4763_v53, %v3565_v50  ;;  %v2690_v2 = vsel %vm532_vm1, %v4748_v18, %v3564_v57  ;;  %v2703_v18 = vsel %vm532_vm1, %v4901_v28, %v3550_v58 }
 0x4e3   : > { %v3573_v42 = vpop.permute.xlu2 %3572 }
 0x4e4   : > { %v3575_v33 = vunpack.i.h.bf16 %v3573_v42  ;;  %v3574_v35 = vunpack.i.l.bf16 %v3573_v42 }
 0x4eb   : > { %v3583_v28 = vpop.permute.xlu2 %3582 }
 0x4ec   : > { %v3585_v49 = vunpack.i.h.bf16 %v3583_v28  ;;  %v3584_v37 = vunpack.i.l.bf16 %v3583_v28 }
 0x4fb   : > { %v3553_v47 = vpop.permute.xlu1 %3552 }
 0x4fc   : > { %v3555_v51 = vunpack.i.h.bf16 %v3553_v47  ;;  %v3554_v27 = vunpack.i.l.bf16 %v3553_v47 }
 0x4fe   : > { %v2707_v59 = vsel %vm2692_vm4, %v2703_v18, %v3555_v51  ;;  %v2706_v12 = vsel %vm2692_vm4, %v2702_v34, %v3554_v27 }
 0x503   : > { %v3568_v10 = vpop.permute.xlu1 %3567 }
 0x504   : > { %v3570_v1 = vunpack.i.h.bf16 %v3568_v10  ;;  %v3569_v60 = vunpack.i.l.bf16 %v3568_v10 }
 0x506   : > { %v2696_v41 = vsel %vm2692_vm4, %v2691_v17, %v3570_v1  ;;  %v2695_v4 = vsel %vm2692_vm4, %v2690_v2, %v3569_v60 }
 0x507   : > { %v2700_v5 = vsel %vm2697_vm5, %v2695_v4, %v3574_v35  ;;  %v2701_v16 = vsel %vm2697_vm5, %v2696_v41, %v3575_v33 }
 0x508   : > { %v2716_v22 = vpack.c.bf16 %v2701_v16, %v2700_v5 }
 0x50a   : > { %2863 = vmatmul.bf16.gmra.mxu2 %v2716_v22 }
 0x50b   : > { %v3578_v19 = vpop.permute.xlu1 %3577 }
 0x50c   : > { %v3580_v13 = vunpack.i.h.bf16 %v3578_v19  ;;  %v3579_v29 = vunpack.i.l.bf16 %v3578_v19 }
 0x50e   : > { %v2705_v24 = vsel %vm532_vm1, %v4899_v7, %v3580_v13  ;;  %v2704_v48 = vsel %vm532_vm1, %v4894_v20, %v3579_v29  ;;  %v3592_v7 = vld [vmem:[%s5045_s8] ss:$0 sm:$0xff] }
 0x50f   : > { %v2708_v38 = vsel %vm2692_vm4, %v2704_v48, %v3584_v37  ;;  %v2709_v62 = vsel %vm2692_vm4, %v2705_v24, %v3585_v49 }
 0x519   : > { %v3558_v53 = vpop.permute.xlu0 %3557 }
 0x51a   : > { %v3560_v21 = vunpack.i.h.bf16 %v3558_v53  ;;  %v3559_v36 = vunpack.i.l.bf16 %v3558_v53 }
 0x51c   : > { %v2711_v45 = vsel %vm2697_vm5, %v2707_v59, %v3560_v21  ;;  %v2710_v44 = vsel %vm2697_vm5, %v2706_v12, %v3559_v36 }
 0x51d   : > { %v2715_v39 = vpack.c.bf16 %v2711_v45, %v2710_v44 }
 0x51f   : > { %2877 = vmatmul.bf16.vlgmr.msra.gmra.mxu3 %v2715_v39 }
 0x521   : > { %v3588_v11 = vpop.permute.xlu0 %3587 }
 0x522   : > { %v3590_v25 = vunpack.i.h.bf16 %v3588_v11  ;;  %v3589_v15 = vunpack.i.l.bf16 %v3588_v11 }
 0x524   : > { %v2712_v23 = vsel %vm2697_vm5, %v2708_v38, %v3589_v15  ;;  %v2713_v63 = vsel %vm2697_vm5, %v2709_v62, %v3590_v25 }
 0x525   : > { %v2717_v32 = vpack.c.bf16 %v2713_v63, %v2712_v23 }
 0x52f   : > { %2882 = vmatmul.bf16.gmra.mxu3 %v2717_v32 }
 0x554   : > { %v2859_v61 = vpop.f32.mrf.mxu2 }
 0x555   : > { %v2860_v20 = vadd.f32 %v3592_v7, %v2859_v61 }
 0x55c   : > { %v2861_v56 = vpop.f32.mrf.mxu2 }
 0x55d   : > { %v2862_v9 = vadd.f32 %v3592_v7, %v2861_v56 }
 0x58d   : > { %v2864_v14 = vpop.f32.mrf.mxu2 }
 0x58e   : > { %v2865_v31 = vadd.f32 %v3592_v7, %v2864_v14 }
 0x595   : > { %v2866_v52 = vpop.f32.mrf.mxu2 }
 0x596   : > { %v2867_v8 = vadd.f32 %v3592_v7, %v2866_v52 }
 0x5a2   : > { %v2878_v6 = vpop.f32.mrf.mxu3 }
 0x5a3   : > { %v2879_v54 = vadd.f32 %v2878_v6, %v2860_v20 }
 0x5aa   : > { %v2880_v40 = vpop.f32.mrf.mxu3 }
 0x5ab   : > { %v2881_v30 = vadd.f32 %v2880_v40, %v2862_v9 }
 0x5ad   : > { %2889 = vrot.lane.b32.xlu1 %v2881_v30, %s3924_s21  ;;  %s387_s21 = scalar_lea.vmem [#allocation10], %s3032_s28 }
 0x5ae   : > { %s2917_s11 = sshll.u32 %s387_s21, 4  ;;  %s2918_s11 = int_to_ptr.vmem [resolvable:$true] %s2917_s11 }
 0x5b2   : > { %v2883_v46 = vpop.f32.mrf.mxu3 }
 0x5b3   : > { %v2884_v43 = vadd.f32 %v2883_v46, %v2865_v31 }
 0x5b5   : > { %2893 = vrot.lane.b32.xlu2 %v2884_v43, %s3923_s18  ;;  %s2919_s18 = sshll.u32 %s2915_s2, 4  ;;  %s2920_s18 = int_to_ptr.hbm [resolvable:$true] %s2919_s18 }
 0x5ba   : > { %v2885_v3 = vpop.f32.mrf.mxu3 }
 0x5bb   : > { %v2886_v26 = vadd.f32 %v2885_v3, %v2867_v8 }
 0x5bd   : > { %2897 = vrot.lane.b32.xlu0 %v2886_v26, %s3925_s24  ;;  %s3855_s24 = sshra.s32 %s2920_s18, 4  ;;  %s3856_s24 = int_to_ptr.hbm [resolvable:$true] %s3855_s24 }
 0x5be   : > { %s3857_s15 = scalar_lea.hbm %s3856_s24, 8  ;;  %p3862_p3 = scmp.lt.s32.totalorder %s3856_s24, %s5046_s9 }
 0x5bf   : > { %p3858_p0 = scmp.ne.s32.totalorder %s3856_s24, %s3857_s15  ;;  %p3863_p4 = scmp.lt.s32.totalorder %s3861_s14, %s3857_s15 }
 0x5c1   : > { %p3859_p1 = pnand %p3858_p0, %p4014_p5  ;;  %p3864_p7 = por %p3863_p4, %p3862_p3 }
 0x5c3   : > { %p3860_p2 = pneg %p3859_p1 }
 0x5c5   : > { %p3865_p8 = pnand %p3864_p7, %p3860_p2 }
 0x60f   : > { %v2894_v50 = vpop.permute.xlu2 %2893 }
 0x61f   : > { %v2890_v47 = vpop.permute.xlu1 %2889 }
 0x620   : > { %v2900_v0 = vsel %vm532_vm1, %v2879_v54, %v2890_v47 }
 0x621   : > { %v2901_v42 = vsel %vm2692_vm4, %v2900_v0, %v2894_v50 }
 0x62f   : > { %v2898_v57 = vpop.permute.xlu0 %2897 }
 0x630   : > { %v2902_v10 = vsel %vm2697_vm5, %v2901_v42, %v2898_v57 }
 0x631   : > { %2903 = vst [vmem:[%s387_s21] sm:$0xff] %v2902_v10 }
 0x632   : > { %3868 = shalt.err (!%p3865_p8)
}
 0x633   : > { %3282 = dma.vmem_to_hbm [thread:$0]  (%p4014_p5), %s2918_s11, 128, %s2920_s18, %s2905_s13  }
 0x634 PF: > { %p3309_p9 = scmp.ge.s32.totalorder %s3915_s12, 2  ;;  %s2931_s25 = sand.u32 1, %s3903_s30  }
 0x635   : > { %s2932_s27 = scalar_lea.sflag [#allocation4], %s2931_s25 }
 0x636   : > { %p3298_p10 = pnand %p3309_p9, %p4018_p6 }
 0x638   : > { %p3299_p11 = pneg %p3298_p10 }
 0x63a   : > { %3898 = dma.done.wait (%p3299_p11), %s2932_s27, 128  }
 0x63b   : > { %3900 = vsyncadd (%p3299_p11), %s2932_s27, 4294967168  ;;  %s5061_s12 = sld [smem:[#allocation16_spill]]  ;;  %s5064_s30 = smov %s3907_s10 }
 0x63c   : > { %s5062_s28 = sld [smem:[#allocation15_spill]] }
 0x63d   : > { %s5063_s11 = sld [smem:[#allocation17_spill]] }
 0x641   : > { %p22_p12 = scmp.ge.s32.totalorder %s5061_s12, 4  }
 0x642   : > { %s5065_s10 = smov %s5062_s28 }
 0x643   :  { %24 = sbr.rel (!%p22_p12) target bundleno = 9 (0x9), region = 108 }
 0x648   :  { %2938 = vsyncpa [#allocation3], 1 }
 0x649   :  { %2940 = vsyncpa [#allocation3 + $0x1], 1 }
 0x64a   :  { %2941 = vsyncpa [#allocation6], 1 }
 0x64b   :  { %2942 = vsyncpa [#allocation9], 1 }
 0x64c   :  { %2943 = vsyncpa [#allocation4], 1 }
 0x64d   :  { %2945 = vsyncpa [#allocation4 + $0x1], 1 }

// kernel: tpu_custom_call.1
= control target key start
LH: loop header
LB: loop body
LE: loop exit
PB: predicated region body
PF: predicated region fallthrough
CT: control target
= control target key end

     0   :  { %s5037_s0 = inlined_call_operand.vmem [shape: f32[8,8,16], index: 0, kind: input, shape index: {}]   ;;  %s5038_s1 = inlined_call_operand.hbm [shape: f32[8,32], index: 1, kind: input, shape index: {}]   ;;  %s5039_s2 = inlined_call_operand.hbm [shape: f32[8,8], index: 2, kind: input, shape index: {}]   ;;  %s5040_s3 = inlined_call_operand.hbm [shape: bf16[16,32], index: 3, kind: input, shape index: {}]   ;;  %s5041_s4 = inlined_call_operand.vmem [shape: f32[1,32], index: 4, kind: input, shape index: {}]   ;;  %s5042_s5 = inlined_call_operand.vmem [shape: bf16[32,768], index: 5, kind: input, shape index: {}]   ;;  %s5043_s6 = inlined_call_operand.hbm [shape: f32[1,768], index: 6, kind: input, shape index: {}]   ;;  %s5044_s7 = inlined_call_operand.vmem [shape: bf16[256,32], index: 7, kind: input, shape index: {}]   ;;  %s5045_s8 = inlined_call_operand.vmem [shape: f32[1,32], index: 8, kind: input, shape index: {}]   ;;  %s5046_s9 = inlined_call_operand.hbm [shape: f32[2,8,128], index: 9, kind: output, shape index: {}]  }
   0x1   :  { %5050 = sst [smem:[#allocation18_spill]] %s5038_s1 }
   0x2   :  { %5051 = sst [smem:[#allocation19_spill]] %s5039_s2 }
   0x3   :  { %14 = vsyncpa [#allocation3], 0 }
   0x4   :  { %15 = vsyncpa [#allocation6], 0 }
   0x5   :  { %16 = vsyncpa [#allocation9], 0 }
   0x6   :  { %17 = vsyncpa [#allocation4], 0 }
   0x7   :  { %19 = vsyncpa [#allocation4 + $0x1], 0  ;;  %s3976_s30 = smov 0   ;;  %s3978_s10 = smov 0  }
   0x8   :  { %s3980_s11 = smov 0   ;;  %s3982_s12 = smov 0  }
   0x9 LB: > { %5052 = sst [smem:[#allocation15_spill]] %s3911_s11  ;;  %s3997_s13 = sadd.s32 4294967295, %s3915_s12   ;;  %s3915_s12 = sphi %s3982_s12, %s5061_s12   ;;  %s3911_s11 = sphi %s3980_s11, %s5063_s11   ;;  %s3907_s10 = sphi %s3978_s10, %s5065_s10   ;;  %s3903_s30 = sphi %s3976_s30, %s5064_s30  }
   0xa   : > { %s3020_s14 = sadd.s32 4294967294, %s3915_s12   ;;  %s4001_s15 = sadd.s32 1, %s3915_s12  }
   0xb   : > { %5053 = sst [smem:[#allocation16_spill]] %s4001_s15  ;;  %s226_s16 = sadd.s32 1, %s3911_s11 }
   0xc   : > { %s223_s17 = ssub.s32 %s3915_s12, %s4001_s15  ;;  %p236_p0 = scmp.ne.s32.totalorder %s3911_s11, %s3907_s10 }
   0xd   : > { %p224_p1 = scmp.eq.s32.totalorder %s223_s17, 0  ;;  %p237_p2 = scmp.eq.s32.totalorder %s3997_s13, 1 }
   0xe   : > { %p242_p3 = scmp.ne.s32.totalorder %s3907_s10, %s3903_s30  ;;  %p243_p4 = scmp.eq.s32.totalorder %s3020_s14, 1 }
   0xf   : > { %s4012_s18 = scalar_select %p224_p1, %s3911_s11, %s226_s16  }
  0x10   : > { %p4014_p5 = por %p237_p2, %p236_p0  ;;  %p4018_p6 = por %p243_p4, %p242_p3 }
  0x11   : > { %5054 = sst [smem:[#allocation17_spill]] %s4012_s18  ;;  %p3021_p7 = scmp.ge.s32.totalorder %s3915_s12, 1 }
  0x12   : > { %p250_p8 = scmp.lt.s32.totalorder %s3915_s12, 3  ;;  %p3301_p9 = scmp.eq.s32.totalorder %s3997_s13, 0 }
  0x13   : > { %s5058_s2 = sld [smem:[#allocation19_spill]]  ;;  %s3917_s25 = smov [#allocation5]  }
  0x14   : > { %p4025_p10 = pnand %p3021_p7, %p250_p8  ;;  %s276_s26 = sshll.u32 %s3917_s25, 4  ;;  %s277_s26 = int_to_ptr.vmem [resolvable:$true] %s276_s26 }
  0x15   : > { %s5059_s1 = sld [smem:[#allocation18_spill]]  ;;  %s285_s22 = sshll.u32 %s5040_s3, 4  ;;  %s286_s22 = int_to_ptr.hbm [resolvable:$true] %s285_s22 }
  0x16   : > { %p3284_p11 = pneg %p4025_p10  ;;  %s3918_s23 = smov [#allocation2]  }
  0x17   : > { %s264_s25 = sshll.u32 %s3918_s23, 4  ;;  %s3919_s27 = smov [#allocation7]   ;;  %s265_s25 = int_to_ptr.vmem [resolvable:$true] %s264_s25 }
  0x18   : > { %p4039_p12 = pnand %p3301_p9, %p3284_p11  ;;  %s287_s28 = sshll.u32 %s3919_s27, 4  ;;  %s288_s28 = int_to_ptr.vmem [resolvable:$true] %s287_s28 }
  0x19   : > { %s274_s24 = sshll.u32 %s5058_s2, 4  ;;  %s306_s18 = sshll.u32 %s5043_s6, 4  ;;  %s275_s24 = int_to_ptr.hbm [resolvable:$true] %s274_s24  ;;  %s307_s18 = int_to_ptr.hbm [resolvable:$true] %s306_s18 }
  0x1a   : > { %3290 = dma.hbm_to_vmem [thread:$0]  (!%p4039_p12), %s275_s24, 128, %s277_s26, [#allocation6]  }
  0x1b   : > { %s262_s29 = sshll.u32 %s5059_s1, 4  ;;  %s3920_s11 = smov 64   ;;  %s263_s29 = int_to_ptr.hbm [resolvable:$true] %s262_s29 }
  0x1c   : > { %3287 = dma.hbm_to_vmem [thread:$0]  (!%p4039_p12), %s263_s29, 128, %s265_s25, [#allocation3]  }
  0x1d   : > { %s3921_s15 = smov 4   ;;  %s3922_s16 = smov [#allocation8]  }
  0x1e   : > { %3293 = dma.hbm_to_vmem [thread:$0]  (!%p4039_p12), %s286_s22, 128, %s288_s28, [#allocation6], %s3920_s11, %s3920_s11, %s3921_s15  }
  0x1f   : > { %s308_s17 = sshll.u32 %s3922_s16, 4  ;;  %336 = sbr.rel (%p4025_p10) target bundleno = 1588 (0x634), region = 56  ;;  %s309_s17 = int_to_ptr.vmem [resolvable:$true] %s308_s17 }
  0x20   : > { %3296 = dma.hbm_to_vmem [thread:$0]  (!%p4039_p12), %s307_s18, 96, %s309_s17, [#allocation9]  }
  0x24   : > { %3886 = dma.done.wait (%p3301_p9), [#allocation3], 128  }
  0x25   : > { %3888 = vsyncadd (%p3301_p9), [#allocation3], 4294967168 }
  0x26   : > { %3890 = dma.done.wait (%p3301_p9), [#allocation6], 256  }
  0x27   : > { %3892 = vsyncadd (%p3301_p9), [#allocation6], 4294967040 }
  0x28   : > { %3894 = dma.done.wait (%p3301_p9), [#allocation9], 96  }
  0x29   : > { %3896 = vsyncadd (%p3301_p9), [#allocation9], 4294967200  ;;  %s3033_s1 = sshll.u32 %s3997_s13, 2  ;;  %v3233_v0 = vld [vmem:[#allocation7] sm:$0xff]  ;;  %vm413_vm0 = vcmask 130048   ;;  %v439_v40 = vld [vmem:[#allocation2] sm:$0xff] }
  0x2a   : > { %p389_p13 = scmp.lt.s32.totalorder %s3033_s1, 7  ;;  %427 = vmatpush.bf16.msra.mxu0 %v3233_v0  ;;  %v3067_v7 = vld [vmem:[%s5042_s5 + $0x30] sm:$0xf]  ;;  %v3243_v8 = vld [vmem:[%s5042_s5 + $0x44] sm:$0xf0]  ;;  %vm532_vm1 = vcmask 261120  }
  0x2b   : > { %v3240_v9 = vld [vmem:[%s5042_s5 + $0x34] sm:$0xf]  ;;  %v3068_v10 = vor.u32 %v3243_v8, %v3067_v7  ;;  %v3069_v11 = vld [vmem:[%s5042_s5 + $0x48] sm:$0xf0]  ;;  %v3043_v13 = vld [vmem:[%s5042_s5] sm:$0xf] }
  0x2c   : > { %s5067_s1 = smov (!%p389_p13, %s3033_s1), 7  ;;  %v3072_v12 = vor.u32 %v3240_v9, %v3069_v11  ;;  %v3237_v14 = vld [vmem:[%s5042_s5 + $0x14] sm:$0xf0]  ;;  %v3234_v15 = vld [vmem:[%s5042_s5 + $0x4] sm:$0xf]  ;;  %s3924_s21 = smov 32  }
  0x2d   : > { %s3034_s2 = sshll.u32 %s5067_s1, 3  ;;  %545 = vmatpush.bf16.msra.mxu1 %v3068_v10  ;;  %v3044_v16 = vor.u32 %v3237_v14, %v3043_v13  ;;  %v3045_v17 = vld [vmem:[%s5042_s5 + $0x18] sm:$0xf0]  ;;  %v3075_v19 = vld [vmem:[%s5042_s5 + $0x38] sm:$0xf]  ;;  %s3925_s24 = smov 96  }
  0x2e   : > { %s392_s18 = scalar_lea.vmem %s5037_s0, %s3034_s2  ;;  %564 = vmatpush.bf16.msrb.mxu0 %v3072_v12  ;;  %3262 = vmatpush.bf16.msra.mxu2 %v3072_v12  ;;  %v3048_v18 = vor.u32 %v3234_v15, %v3045_v17  ;;  %v3244_v20 = vld [vmem:[%s5042_s5 + $0x4c] sm:$0xf0]  ;;  %v3241_v21 = vld [vmem:[%s5042_s5 + $0x3c] sm:$0xf]  ;;  %v3077_v23 = vld [vmem:[%s5042_s5 + $0x50] sm:$0xf0] }
  0x2f   : > { %v395_v1 = vld [vmem:[%s392_s18] sm:$0xff]  ;;  %v396_v2 = vld [vmem:[%s392_s18 + $0x8] sm:$0xff]  ;;  %v397_v4 = vld [vmem:[%s392_s18 + $0x10] sm:$0xff]  ;;  %v3076_v22 = vor.u32 %v3244_v20, %v3075_v19  ;;  %v3080_v24 = vor.u32 %v3241_v21, %v3077_v23  ;;  %vm1566_vm2 = vcmask 64512   ;;  %vm1986_vm3 = vcmask 1043456   ;;  %s385_s27 = sand.u32 1, %s3907_s10  }
  0x30   : > { %v399_v3 = vpack.c.bf16 %v396_v2, %v395_v1  ;;  %v398_v5 = vld [vmem:[%s392_s18 + $0x18] sm:$0xff]  ;;  %v3051_v25 = vld [vmem:[%s5042_s5 + $0x8] sm:$0xf]  ;;  %v3238_v26 = vld [vmem:[%s5042_s5 + $0x1c] sm:$0xf0]  ;;  %s3923_s18 = smov 64  }
  0x31   : > { %v400_v6 = vpack.c.bf16 %v398_v5, %v397_v4  ;;  %546 = vmatpush.bf16.msra.mxu1 %v3044_v16  ;;  %3264 = vmatpush.bf16.msra.mxu3 %v3076_v22  ;;  %v3235_v27 = vld [vmem:[%s5042_s5 + $0xc] sm:$0xf]  ;;  %v3052_v28 = vor.u32 %v3238_v26, %v3051_v25  ;;  %v3053_v29 = vld [vmem:[%s5042_s5 + $0x20] sm:$0xf0]  ;;  %v3085_v33 = vld [vmem:[%s5042_s5 + $0x58] sm:$0xf0] }
  0x32   : > { %3039 = vmatmul.msk.bf16.vlgmr.msra.gmra.mxu0 %vm413_vm0, %v399_v3  ;;  %3263 = vmatpush.bf16.msra.mxu2 %v3048_v18  ;;  %v3056_v30 = vor.u32 %v3235_v27, %v3053_v29  ;;  %v3242_v32 = vld [vmem:[%s5042_s5 + $0x44] sm:$0xf]  ;;  %v3236_v34 = vld [vmem:[%s5042_s5 + $0x14] sm:$0xf]  ;;  %v3061_v36 = vld [vmem:[%s5042_s5 + $0x28] sm:$0xf0] }
  0x33   : > { %565 = vmatpush.bf16.msrb.mxu0 %v3048_v18  ;;  %v3088_v35 = vor.u32 %v3242_v32, %v3085_v33  ;;  %v3591_v37 = vld [vmem:[%s5041_s4] ss:$0 sm:$0xff]  ;;  %v3064_v38 = vor.u32 %v3236_v34, %v3061_v36  ;;  %v3245_v48 = vld [vmem:[%s5042_s5 + $0x54] sm:$0xf0]  ;;  %v3059_v49 = vld [vmem:[%s5042_s5 + $0x10] sm:$0xf] }
  0x34   : > { %v3083_v47 = vld [vmem:[%s5042_s5 + $0x40] sm:$0xf]  ;;  %v3239_v51 = vld [vmem:[%s5042_s5 + $0x24] sm:$0xf0]  ;;  %v4162_v60 = vld [vmem:[#allocation8] sm:$0x3f] }
  0x35   : > { %583 = vmatpush.bf16.msrb.mxu1 %v3076_v22  ;;  %3265 = vmatpush.bf16.msra.mxu3 %v3052_v28  ;;  %v3084_v50 = vor.u32 %v3245_v48, %v3083_v47  ;;  %v3060_v52 = vor.u32 %v3239_v51, %v3059_v49  ;;  %v460_v61 = vperm.slane %v4162_v60, 0  ;;  %v462_v5 = vperm.slane %v4162_v60, 2  ;;  %s3032_s28 = sshll.u32 %s385_s27, 3  ;;  %s3230_s16 = sshll.u32 %s3997_s13, 3 }
  0x36   : > { %640 = vmatpush.bf16.msrb.mxu2 %v3088_v35  ;;  %v465_v34 = vperm.slane %v4162_v60, 5  ;;  %vm2692_vm4 = vcmask 523264   ;;  %vm2697_vm5 = vcmask 785408   ;;  %s2915_s2 = scalar_lea.hbm %s5046_s9, %s3230_s16  ;;  %s2905_s13 = scalar_lea.sflag [#allocation4], %s385_s27 }
  0x37   : > { %602 = vmatpush.bf16.msra.mxu0 %v3080_v24  ;;  %v461_v24 = vperm.slane %v4162_v60, 1  ;;  %s3861_s14 = scalar_lea.hbm %s5046_s9, 16 }
  0x39   : > { %584 = vmatpush.bf16.msrb.mxu1 %v3052_v28 }
  0x3a   : > { %641 = vmatpush.bf16.msrb.mxu2 %v3064_v38  ;;  %v463_v38 = vperm.slane %v4162_v60, 3 }
  0x3b   : > { %603 = vmatpush.bf16.msra.mxu0 %v3056_v30 }
  0x42   : > { %3040 = vmatmul.msk.bf16.gmra.mxu0 %vm413_vm0, %v400_v6 }
  0xaf   : > { %v429_v31 = vpop.f32.mrf.mxu0 }
  0xb0   : > { %v430_v39 = vadd.f32 %v3591_v37, %v429_v31 }
  0xb2   : > { %v440_v43 = vadd.f32 %v439_v40, %v430_v39 }
  0xb7   : > { %v431_v41 = vpop.f32.mrf.mxu0 }
  0xb8   : > { %v432_v42 = vadd.f32 %v3591_v37, %v431_v41 }
  0xba   : > { %v441_v44 = vadd.f32 %v439_v40, %v432_v42 }
  0xbc   : > { %v444_v45 = vpack.c.bf16 %v441_v44, %v440_v43 }
  0xbe   : > { %3089 = vmatmul.msk.bf16.vlgmr.msra.gmra.mxu1 %vm532_vm1, %v444_v45  ;;  %3091 = vmatmul.msk.bf16.vlgmr.msrb.gmra.mxu0 %vm532_vm1, %v444_v45 }
  0xbf   : > { %v434_v46 = vpop.f32.mrf.mxu0  ;;  %621 = vmatpush.bf16.msra.mxu1 %v3084_v50 }
  0xc0   : > { %v435_v53 = vadd.f32 %v3591_v37, %v434_v46 }
  0xc2   : > { %v442_v56 = vadd.f32 %v439_v40, %v435_v53 }
  0xc3   : > { %622 = vmatpush.bf16.msra.mxu1 %v3060_v52 }
  0xc7   : > { %v436_v54 = vpop.f32.mrf.mxu0 }
  0xc8   : > { %v437_v55 = vadd.f32 %v3591_v37, %v436_v54 }
  0xca   : > { %v443_v57 = vadd.f32 %v439_v40, %v437_v55 }
  0xcc   : > { %v445_v58 = vpack.c.bf16 %v443_v57, %v442_v56 }
  0xce   : > { %3090 = vmatmul.msk.bf16.gmra.mxu1 %vm532_vm1, %v445_v58  ;;  %3092 = vmatmul.msk.bf16.vlgmr.msra.gmra.mxu2 %vm532_vm1, %v445_v58 }
  0xcf   : > { %3094 = vmatmul.msk.bf16.vlgmr.msra.gmra.mxu3 %vm532_vm1, %v445_v58  ;;  %3095 = vmatmul.msk.bf16.vlgmr.msra.gmra.mxu0 %vm532_vm1, %v444_v45 }
  0xde   : > { %3093 = vmatmul.msk.bf16.vlgmr.msrb.gmra.mxu1 %vm532_vm1, %v444_v45  ;;  %3099 = vmatmul.msk.bf16.vlgmr.msrb.gmra.mxu2 %vm532_vm1, %v444_v45 }
  0xdf   : > { %3096 = vmatmul.msk.bf16.gmra.mxu0 %vm532_vm1, %v445_v58 }
  0xee   : > { %3097 = vmatmul.msk.bf16.vlgmr.msra.gmra.mxu1 %vm532_vm1, %v444_v45  ;;  %3100 = vmatmul.msk.bf16.gmra.mxu2 %vm532_vm1, %v445_v58 }
  0xfe   : > { %3098 = vmatmul.msk.bf16.gmra.mxu1 %vm532_vm1, %v445_v58 }
 0x13b   : > { %v548_v59 = vpop.f32.mrf.mxu1  ;;  %v567_v1 = vpop.f32.mrf.mxu0 }
 0x13c   : > { %v549_v63 = vadd.f32 %v548_v59, %v460_v61  ;;  %v4188_v31 = vadd.f32 %v567_v1, %v461_v24 }
 0x13e   : > { %v893_v39 = vpack.c.bf16 %v549_v63, %v549_v63 }
 0x143   : > { %v550_v62 = vpop.f32.mrf.mxu1  ;;  %v569_v4 = vpop.f32.mrf.mxu0 }
 0x144   : > { %v4165_v0 = vadd.f32 %v550_v62, %v460_v61  ;;  %v4186_v28 = vadd.f32 %v569_v4, %v461_v24  ;;  %v464_v4 = vperm.slane %v4162_v60, 4 }
 0x146   : > { %v4168_v2 = vpack.i.bf16 %v4165_v0, %v549_v63  ;;  %v3406_v35 = vpack.i.bf16 %v4186_v28, %v4188_v31  ;;  %v894_v54 = vpack.c.bf16 %v4165_v0, %v4165_v0 }
 0x148   : > { %3362 = vrot.lane.b32.xlu1 %v4168_v2, %s3923_s18 }
 0x14b   : > { %v553_v3 = vpop.f32.mrf.mxu1 }
 0x14c   : > { %v554_v12 = vadd.f32 %v553_v3, %v460_v61  ;;  %v605_v13 = vpop.f32.mrf.mxu0 }
 0x14d   : > { %v4206_v45 = vadd.f32 %v605_v13, %v463_v38 }
 0x14e   : > { %v895_v19 = vpack.c.bf16 %v554_v12, %v554_v12 }
 0x150   : > { %3377 = vrot.lane.b32.xlu1 %v4168_v2, %s3924_s21 }
 0x151   : > { %v4175_v6 = vpop.f32.mrf.mxu2 }
 0x152   : > { %v591_v7 = vpop.f32.mrf.mxu3  ;;  %v4245_v1 = vadd.f32 %v4175_v6, %v461_v24 }
 0x153   : > { %v592_v8 = vadd.f32 %v591_v7, %v462_v5  ;;  %v555_v9 = vpop.f32.mrf.mxu1 }
 0x154   : > { %v556_v26 = vadd.f32 %v555_v9, %v460_v61  ;;  %v607_v29 = vpop.f32.mrf.mxu0 }
 0x155   : > { %v927_v10 = vpack.c.bf16 %v592_v8, %v592_v8  ;;  %v4199_v41 = vadd.f32 %v607_v29, %v463_v38 }
 0x156   : > { %v896_v33 = vpack.c.bf16 %v556_v26, %v556_v26  ;;  %v3371_v53 = vpack.i.bf16 %v556_v26, %v554_v12 }
 0x157   : > { %v1000_v11 = vsel %vm532_vm1, %v927_v10, 0  ;;  %v3396_v49 = vpack.i.bf16 %v4199_v41, %v4206_v45 }
 0x158   : > { %1009 = vmatpush.bf16.xpose.msrb.mxu0 %v1000_v11 }
 0x159   : > { %v4178_v14 = vpop.f32.mrf.mxu2 }
 0x15a   : > { %v593_v15 = vpop.f32.mrf.mxu3  ;;  %v4242_v0 = vadd.f32 %v4178_v14, %v461_v24 }
 0x15b   : > { %v594_v16 = vadd.f32 %v593_v15, %v462_v5  ;;  %v586_v17 = vpop.f32.mrf.mxu1 }
 0x15c   : > { %v587_v18 = vadd.f32 %v586_v17, %v462_v5  ;;  %v610_v48 = vpop.f32.mrf.mxu0 }
 0x15d   : > { %v3366_v20 = vpack.i.bf16 %v594_v16, %v592_v8  ;;  %v928_v21 = vpack.c.bf16 %v594_v16, %v594_v16  ;;  %v4230_v59 = vadd.f32 %v610_v48, %v463_v38 }
 0x15e   : > { %v925_v22 = vpack.c.bf16 %v587_v18, %v587_v18 }
 0x15f   : > { %3367 = vrot.lane.b32.xlu2 %v3366_v20, %s3925_s24  ;;  %3103 = vmatmul.msk.bf16.vlgmr.msrb.gmra.mxu0 %vm532_vm1, %v895_v19  ;;  %v1019_v23 = vsel %vm532_vm1, %v928_v21, 0 }
 0x160   : > { %3392 = vrot.lane.b32.xlu1 %v3366_v20, %s3924_s21  ;;  %1028 = vmatpush.bf16.xpose.msrb.mxu1 %v1019_v23  ;;  %v962_v25 = vsel %vm532_vm1, %v925_v22, 0 }
 0x161   : > { %v643_v27 = vpop.f32.mrf.mxu2  ;;  %971 = vmatpush.bf16.xpose.msrb.mxu3 %v962_v25 }
 0x162   : > { %v4202_v43 = vadd.f32 %v643_v27, %v465_v34 }
 0x163   : > { %v588_v30 = vpop.f32.mrf.mxu1 }
 0x164   : > { %v589_v32 = vadd.f32 %v588_v30, %v462_v5  ;;  %v612_v55 = vpop.f32.mrf.mxu0 }
 0x165   : > { %v4226_v57 = vadd.f32 %v612_v55, %v463_v38 }
 0x166   : > { %v3351_v36 = vpack.i.bf16 %v589_v32, %v587_v18  ;;  %v926_v37 = vpack.c.bf16 %v589_v32, %v589_v32 }
 0x167   : > { %3382 = vrot.lane.b32.xlu2 %v3366_v20, %s3923_s18  ;;  %3104 = vmatmul.msk.bf16.vlgmr.msrb.gmra.mxu1 %vm532_vm1, %v896_v33  ;;  %v3456_v63 = vpack.i.bf16 %v4226_v57, %v4230_v59 }
 0x168   : > { %3407 = vrot.lane.b32.xlu1 %v3406_v35, %s3925_s24  ;;  %3352 = vrot.lane.b32.xlu0 %v3351_v36, %s3925_s24  ;;  %v981_v40 = vsel %vm532_vm1, %v926_v37, 0 }
 0x169   : > { %3101 = vmatmul.msk.bf16.vlgmr.msrb.gmra.mxu3 %vm532_vm1, %v893_v39  ;;  %v645_v42 = vpop.f32.mrf.mxu2 }
 0x16a   : > { %v4204_v44 = vadd.f32 %v645_v42, %v465_v34  ;;  %990 = vmatpush.bf16.xpose.msra.mxu3 %v981_v40 }
 0x16b   : > { %v624_v46 = vpop.f32.mrf.mxu1 }
 0x16c   : > { %v4210_v47 = vpack.i.bf16 %v4204_v44, %v4202_v43  ;;  %v4266_v8 = vadd.f32 %v624_v46, %v464_v4 }
 0x16f   : > { %3397 = vrot.lane.b32.xlu2 %v3396_v49, %s3925_s24 }
 0x170   : > { %3432 = vrot.lane.b32.xlu1 %v3406_v35, %s3924_s21  ;;  %3357 = vrot.lane.b32.xlu0 %v4168_v2, %s3925_s24  ;;  %v3441_v2 = vpack.i.bf16 %v4242_v0, %v4245_v1 }
 0x171   : > { %v648_v50 = vpop.f32.mrf.mxu2 }
 0x172   : > { %v4218_v51 = vadd.f32 %v648_v50, %v465_v34 }
 0x173   : > { %v626_v52 = vpop.f32.mrf.mxu1 }
 0x174   : > { %v4264_v60 = vadd.f32 %v626_v52, %v464_v4 }
 0x176   : > { %v3476_v9 = vpack.i.bf16 %v4264_v60, %v4266_v8 }
 0x177   : > { %3412 = vrot.lane.b32.xlu2 %v3396_v49, %s3923_s18 }
 0x178   : > { %3447 = vrot.lane.b32.xlu1 %v3351_v36, %s3923_s18  ;;  %3372 = vrot.lane.b32.xlu0 %v3371_v53, %s3925_s24 }
 0x179   : > { %3102 = vmatmul.msk.bf16.vlgmr.msra.gmra.mxu3 %vm532_vm1, %v894_v54  ;;  %v650_v56 = vpop.f32.mrf.mxu2 }
 0x17a   : > { %v4228_v58 = vadd.f32 %v650_v56, %v465_v34 }
 0x17b   : > { %v629_v62 = vpop.f32.mrf.mxu1 }
 0x17c   : > { %v4234_v61 = vpack.i.bf16 %v4228_v58, %v4218_v51  ;;  %v4255_v7 = vadd.f32 %v629_v62, %v464_v4 }
 0x17f   : > { %3422 = vrot.lane.b32.xlu2 %v3396_v49, %s3924_s21 }
 0x180   : > { %3457 = vrot.lane.b32.xlu1 %v3456_v63, %s3925_s24  ;;  %3387 = vrot.lane.b32.xlu0 %v3371_v53, %s3923_s18 }
 0x183   : > { %v631_v3 = vpop.f32.mrf.mxu1 }
 0x184   : > { %v4253_v5 = vadd.f32 %v631_v3, %v464_v4 }
 0x186   : > { %v3486_v6 = vpack.i.bf16 %v4253_v5, %v4255_v7 }
 0x187   : > { %3442 = vrot.lane.b32.xlu2 %v3441_v2, %s3924_s21 }
 0x188   : > { %3467 = vrot.lane.b32.xlu1 %v3456_v63, %s3924_s21  ;;  %3402 = vrot.lane.b32.xlu0 %v3371_v53, %s3924_s21 }
 0x18f   : > { %3452 = vrot.lane.b32.xlu2 %v3351_v36, %s3924_s21  ;;  %v4292_v36 = vld [vmem:[#allocation5] sm:$0xff] }
 0x190   : > { %3487 = vrot.lane.b32.xlu1 %v3486_v6, %s3925_s24  ;;  %3417 = vrot.lane.b32.xlu0 %v3406_v35, %s3923_s18 }
 0x197   : > { %3462 = vrot.lane.b32.xlu2 %v3456_v63, %s3923_s18 }
 0x198   : > { %3427 = vrot.lane.b32.xlu0 %v3441_v2, %s3925_s24 }
 0x19f   : > { %3477 = vrot.lane.b32.xlu2 %v3476_v9, %s3923_s18 }
 0x1a0   : > { %3437 = vrot.lane.b32.xlu0 %v3441_v2, %s3923_s18 }
 0x1a7   : > { %3492 = vrot.lane.b32.xlu2 %v3486_v6, %s3923_s18 }
 0x1a8   : > { %3472 = vrot.lane.b32.xlu0 %v3476_v9, %s3925_s24 }
 0x1b0   : > { %3482 = vrot.lane.b32.xlu0 %v3476_v9, %s3924_s21 }
 0x1b8   : > { %3497 = vrot.lane.b32.xlu0 %v3486_v6, %s3924_s21 }
 0x1b9   : > { %v3368_v10 = vpop.permute.xlu2 %3367 }
 0x1ba   : > { %v3370_v11 = vunpack.i.h.bf16 %v3368_v10  ;;  %v3369_v12 = vunpack.i.l.bf16 %v3368_v10  ;;  %v4278_v17 = vpop.permute.xlu1 %3362 }
 0x1bc   : > { %v932_v13 = vpack.c.bf16 %v3370_v11, %v3370_v11  ;;  %v931_v14 = vpack.c.bf16 %v3369_v12, %v3369_v12 }
 0x1be   : > { %v1076_v15 = vsel %vm532_vm1, %v931_v14, 0  ;;  %v1095_v16 = vsel %vm532_vm1, %v932_v13, 0 }
 0x1bf   : > { %1085 = vmatpush.bf16.xpose.msra.mxu0 %v1076_v15  ;;  %1104 = vmatpush.bf16.xpose.msra.mxu1 %v1095_v16 }
 0x1c1   : > { %v3383_v18 = vpop.permute.xlu2 %3382 }
 0x1c2   : > { %v3385_v19 = vunpack.i.h.bf16 %v3383_v18  ;;  %v3384_v20 = vunpack.i.l.bf16 %v3383_v18  ;;  %v4284_v26 = vpop.permute.xlu1 %3377 }
 0x1c4   : > { %v936_v21 = vpack.c.bf16 %v3385_v19, %v3385_v19  ;;  %v935_v22 = vpack.c.bf16 %v3384_v20, %v3384_v20 }
 0x1c6   : > { %v1152_v23 = vsel %vm532_vm1, %v935_v22, 0  ;;  %v1171_v24 = vsel %vm532_vm1, %v936_v21, 0 }
 0x1c7   : > { %1161 = vmatpush.bf16.xpose.msrb.mxu0 %v1152_v23  ;;  %1180 = vmatpush.bf16.xpose.msrb.mxu1 %v1171_v24 }
 0x1c9   : > { %v4282_v25 = vpop.permute.xlu2 %3397 }
 0x1d1   : > { %v4286_v27 = vpop.permute.xlu2 %3412 }
 0x1d2   : > { %v3393_v29 = vpop.permute.xlu1 %3392 }
 0x1d3   : > { %v3395_v3 = vunpack.i.h.bf16 %v3393_v29  ;;  %v3394_v4 = vunpack.i.l.bf16 %v3393_v29 }
 0x1d5   : > { %v940_v19 = vpack.c.bf16 %v3395_v3, %v3395_v3  ;;  %v939_v20 = vpack.c.bf16 %v3394_v4, %v3394_v4 }
 0x1d9   : > { %v4288_v30 = vpop.permute.xlu2 %3422 }
 0x1da   : > { %v4290_v32 = vpop.permute.xlu1 %3407  ;;  %v3353_v33 = vpop.permute.xlu0 %3352 }
 0x1db   : > { %v3355_v34 = vunpack.i.h.bf16 %v3353_v33  ;;  %v3354_v35 = vunpack.i.l.bf16 %v3353_v33 }
 0x1dc   : > { %v1011_v37 = vpop.f32.mrf.mxu0 }
 0x1dd   : > { %v930_v38 = vpack.c.bf16 %v3355_v34, %v3355_v34  ;;  %v929_v39 = vpack.c.bf16 %v3354_v35, %v3354_v35  ;;  %v4295_v40 = vadd.f32 %v1011_v37, %v4292_v36 }
 0x1df   : > { %v1038_v42 = vsel %vm532_vm1, %v929_v39, 0  ;;  %v1057_v46 = vsel %vm532_vm1, %v930_v38, 0  ;;  %v1573_v49 = vsel %vm1566_vm2, %v4295_v40, -inf }
 0x1e0   : > { %1047 = vmatpush.bf16.xpose.msra.mxu2 %v1038_v42  ;;  %1066 = vmatpush.bf16.xpose.msrb.mxu3 %v1057_v46 }
 0x1e1   : > { %v4299_v48 = vpop.permute.xlu2 %3442 }
 0x1e2   : > { %v4303_v50 = vpop.permute.xlu1 %3432  ;;  %1574 = vmax.xlane.f32.xlu0 %v1573_v49  ;;  %v3358_v52 = vpop.permute.xlu0 %3357 }
 0x1e3   : > { %v3360_v53 = vunpack.i.h.bf16 %v3358_v52  ;;  %v3359_v54 = vunpack.i.l.bf16 %v3358_v52  ;;  %v3365_v52 = vunpack.i.h.bf16 %v4278_v17 }
 0x1e4   : > { %v1013_v55 = vpop.f32.mrf.mxu0  ;;  %v1030_v56 = vpop.f32.mrf.mxu1 }
 0x1e5   : > { %v898_v62 = vpack.c.bf16 %v3360_v53, %v3360_v53  ;;  %v897_v63 = vpack.c.bf16 %v3359_v54, %v3359_v54  ;;  %v4306_v2 = vadd.f32 %v1030_v56, %v4292_v36  ;;  %v3364_v53 = vunpack.i.l.bf16 %v4278_v17 }
 0x1e6   : > { %v1228_v54 = vsel %vm532_vm1, %v939_v20, 0  ;;  %v1247_v55 = vsel %vm532_vm1, %v940_v19, 0  ;;  %v941_v56 = vpack.c.bf16 %v4206_v45, %v4206_v45  ;;  %v902_v3 = vpack.c.bf16 %v3365_v52, %v3365_v52 }
 0x1e7   : > { %3105 = vmatmul.msk.bf16.vlgmr.msra.gmra.mxu2 %vm532_vm1, %v897_v63  ;;  %3106 = vmatmul.msk.bf16.vlgmr.msrb.gmra.mxu3 %vm532_vm1, %v898_v62  ;;  %v1576_v6 = vsel %vm1566_vm2, %v4306_v2, -inf  ;;  %v942_v62 = vpack.c.bf16 %v4199_v41, %v4199_v41  ;;  %v901_v4 = vpack.c.bf16 %v3364_v53, %v3364_v53  ;;  %v943_v45 = vpack.c.bf16 %v4230_v59, %v4230_v59 }
 0x1e8   : > { %1577 = vmax.xlane.f32.xlu1 %v1576_v6  ;;  %v1266_v17 = vsel %vm532_vm1, %v941_v56, 0  ;;  %v944_v41 = vpack.c.bf16 %v4226_v57, %v4226_v57  ;;  %v3380_v20 = vunpack.i.h.bf16 %v4284_v26  ;;  %v3414_v56 = vunpack.i.l.bf16 %v4286_v27 }
 0x1e9   : > { %v3453_v9 = vpop.permute.xlu2 %3452  ;;  %v1304_v19 = vsel %vm532_vm1, %v943_v45, 0 }
 0x1ea   : > { %v3455_v10 = vunpack.i.h.bf16 %v3453_v9  ;;  %v3454_v11 = vunpack.i.l.bf16 %v3453_v9  ;;  %v3448_v12 = vpop.permute.xlu1 %3447  ;;  %v3373_v13 = vpop.permute.xlu0 %3372  ;;  %v1285_v9 = vsel %vm532_vm1, %v942_v62, 0  ;;  %v1323_v59 = vsel %vm532_vm1, %v944_v41, 0 }
 0x1eb   : > { %v3450_v14 = vunpack.i.h.bf16 %v3448_v12  ;;  %v3449_v15 = vunpack.i.l.bf16 %v3448_v12  ;;  %v3375_v16 = vunpack.i.h.bf16 %v3373_v13  ;;  %v3374_v18 = vunpack.i.l.bf16 %v3373_v13 }
 0x1ec   : > { %v938_v21 = vpack.c.bf16 %v3455_v10, %v3455_v10  ;;  %v937_v22 = vpack.c.bf16 %v3454_v11, %v3454_v11  ;;  %v973_v23 = vpop.f32.mrf.mxu3  ;;  %v1032_v24 = vpop.f32.mrf.mxu1 }
 0x1ed   : > { %v934_v29 = vpack.c.bf16 %v3450_v14, %v3450_v14  ;;  %v933_v33 = vpack.c.bf16 %v3449_v15, %v3449_v15  ;;  %v900_v34 = vpack.c.bf16 %v3375_v16, %v3375_v16  ;;  %v899_v35 = vpack.c.bf16 %v3374_v18, %v3374_v18 }
 0x1ee   : > { %v4313_v37 = vadd.f32 %v973_v23, %v4292_v36  ;;  %v1190_v38 = vsel %vm532_vm1, %v937_v22, 0  ;;  %v1209_v39 = vsel %vm532_vm1, %v938_v21, 0  ;;  %v3400_v16 = vunpack.i.h.bf16 %v4282_v25 }
 0x1ef   : > { %v1114_v42 = vsel %vm532_vm1, %v933_v33, 0  ;;  %v1133_v46 = vsel %vm532_vm1, %v934_v29, 0  ;;  %3107 = vmatmul.msk.bf16.vlgmr.msra.gmra.mxu0 %vm532_vm1, %v899_v35  ;;  %3108 = vmatmul.msk.bf16.vlgmr.msra.gmra.mxu1 %vm532_vm1, %v900_v34  ;;  %v3399_v18 = vunpack.i.l.bf16 %v4282_v25  ;;  %v3379_v21 = vunpack.i.l.bf16 %v4284_v26 }
 0x1f0   : > { %1123 = vmatpush.bf16.xpose.msrb.mxu2 %v1114_v42  ;;  %1142 = vmatpush.bf16.xpose.msra.mxu3 %v1133_v46  ;;  %v1567_v49 = vsel %vm1566_vm2, %v4313_v37, -inf  ;;  %v946_v22 = vpack.c.bf16 %v3400_v16, %v3400_v16  ;;  %v906_v29 = vpack.c.bf16 %v3380_v20, %v3380_v20  ;;  %v3424_v16 = vunpack.i.l.bf16 %v4288_v30 }
 0x1f1   : > { %1237 = vmatpush.bf16.xpose.msra.mxu0 %v1228_v54  ;;  %1256 = vmatpush.bf16.xpose.msra.mxu1 %v1247_v55  ;;  %v945_v25 = vpack.c.bf16 %v3399_v18, %v3399_v18  ;;  %v905_v33 = vpack.c.bf16 %v3379_v21, %v3379_v21  ;;  %v3415_v55 = vunpack.i.h.bf16 %v4286_v27 }
 0x1f2   : > { %1568 = vmax.xlane.f32.xlu0 %v1567_v49  ;;  %v3388_v6 = vpop.permute.xlu0 %3387  ;;  %v3458_v23 = vpop.permute.xlu1 %3457  ;;  %v1361_v42 = vsel %vm532_vm1, %v946_v22, 0 }
 0x1f3   : > { %v3390_v10 = vunpack.i.h.bf16 %v3388_v6  ;;  %v3389_v11 = vunpack.i.l.bf16 %v3388_v6  ;;  %v3460_v35 = vunpack.i.h.bf16 %v3458_v23  ;;  %v3463_v6 = vpop.permute.xlu2 %3462 }
 0x1f4   : > { %v975_v63 = vpop.f32.mrf.mxu3  ;;  %v3465_v27 = vunpack.i.h.bf16 %v3463_v6 }
 0x1f5   : > { %v904_v13 = vpack.c.bf16 %v3390_v10, %v3390_v10  ;;  %v903_v14 = vpack.c.bf16 %v3389_v11, %v3389_v11  ;;  %v948_v49 = vpack.c.bf16 %v3460_v35, %v3460_v35  ;;  %v3464_v10 = vunpack.i.l.bf16 %v3463_v6 }
 0x1f6   : > { %v952_v41 = vpack.c.bf16 %v3465_v27, %v3465_v27 }
 0x1f7   : > { %3109 = vmatmul.msk.bf16.vlgmr.msrb.gmra.mxu2 %vm532_vm1, %v901_v4  ;;  %3110 = vmatmul.msk.bf16.vlgmr.msra.gmra.mxu3 %vm532_vm1, %v902_v3  ;;  %v1399_v63 = vsel %vm532_vm1, %v948_v49, 0  ;;  %v950_v3 = vpack.c.bf16 %v3415_v55, %v3415_v55  ;;  %v949_v4 = vpack.c.bf16 %v3414_v56, %v3414_v56 }
 0x1f8   : > { %1199 = vmatpush.bf16.xpose.msra.mxu2 %v1190_v38  ;;  %1218 = vmatpush.bf16.xpose.msrb.mxu3 %v1209_v39  ;;  %v3459_v38 = vunpack.i.l.bf16 %v3458_v23  ;;  %v1342_v39 = vsel %vm532_vm1, %v945_v25, 0 }
 0x1f9   : > { %v1418_v11 = vsel %vm532_vm1, %v949_v4, 0  ;;  %v1437_v45 = vsel %vm532_vm1, %v950_v3, 0 }
 0x1fa   : > { %v3403_v34 = vpop.permute.xlu0 %3402  ;;  %v947_v52 = vpack.c.bf16 %v3459_v38, %v3459_v38  ;;  %v3468_v20 = vpop.permute.xlu1 %3467 }
 0x1fb   : > { %v3405_v26 = vunpack.i.h.bf16 %v3403_v34  ;;  %v3404_v46 = vunpack.i.l.bf16 %v3403_v34  ;;  %v3470_v25 = vunpack.i.h.bf16 %v3468_v20  ;;  %v3469_v23 = vunpack.i.l.bf16 %v3468_v20 }
 0x1fc   : > { %v992_v12 = vpop.f32.mrf.mxu3  ;;  %v1380_v62 = vsel %vm532_vm1, %v947_v52, 0 }
 0x1fd   : > { %v4340_v15 = vadd.f32 %v992_v12, %v4292_v36  ;;  %v908_v53 = vpack.c.bf16 %v3405_v26, %v3405_v26  ;;  %v907_v54 = vpack.c.bf16 %v3404_v46, %v3404_v46  ;;  %v951_v12 = vpack.c.bf16 %v3464_v10, %v3464_v10 }
 0x1fe   : > { %v956_v34 = vpack.c.bf16 %v3470_v25, %v3470_v25  ;;  %v955_v35 = vpack.c.bf16 %v3469_v23, %v3469_v23 }
 0x1ff   : > { %3111 = vmatmul.msk.bf16.vlgmr.msrb.gmra.mxu0 %vm532_vm1, %v903_v14  ;;  %3112 = vmatmul.msk.bf16.vlgmr.msrb.gmra.mxu1 %vm532_vm1, %v904_v13  ;;  %v1570_v57 = vsel %vm1566_vm2, %v4340_v15, -inf  ;;  %v3425_v14 = vunpack.i.h.bf16 %v4288_v30  ;;  %v1456_v18 = vsel %vm532_vm1, %v951_v12, 0 }
 0x200   : > { %1275 = vmatpush.bf16.xpose.msrb.mxu2 %v1266_v17  ;;  %1294 = vmatpush.bf16.xpose.msra.mxu3 %v1285_v9  ;;  %v909_v17 = vpack.c.bf16 %v4188_v31, %v4188_v31  ;;  %v910_v9 = vpack.c.bf16 %v4186_v28, %v4186_v28  ;;  %v911_v31 = vpack.c.bf16 %v4245_v1, %v4245_v1  ;;  %v3409_v1 = vunpack.i.l.bf16 %v4290_v32 }
 0x201   : > { %1313 = vmatpush.bf16.xpose.msrb.mxu0 %v1304_v19  ;;  %1332 = vmatpush.bf16.xpose.msrb.mxu1 %v1323_v59  ;;  %v912_v28 = vpack.c.bf16 %v4242_v0, %v4242_v0  ;;  %v1475_v19 = vsel %vm532_vm1, %v952_v41, 0  ;;  %v3410_v59 = vunpack.i.h.bf16 %v4290_v32  ;;  %v953_v0 = vpack.c.bf16 %v3424_v16, %v3424_v16 }
 0x202   : > { %1571 = vmax.xlane.f32.xlu1 %v1570_v57  ;;  %v3418_v13 = vpop.permute.xlu0 %3417  ;;  %v954_v57 = vpack.c.bf16 %v3425_v14, %v3425_v14  ;;  %v913_v22 = vpack.c.bf16 %v3409_v1, %v3409_v1  ;;  %v1551_v26 = vsel %vm532_vm1, %v956_v34, 0  ;;  %v3434_v41 = vunpack.i.l.bf16 %v4303_v50 }
 0x203   : > { %v914_v21 = vpack.c.bf16 %v3410_v59, %v3410_v59  ;;  %v3420_v46 = vunpack.i.h.bf16 %v3418_v13  ;;  %v3419_v49 = vunpack.i.l.bf16 %v3418_v13  ;;  %v3488_v13 = vpop.permute.xlu1 %3487  ;;  %v3445_v59 = vunpack.i.h.bf16 %v4299_v48 }
 0x204   : > { %v994_v24 = vpop.f32.mrf.mxu3  ;;  %v3490_v14 = vunpack.i.h.bf16 %v3488_v13  ;;  %v3489_v16 = vunpack.i.l.bf16 %v3488_v13 }
 0x205   : > { %v1494_v24 = vsel %vm532_vm1, %v953_v0, 0  ;;  %v918_v55 = vpack.c.bf16 %v3420_v46, %v3420_v46  ;;  %v917_v56 = vpack.c.bf16 %v3419_v49, %v3419_v49  ;;  %v924_v0 = vpack.c.bf16 %v3445_v59, %v3445_v59 }
 0x206   : > { %v1958_v1 = vpack.c.bf16 %v3490_v14, %v3490_v14 }
 0x207   : > { %3113 = vmatmul.msk.bf16.vlgmr.msra.gmra.mxu2 %vm532_vm1, %v905_v33  ;;  %3114 = vmatmul.msk.bf16.vlgmr.msrb.gmra.mxu3 %vm532_vm1, %v906_v29  ;;  %v1513_v29 = vsel %vm532_vm1, %v954_v57, 0  ;;  %v1957_v57 = vpack.c.bf16 %v3489_v16, %v3489_v16 }
 0x208   : > { %1351 = vmatpush.bf16.xpose.msra.mxu2 %v1342_v39  ;;  %1370 = vmatpush.bf16.xpose.msrb.mxu3 %v1361_v42  ;;  %v1532_v42 = vsel %vm532_vm1, %v955_v35, 0 }
 0x20a   : > { %v3428_v30 = vpop.permute.xlu0 %3427 }
 0x20b   : > { %v3430_v33 = vunpack.i.h.bf16 %v3428_v30  ;;  %v3429_v32 = vunpack.i.l.bf16 %v3428_v30 }
 0x20d   : > { %v916_v38 = vpack.c.bf16 %v3430_v33, %v3430_v33  ;;  %v915_v39 = vpack.c.bf16 %v3429_v32, %v3429_v32 }
 0x20f   : > { %3115 = vmatmul.msk.bf16.vlgmr.msra.gmra.mxu0 %vm532_vm1, %v907_v54  ;;  %3116 = vmatmul.msk.bf16.vlgmr.msra.gmra.mxu1 %vm532_vm1, %v908_v53  ;;  %v1951_v53 = vpack.c.bf16 %v4266_v8, %v4266_v8  ;;  %v1952_v54 = vpack.c.bf16 %v4264_v60, %v4264_v60  ;;  %v1953_v8 = vpack.c.bf16 %v4255_v7, %v4255_v7  ;;  %v3435_v7 = vunpack.i.h.bf16 %v4303_v50 }
 0x210   : > { %1389 = vmatpush.bf16.xpose.msra.mxu0 %v1380_v62  ;;  %1408 = vmatpush.bf16.xpose.msra.mxu1 %v1399_v63  ;;  %v1954_v60 = vpack.c.bf16 %v4253_v5, %v4253_v5  ;;  %v3444_v50 = vunpack.i.l.bf16 %v4299_v48 }
 0x211   : > { %v1988_v62 = vsel %vm1986_vm3, %v1951_v53, 0  ;;  %v2007_v63 = vsel %vm1986_vm3, %v1952_v54, 0 }
 0x212   : > { %v3438_v52 = vpop.permute.xlu0 %3437  ;;  %v923_v20 = vpack.c.bf16 %v3444_v50, %v3444_v50 }
 0x213   : > { %v3440_v3 = vunpack.i.h.bf16 %v3438_v52  ;;  %v3439_v4 = vunpack.i.l.bf16 %v3438_v52 }
 0x217   : > { %3117 = vmatmul.msk.bf16.vlgmr.msrb.gmra.mxu2 %vm532_vm1, %v909_v17  ;;  %3118 = vmatmul.msk.bf16.vlgmr.msra.gmra.mxu3 %vm532_vm1, %v910_v9  ;;  %v920_v17 = vpack.c.bf16 %v3440_v3, %v3440_v3  ;;  %v919_v9 = vpack.c.bf16 %v3439_v4, %v3439_v4 }
 0x218   : > { %1427 = vmatpush.bf16.xpose.msrb.mxu2 %v1418_v11  ;;  %1446 = vmatpush.bf16.xpose.msra.mxu3 %v1437_v45  ;;  %v2026_v11 = vsel %vm1986_vm3, %v1953_v8, 0  ;;  %v2045_v45 = vsel %vm1986_vm3, %v1954_v60, 0 }
 0x21a   : > { %v3473_v6 = vpop.permute.xlu0 %3472 }
 0x21b   : > { %v3475_v27 = vunpack.i.h.bf16 %v3473_v6  ;;  %v3474_v10 = vunpack.i.l.bf16 %v3473_v6 }
 0x21d   : > { %v1956_v5 = vpack.c.bf16 %v3475_v27, %v3475_v27  ;;  %v1955_v12 = vpack.c.bf16 %v3474_v10, %v3474_v10 }
 0x21f   : > { %3119 = vmatmul.msk.bf16.vlgmr.msrb.gmra.mxu0 %vm532_vm1, %v911_v31  ;;  %3120 = vmatmul.msk.bf16.vlgmr.msrb.gmra.mxu1 %vm532_vm1, %v912_v28  ;;  %v922_v31 = vpack.c.bf16 %v3435_v7, %v3435_v7  ;;  %v921_v28 = vpack.c.bf16 %v3434_v41, %v3434_v41 }
 0x220   : > { %1465 = vmatpush.bf16.xpose.msrb.mxu0 %v1456_v18  ;;  %1484 = vmatpush.bf16.xpose.msrb.mxu1 %v1475_v19  ;;  %v2064_v18 = vsel %vm1986_vm3, %v1955_v12, 0  ;;  %v2083_v19 = vsel %vm1986_vm3, %v1956_v5, 0 }
 0x222   : > { %v4418_v30 = vpop.permute.xlu0 %3482 }
 0x227   : > { %3121 = vmatmul.msk.bf16.vlgmr.msra.gmra.mxu2 %vm532_vm1, %v913_v22  ;;  %3122 = vmatmul.msk.bf16.vlgmr.msrb.gmra.mxu3 %vm532_vm1, %v914_v21  ;;  %v2102_v21 = vsel %vm1986_vm3, %v1957_v57, 0  ;;  %v2121_v22 = vsel %vm1986_vm3, %v1958_v1, 0 }
 0x228   : > { %1503 = vmatpush.bf16.xpose.msra.mxu2 %v1494_v24  ;;  %1522 = vmatpush.bf16.xpose.msrb.mxu3 %v1513_v29 }
 0x22a   : > { %v4420_v25 = vpop.permute.xlu0 %3497 }
 0x22f   : > { %3123 = vmatmul.msk.bf16.vlgmr.msra.gmra.mxu0 %vm532_vm1, %v915_v39  ;;  %3124 = vmatmul.msk.bf16.vlgmr.msra.gmra.mxu1 %vm532_vm1, %v916_v38 }
 0x230   : > { %1541 = vmatpush.bf16.xpose.msra.mxu0 %v1532_v42  ;;  %1560 = vmatpush.bf16.xpose.msra.mxu1 %v1551_v26 }
 0x237   : > { %3125 = vmatmul.msk.bf16.vlgmr.msrb.gmra.mxu2 %vm532_vm1, %v917_v56  ;;  %3126 = vmatmul.msk.bf16.vlgmr.msra.gmra.mxu3 %vm532_vm1, %v918_v55 }
 0x238   : > { %1997 = vmatpush.bf16.msrb.mxu2 %v1988_v62  ;;  %2016 = vmatpush.bf16.msra.mxu3 %v2007_v63 }
 0x23f   : > { %3127 = vmatmul.msk.bf16.vlgmr.msrb.gmra.mxu0 %vm532_vm1, %v919_v9  ;;  %3128 = vmatmul.msk.bf16.vlgmr.msrb.gmra.mxu1 %vm532_vm1, %v920_v17 }
 0x240   : > { %2035 = vmatpush.bf16.msrb.mxu0 %v2026_v11  ;;  %2054 = vmatpush.bf16.msrb.mxu1 %v2045_v45 }
 0x247   : > { %3129 = vmatmul.msk.bf16.vlgmr.msra.gmra.mxu2 %vm532_vm1, %v921_v28  ;;  %3130 = vmatmul.msk.bf16.vlgmr.msrb.gmra.mxu3 %vm532_vm1, %v922_v31 }
 0x248   : > { %2073 = vmatpush.bf16.msra.mxu2 %v2064_v18  ;;  %2092 = vmatpush.bf16.msrb.mxu3 %v2083_v19 }
 0x24f   : > { %3131 = vmatmul.msk.bf16.vlgmr.msra.gmra.mxu0 %vm532_vm1, %v923_v20  ;;  %3132 = vmatmul.msk.bf16.vlgmr.msra.gmra.mxu1 %vm532_vm1, %v924_v0 }
 0x250   : > { %2111 = vmatpush.bf16.msra.mxu0 %v2102_v21  ;;  %2130 = vmatpush.bf16.msra.mxu1 %v2121_v22 }
 0x255   : > { %v1575_v23 = vpop.xlane.xlu0 %1574 }
 0x256   : > { %v1665_v48 = vsub.f32 %v4295_v40, %v1575_v23 }
 0x258   : > { %v1699_v24 = vmul.f32 1.442695, %v1665_v48 }
 0x25a   : > { %3593 = vpow2.f32 %v1699_v24 }
 0x25b   : > { %v1578_v32 = vpop.xlane.xlu1 %1577 }
 0x25c   : > { %v1666_v42 = vsub.f32 %v4306_v2, %v1578_v32 }
 0x25e   : > { %v1701_v46 = vmul.f32 1.442695, %v1666_v42 }
 0x260   : > { %v4437_v54 = vpop.eup %3593  ;;  %3595 = vpow2.f32 %v1701_v46 }
 0x261   : > { %v1765_v3 = vsel %vm1566_vm2, %v4437_v54, 0.0 }
 0x265   : > { %v1569_v12 = vpop.xlane.xlu0 %1568 }
 0x266   : > { %v4447_v17 = vpop.eup %3595  ;;  %v1663_v16 = vsub.f32 %v4313_v37, %v1569_v12 }
 0x267   : > { %v1768_v11 = vsel %vm1566_vm2, %v4447_v17, 0.0 }
 0x268   : > { %v1695_v19 = vmul.f32 1.442695, %v1663_v16 }
 0x26a   : > { %v1049_v29 = vpop.f32.mrf.mxu2  ;;  %v1068_v33 = vpop.f32.mrf.mxu3 }
 0x26b   : > { %v4435_v53 = vadd.f32 %v1049_v29, %v4292_v36  ;;  %v4461_v13 = vadd.f32 %v1068_v33, %v4292_v36 }
 0x26c   : > { %v1087_v34 = vpop.f32.mrf.mxu0  ;;  %v1106_v35 = vpop.f32.mrf.mxu1 }
 0x26d   : > { %v4424_v38 = vadd.f32 %v1087_v34, %v4292_v36  ;;  %v4427_v39 = vadd.f32 %v1106_v35, %v4292_v36  ;;  %v1579_v63 = vsel %vm1566_vm2, %v4435_v53, -inf  ;;  %v1582_v18 = vsel %vm1566_vm2, %v4461_v13, -inf }
 0x26f   : > { %v1588_v26 = vsel %vm1566_vm2, %v4427_v39, -inf  ;;  %v1585_v40 = vsel %vm1566_vm2, %v4424_v38, -inf }
 0x270   : > { %1589 = vmax.xlane.f32.xlu2 %v1588_v26  ;;  %1586 = vmax.xlane.f32.xlu1 %v1585_v40 }
 0x272   : > { %v1051_v49 = vpop.f32.mrf.mxu2  ;;  %v1070_v52 = vpop.f32.mrf.mxu3 }
 0x274   : > { %v1089_v56 = vpop.f32.mrf.mxu0  ;;  %v1108_v62 = vpop.f32.mrf.mxu1 }
 0x275   : > { %v1572_v55 = vpop.xlane.xlu1 %1571 }
 0x276   : > { %v1664_v2 = vsub.f32 %v4340_v15, %v1572_v55 }
 0x278   : > { %v1697_v4 = vmul.f32 1.442695, %v1664_v2  ;;  %1580 = vmax.xlane.f32.xlu2 %v1579_v63  ;;  %1766 = vadd.xlane.f32.xlu1 %v1765_v3 }
 0x27a   : > { %v1125_v8 = vpop.f32.mrf.mxu2  ;;  %v1144_v60 = vpop.f32.mrf.mxu3  ;;  %3597 = vpow2.f32 %v1697_v4 }
 0x27b   : > { %v4445_v6 = vadd.f32 %v1144_v60, %v4292_v36  ;;  %3599 = vpow2.f32 %v1695_v19  ;;  %v4493_v46 = vadd.f32 %v1125_v8, %v4292_v36 }
 0x27c   : > { %v1163_v15 = vpop.f32.mrf.mxu0  ;;  %v1182_v27 = vpop.f32.mrf.mxu1 }
 0x27d   : > { %v4450_v9 = vadd.f32 %v1163_v15, %v4292_v36  ;;  %v1594_v10 = vsel %vm1566_vm2, %v4445_v6, -inf  ;;  %v4469_v1 = vadd.f32 %v1182_v27, %v4292_v36  ;;  %v1591_v62 = vsel %vm1566_vm2, %v4493_v46, -inf }
 0x27e   : > { %1595 = vmax.xlane.f32.xlu0 %v1594_v10 }
 0x27f   : > { %v1597_v45 = vsel %vm1566_vm2, %v4450_v9, -inf  ;;  %v1600_v22 = vsel %vm1566_vm2, %v4469_v1, -inf }
 0x280   : > { %1769 = vadd.xlane.f32.xlu2 %v1768_v11  ;;  %1598 = vmax.xlane.f32.xlu1 %v1597_v45  ;;  %v4458_v7 = vpop.eup %3597 }
 0x281   : > { %v1762_v14 = vsel %vm1566_vm2, %v4458_v7, 0.0  ;;  %v4486_v33 = vpop.eup %3599 }
 0x282   : > { %v1127_v41 = vpop.f32.mrf.mxu2  ;;  %v1146_v5 = vpop.f32.mrf.mxu3  ;;  %v1759_v42 = vsel %vm1566_vm2, %v4486_v33, 0.0 }
 0x284   : > { %v1165_v31 = vpop.f32.mrf.mxu0  ;;  %v1184_v28 = vpop.f32.mrf.mxu1 }
 0x286   : > { %1763 = vadd.xlane.f32.xlu0 %v1762_v14 }
 0x288   : > { %1583 = vmax.xlane.f32.xlu2 %v1582_v18 }
 0x28a   : > { %v1201_v59 = vpop.f32.mrf.mxu2  ;;  %v1220_v50 = vpop.f32.mrf.mxu3 }
 0x28b   : > { %v4472_v57 = vadd.f32 %v1201_v59, %v4292_v36  ;;  %v4484_v29 = vadd.f32 %v1220_v50, %v4292_v36 }
 0x28c   : > { %v1239_v0 = vpop.f32.mrf.mxu0  ;;  %v1258_v21 = vpop.f32.mrf.mxu1 }
 0x28d   : > { %v4475_v20 = vadd.f32 %v1239_v0, %v4292_v36  ;;  %v1603_v37 = vsel %vm1566_vm2, %v4472_v57, -inf  ;;  %v1606_v35 = vsel %vm1566_vm2, %v4484_v29, -inf  ;;  %v4508_v8 = vadd.f32 %v1258_v21, %v4292_v36 }
 0x28e   : > { %1604 = vmax.xlane.f32.xlu0 %v1603_v37 }
 0x28f   : > { %v1609_v23 = vsel %vm1566_vm2, %v4475_v20, -inf  ;;  %v1612_v10 = vsel %vm1566_vm2, %v4508_v8, -inf }
 0x290   : > { %1601 = vmax.xlane.f32.xlu2 %v1600_v22  ;;  %1610 = vmax.xlane.f32.xlu1 %v1609_v23 }
 0x292   : > { %v1203_v48 = vpop.f32.mrf.mxu2  ;;  %v1222_v24 = vpop.f32.mrf.mxu3 }
 0x294   : > { %v1241_v32 = vpop.f32.mrf.mxu0  ;;  %v1260_v34 = vpop.f32.mrf.mxu1 }
 0x298   : > { %1607 = vmax.xlane.f32.xlu1 %v1606_v35  ;;  %1760 = vadd.xlane.f32.xlu2 %v1759_v42 }
 0x29a   : > { %v1277_v26 = vpop.f32.mrf.mxu2  ;;  %v1296_v40 = vpop.f32.mrf.mxu3 }
 0x29b   : > { %v4496_v49 = vadd.f32 %v1277_v26, %v4292_v36  ;;  %v4511_v60 = vadd.f32 %v1296_v40, %v4292_v36 }
 0x29c   : > { %v1315_v52 = vpop.f32.mrf.mxu0  ;;  %v1334_v55 = vpop.f32.mrf.mxu1 }
 0x29d   : > { %v1615_v56 = vsel %vm1566_vm2, %v4496_v49, -inf  ;;  %v4501_v2 = vadd.f32 %v1334_v55, %v4292_v36  ;;  %v1618_v11 = vsel %vm1566_vm2, %v4511_v60, -inf  ;;  %v4518_v5 = vadd.f32 %v1315_v52, %v4292_v36 }
 0x29e   : > { %1616 = vmax.xlane.f32.xlu0 %v1615_v56 }
 0x29f   : > { %v1624_v63 = vsel %vm1566_vm2, %v4501_v2, -inf  ;;  %v1621_v18 = vsel %vm1566_vm2, %v4518_v5, -inf }
 0x2a0   : > { %1592 = vmax.xlane.f32.xlu2 %v1591_v62  ;;  %1625 = vmax.xlane.f32.xlu1 %v1624_v63 }
 0x2a2   : > { %v1279_v3 = vpop.f32.mrf.mxu2  ;;  %v1298_v4 = vpop.f32.mrf.mxu3 }
 0x2a4   : > { %v1317_v15 = vpop.f32.mrf.mxu0  ;;  %v1336_v27 = vpop.f32.mrf.mxu1 }
 0x2a8   : > { %1613 = vmax.xlane.f32.xlu2 %v1612_v10  ;;  %1619 = vmax.xlane.f32.xlu1 %v1618_v11 }
 0x2aa   : > { %v1353_v45 = vpop.f32.mrf.mxu2  ;;  %v1372_v41 = vpop.f32.mrf.mxu3 }
 0x2ab   : > { %v4521_v12 = vadd.f32 %v1353_v45, %v4292_v36  ;;  %v4553_v62 = vadd.f32 %v1372_v41, %v4292_v36 }
 0x2ac   : > { %v1391_v31 = vpop.f32.mrf.mxu0  ;;  %v1410_v14 = vpop.f32.mrf.mxu1 }
 0x2ad   : > { %v4524_v28 = vadd.f32 %v1391_v31, %v4292_v36  ;;  %v1627_v19 = vsel %vm1566_vm2, %v4521_v12, -inf  ;;  %v4533_v0 = vadd.f32 %v1410_v14, %v4292_v36  ;;  %v1630_v4 = vsel %vm1566_vm2, %v4553_v62, -inf }
 0x2af   : > { %v1633_v16 = vsel %vm1566_vm2, %v4524_v28, -inf  ;;  %v1636_v22 = vsel %vm1566_vm2, %v4533_v0, -inf }
 0x2b0   : > { %1634 = vmax.xlane.f32.xlu0 %v1633_v16  ;;  %1622 = vmax.xlane.f32.xlu2 %v1621_v18 }
 0x2b1   : > { %1628 = vmax.xlane.f32.xlu1 %v1627_v19  ;;  %v4576_v19 = vpop.permute.xlu2 %3477 }
 0x2b2   : > { %v1355_v59 = vpop.f32.mrf.mxu2  ;;  %v1374_v50 = vpop.f32.mrf.mxu3 }
 0x2b4   : > { %v1393_v21 = vpop.f32.mrf.mxu0  ;;  %v1412_v37 = vpop.f32.mrf.mxu1 }
 0x2b8   : > { %1637 = vmax.xlane.f32.xlu0 %v1636_v22 }
 0x2b9   : > { %v3493_v22 = vpop.permute.xlu2 %3492 }
 0x2ba   : > { %v1429_v23 = vpop.f32.mrf.mxu2  ;;  %v1448_v48 = vpop.f32.mrf.mxu3 }
 0x2bb   : > { %v4538_v24 = vadd.f32 %v1448_v48, %v4292_v36  ;;  %v4558_v10 = vadd.f32 %v1429_v23, %v4292_v36 }
 0x2bc   : > { %v1467_v32 = vpop.f32.mrf.mxu0  ;;  %v1486_v35 = vpop.f32.mrf.mxu1 }
 0x2bd   : > { %v4541_v34 = vadd.f32 %v1467_v32, %v4292_v36  ;;  %v4544_v42 = vadd.f32 %v1486_v35, %v4292_v36  ;;  %v1642_v26 = vsel %vm1566_vm2, %v4538_v24, -inf  ;;  %v1639_v18 = vsel %vm1566_vm2, %v4558_v10, -inf }
 0x2bf   : > { %v1645_v40 = vsel %vm1566_vm2, %v4541_v34, -inf  ;;  %v1648_v52 = vsel %vm1566_vm2, %v4544_v42, -inf }
 0x2c0   : > { %1643 = vmax.xlane.f32.xlu0 %v1642_v26  ;;  %1646 = vmax.xlane.f32.xlu2 %v1645_v40 }
 0x2c1   : > { %1649 = vmax.xlane.f32.xlu1 %v1648_v52 }
 0x2c2   : > { %v1431_v55 = vpop.f32.mrf.mxu2  ;;  %v1450_v56 = vpop.f32.mrf.mxu3 }
 0x2c4   : > { %v1469_v63 = vpop.f32.mrf.mxu0  ;;  %v1488_v3 = vpop.f32.mrf.mxu1 }
 0x2c8   : > { %1631 = vmax.xlane.f32.xlu2 %v1630_v4  ;;  %v3494_v4 = vunpack.i.l.bf16 %v3493_v22 }
 0x2ca   : > { %v1505_v15 = vpop.f32.mrf.mxu2  ;;  %v1524_v27 = vpop.f32.mrf.mxu3 }
 0x2cb   : > { %v4561_v11 = vadd.f32 %v1505_v15, %v4292_v36  ;;  %v4564_v45 = vadd.f32 %v1524_v27, %v4292_v36 }
 0x2cc   : > { %v4566_v31 = vpop.f32.mrf.mxu0  ;;  %v4568_v41 = vpop.f32.mrf.mxu1 }
 0x2cd   : > { %v1654_v14 = vsel %vm1566_vm2, %v4564_v45, -inf  ;;  %v1651_v16 = vsel %vm1566_vm2, %v4561_v11, -inf }
 0x2ce   : > { %1655 = vmax.xlane.f32.xlu1 %v1654_v14  ;;  %1652 = vmax.xlane.f32.xlu0 %v1651_v16 }
 0x2d0   : > { %1640 = vmax.xlane.f32.xlu2 %v1639_v18 }
 0x2d2   : > { %v1507_v59 = vpop.f32.mrf.mxu2  ;;  %v1526_v50 = vpop.f32.mrf.mxu3 }
 0x2d4   : > { %v1545_v21 = vpop.f32.mrf.mxu0  ;;  %v1564_v37 = vpop.f32.mrf.mxu1 }
 0x2e3   : > { %v1590_v23 = vpop.xlane.xlu2 %1589  ;;  %v1587_v48 = vpop.xlane.xlu1 %1586 }
 0x2e4   : > { %v1669_v32 = vsub.f32 %v4424_v38, %v1587_v48  ;;  %v1670_v26 = vsub.f32 %v4427_v39, %v1590_v23  ;;  %v1961_v39 = vpack.c.bf16 %v3494_v4, %v3494_v4  ;;  %v3495_v23 = vunpack.i.h.bf16 %v3493_v22 }
 0x2e6   : > { %v1707_v35 = vmul.f32 1.442695, %v1669_v32  ;;  %v1709_v40 = vmul.f32 1.442695, %v1670_v26  ;;  %v2178_v48 = vsel %vm1986_vm3, %v1961_v39, 0  ;;  %v1962_v26 = vpack.c.bf16 %v3495_v23, %v3495_v23 }
 0x2e8   : > { %3601 = vpow2.f32 %v1707_v35 }
 0x2eb   : > { %v1581_v52 = vpop.xlane.xlu2 %1580  ;;  %v1767_v55 = vpop.xlane.xlu1 %1766 }
 0x2ec   : > { %v1667_v56 = vsub.f32 %v4435_v53, %v1581_v52  ;;  %3603 = vrcp.f32 %v1767_v55  ;;  %v3480_v55 = vunpack.i.h.bf16 %v4576_v19 }
 0x2ed   : > { %3605 = vpow2.f32 %v1709_v40 }
 0x2ee   : > { %v1703_v63 = vmul.f32 1.442695, %v1667_v56  ;;  %v4581_v3 = vpop.eup %3601 }
 0x2ef   : > { %v1777_v15 = vsel %vm1566_vm2, %v4581_v3, 0.0 }
 0x2f0   : > { %3607 = vpow2.f32 %v1703_v63  ;;  %1778 = vadd.xlane.f32.xlu1 %v1777_v15  ;;  %v2197_v15 = vsel %vm1986_vm3, %v1962_v26, 0 }
 0x2f1   : > { %v1596_v38 = vpop.xlane.xlu0 %1595 }
 0x2f2   : > { %v3604_v27 = vpop.eup %3603 }
 0x2f3   : > { %v1889_v14 = vmul.f32 %v3604_v27, %v4437_v54  ;;  %v1770_v16 = vpop.xlane.xlu2 %1769  ;;  %v1599_v18 = vpop.xlane.xlu1 %1598 }
 0x2f4   : > { %3609 = vrcp.f32 %v1770_v16  ;;  %v1673_v53 = vsub.f32 %v4450_v9, %v1599_v18  ;;  %v4587_v59 = vpop.eup %3605 }
 0x2f5   : > { %v1921_v50 = vpack.c.bf16 %v1889_v14, %v1889_v14  ;;  %v1780_v54 = vsel %vm1566_vm2, %v4587_v59, 0.0  ;;  %v4609_v14 = vadd.f32 %v4568_v41, %v4292_v36 }
 0x2f6   : > { %v4589_v21 = vpop.eup %3607  ;;  %v1715_v37 = vmul.f32 1.442695, %v1673_v53 }
 0x2f7   : > { %3135 = vmatmul.msk.bf16.vlgmr.msrb.gmra.mxu0 %vm1566_vm2, %v1921_v50  ;;  %v1771_v32 = vsel %vm1566_vm2, %v4589_v21, 0.0 }
 0x2f8   : > { %3611 = vpow2.f32 %v1715_v37  ;;  %2187 = vmatpush.bf16.msrb.mxu0 %v2178_v48  ;;  %1772 = vadd.xlane.f32.xlu2 %v1771_v32  ;;  %v1672_v37 = vsub.f32 %v4445_v6, %v1596_v38  ;;  %v4624_v48 = vadd.f32 %v4566_v31, %v4292_v36  ;;  %v3479_v38 = vunpack.i.l.bf16 %v4576_v19 }
 0x2f9   : > { %1781 = vadd.xlane.f32.xlu1 %v1780_v54  ;;  %v1764_v9 = vpop.xlane.xlu0 %1763 }
 0x2fa   : > { %v3610_v35 = vpop.eup %3609  ;;  %3613 = vrcp.f32 %v1764_v9  ;;  %v1713_v41 = vmul.f32 1.442695, %v1672_v37  ;;  %v1657_v9 = vsel %vm1566_vm2, %v4624_v48, -inf }
 0x2fb   : > { %v1890_v22 = vmul.f32 %v3610_v35, %v4447_v17  ;;  %v1584_v40 = vpop.xlane.xlu2 %1583  ;;  %v1960_v17 = vpack.c.bf16 %v3480_v55, %v3480_v55 }
 0x2fc   : > { %v1668_v52 = vsub.f32 %v4461_v13, %v1584_v40 }
 0x2fd   : > { %v1922_v56 = vpack.c.bf16 %v1890_v22, %v1890_v22  ;;  %v2159_v53 = vsel %vm1986_vm3, %v1960_v17, 0  ;;  %v1959_v22 = vpack.c.bf16 %v3479_v38, %v3479_v38 }
 0x2fe   : > { %v4600_v63 = vpop.eup %3611  ;;  %v1705_v4 = vmul.f32 1.442695, %v1668_v52 }
 0x2ff   : > { %3136 = vmatmul.msk.bf16.vlgmr.msrb.gmra.mxu1 %vm1566_vm2, %v1922_v56  ;;  %v1789_v27 = vsel %vm1566_vm2, %v4600_v63, 0.0 }
 0x300   : > { %v3614_v39 = vpop.eup %3613  ;;  %3615 = vpow2.f32 %v1705_v4  ;;  %2206 = vmatpush.bf16.msrb.mxu1 %v2197_v15  ;;  %1790 = vadd.xlane.f32.xlu2 %v1789_v27 }
 0x301   : > { %v1888_v13 = vmul.f32 %v3614_v39, %v4458_v7  ;;  %v1660_v7 = vsel %vm1566_vm2, %v4609_v14, -inf  ;;  %v1605_v32 = vpop.xlane.xlu0 %1604 }
 0x302   : > { %v1675_v6 = vsub.f32 %v4472_v57, %v1605_v32  ;;  %v2140_v57 = vsel %vm1986_vm3, %v1959_v22, 0 }
 0x303   : > { %v1920_v16 = vpack.c.bf16 %v1888_v13, %v1888_v13  ;;  %v4611_v18 = vpop.xlane.xlu2 %1601  ;;  %v1611_v15 = vpop.xlane.xlu1 %1610 }
 0x304   : > { %v1719_v26 = vmul.f32 1.442695, %v1675_v6 }
 0x305   : > { %3134 = vmatmul.msk.bf16.vlgmr.msra.gmra.mxu3 %vm1566_vm2, %v1920_v16 }
 0x306   : > { %v4615_v50 = vpop.eup %3615  ;;  %2168 = vmatpush.bf16.msra.mxu3 %v2159_v53 }
 0x307   : > { %v1774_v23 = vsel %vm1566_vm2, %v4615_v50, 0.0 }
 0x308   : > { %1775 = vadd.xlane.f32.xlu0 %v1774_v23  ;;  %1661 = vmax.xlane.f32.xlu2 %v1660_v7 }
 0x30b   : > { %v1761_v54 = vpop.xlane.xlu2 %1760  ;;  %v1608_v37 = vpop.xlane.xlu1 %1607 }
 0x30c   : > { %3617 = vrcp.f32 %v1761_v54 }
 0x30d   : > { %3619 = vpow2.f32 %v1713_v41 }
 0x30e   : > { %3621 = vpow2.f32 %v1719_v26 }
 0x310   : > { %1658 = vmax.xlane.f32.xlu0 %v1657_v9 }
 0x311   : > { %v4639_v52 = vpop.xlane.xlu0 %1616 }
 0x312   : > { %v3618_v35 = vpop.eup %3617  ;;  %3502 = vrot.lane.b32.xlu1 %v4210_v47, %s3925_s24 }
 0x313   : > { %v1887_v36 = vmul.f32 %v3618_v35, %v4486_v33  ;;  %v4633_v31 = vpop.eup %3619  ;;  %v1593_v56 = vpop.xlane.xlu2 %1592 }
 0x314   : > { %v1786_v19 = vsel %vm1566_vm2, %v4633_v31, 0.0  ;;  %v4641_v55 = vpop.eup %3621  ;;  %v1671_v13 = vsub.f32 %v4493_v46, %v1593_v56  ;;  %v1626_v35 = vpop.xlane.xlu1 %1625  ;;  %v1676_v56 = vsub.f32 %v4484_v29, %v1608_v37 }
 0x315   : > { %v1919_v40 = vpack.c.bf16 %v1887_v36, %v1887_v36  ;;  %v1795_v33 = vsel %vm1566_vm2, %v4641_v55, 0.0 }
 0x316   : > { %v1711_v23 = vmul.f32 1.442695, %v1671_v13  ;;  %v1682_v13 = vsub.f32 %v4501_v2, %v1626_v35 }
 0x317   : > { %3133 = vmatmul.msk.bf16.vlgmr.msrb.gmra.mxu2 %vm1566_vm2, %v1919_v40 }
 0x318   : > { %2149 = vmatpush.bf16.msrb.mxu2 %v2140_v57  ;;  %1787 = vadd.xlane.f32.xlu0 %v1786_v19 }
 0x31b   : > { %v1614_v39 = vpop.xlane.xlu2 %1613 }
 0x320   : > { %3507 = vrot.lane.b32.xlu2 %v4210_v47, %s3923_s18  ;;  %1796 = vadd.xlane.f32.xlu0 %v1795_v33  ;;  %v1620_v33 = vpop.xlane.xlu1 %1619 }
 0x323   : > { %v1635_v4 = vpop.xlane.xlu0 %1634  ;;  %v1623_v32 = vpop.xlane.xlu2 %1622 }
 0x324   : > { %v1685_v27 = vsub.f32 %v4524_v28, %v1635_v4  ;;  %v1677_v28 = vsub.f32 %v4475_v20, %v1611_v15  ;;  %v1678_v20 = vsub.f32 %v4508_v8, %v1614_v39 }
 0x326   : > { %v1739_v17 = vmul.f32 1.442695, %v1685_v27  ;;  %v1723_v46 = vmul.f32 1.442695, %v1677_v28 }
 0x328   : > { %3623 = vpow2.f32 %v1739_v17 }
 0x32b   : > { %v1638_v16 = vpop.xlane.xlu0 %1637 }
 0x32c   : > { %v1686_v53 = vsub.f32 %v4533_v0, %v1638_v16  ;;  %v1674_v0 = vsub.f32 %v4469_v1, %v4611_v18  ;;  %v1725_v1 = vmul.f32 1.442695, %v1678_v20  ;;  %v1681_v18 = vsub.f32 %v4518_v5, %v1623_v32 }
 0x32d   : > { %v1721_v5 = vmul.f32 1.442695, %v1676_v56 }
 0x32e   : > { %v1741_v7 = vmul.f32 1.442695, %v1686_v53  ;;  %v4650_v41 = vpop.eup %3623  ;;  %v1717_v36 = vmul.f32 1.442695, %v1674_v0  ;;  %v1731_v4 = vmul.f32 1.442695, %v1681_v18  ;;  %v1680_v0 = vsub.f32 %v4511_v60, %v1620_v33 }
 0x32f   : > { %v1825_v54 = vsel %vm1566_vm2, %v4650_v41, 0.0  ;;  %v1733_v53 = vmul.f32 1.442695, %v1682_v13 }
 0x330   : > { %3625 = vpow2.f32 %v1741_v7  ;;  %1826 = vadd.xlane.f32.xlu0 %v1825_v54  ;;  %v1629_v7 = vpop.xlane.xlu1 %1628 }
 0x331   : > { %3627 = vpow2.f32 %v1711_v23  ;;  %v1683_v60 = vsub.f32 %v4521_v12, %v1629_v7 }
 0x332   : > { %3629 = vpow2.f32 %v1723_v46 }
 0x333   : > { %v4663_v26 = vpop.xlane.xlu2 %1646  ;;  %v4665_v22 = vpop.xlane.xlu0 %1643  ;;  %3631 = vpow2.f32 %v1717_v36  ;;  %v1735_v33 = vmul.f32 1.442695, %v1683_v60 }
 0x334   : > { %3633 = vpow2.f32 %v1725_v1 }
 0x335   : > { %3635 = vpow2.f32 %v1731_v4 }
 0x336   : > { %v4655_v6 = vpop.eup %3625 }
 0x337   : > { %v1828_v38 = vsel %vm1566_vm2, %v4655_v6, 0.0  ;;  %v4661_v9 = vpop.eup %3627 }
 0x338   : > { %1829 = vadd.xlane.f32.xlu0 %v1828_v38  ;;  %v1783_v40 = vsel %vm1566_vm2, %v4661_v9, 0.0  ;;  %v4671_v57 = vpop.eup %3629  ;;  %v4702_v20 = vpop.xlane.xlu1 %1649 }
 0x339   : > { %v1801_v27 = vsel %vm1566_vm2, %v4671_v57, 0.0  ;;  %v4677_v17 = vpop.eup %3631 }
 0x33a   : > { %v4680_v16 = vpop.eup %3633  ;;  %v1792_v29 = vsel %vm1566_vm2, %v4677_v17, 0.0 }
 0x33b   : > { %v1632_v15 = vpop.xlane.xlu2 %1631  ;;  %v1804_v37 = vsel %vm1566_vm2, %v4680_v16, 0.0  ;;  %v4688_v23 = vpop.eup %3635 }
 0x33c   : > { %1784 = vadd.xlane.f32.xlu1 %v1783_v40 }
 0x341   : > { %v1653_v19 = vpop.xlane.xlu0 %1652 }
 0x342   : > { %v1691_v8 = vsub.f32 %v4561_v11, %v1653_v19  ;;  %v1679_v11 = vsub.f32 %v4496_v49, %v4639_v52  ;;  %v1813_v52 = vsel %vm1566_vm2, %v4688_v23, 0.0  ;;  %v4713_v19 = vpop.xlane.xlu1 %1655 }
 0x343   : > { %v1641_v32 = vpop.xlane.xlu2 %1640 }
 0x344   : > { %v1751_v39 = vmul.f32 1.442695, %v1691_v8  ;;  %1802 = vadd.xlane.f32.xlu1 %v1801_v27  ;;  %v1727_v54 = vmul.f32 1.442695, %v1679_v11  ;;  %v1687_v46 = vsub.f32 %v4558_v10, %v1641_v32  ;;  %v1729_v10 = vmul.f32 1.442695, %v1680_v0 }
 0x345   : > { %v1684_v27 = vsub.f32 %v4553_v62, %v1632_v15  ;;  %v1688_v11 = vsub.f32 %v4538_v24, %v4665_v22  ;;  %v3484_v24 = vunpack.i.l.bf16 %v4418_v30 }
 0x346   : > { %3637 = vpow2.f32 %v1751_v39  ;;  %v1743_v38 = vmul.f32 1.442695, %v1687_v46 }
 0x347   : > { %3639 = vpow2.f32 %v1721_v5  ;;  %v1737_v5 = vmul.f32 1.442695, %v1684_v27  ;;  %v1745_v32 = vmul.f32 1.442695, %v1688_v11 }
 0x348   : > { %3641 = vpow2.f32 %v1733_v53 }
 0x349   : > { %1793 = vadd.xlane.f32.xlu2 %v1792_v29  ;;  %3643 = vpow2.f32 %v1727_v54  ;;  %v3499_v29 = vunpack.i.l.bf16 %v4420_v25 }
 0x34a   : > { %3645 = vpow2.f32 %v1743_v38  ;;  %v1963_v38 = vpack.c.bf16 %v3484_v24, %v3484_v24 }
 0x34b   : > { %3647 = vpow2.f32 %v1729_v10  ;;  %v1965_v15 = vpack.c.bf16 %v3499_v29, %v3499_v29 }
 0x34c   : > { %1805 = vadd.xlane.f32.xlu1 %v1804_v37  ;;  %v4690_v2 = vpop.eup %3637  ;;  %3649 = vpow2.f32 %v1735_v33 }
 0x34d   : > { %v1843_v28 = vsel %vm1566_vm2, %v4690_v2, 0.0  ;;  %v4695_v49 = vpop.eup %3639  ;;  %v2254_v46 = vsel %vm1986_vm3, %v1965_v15, 0 }
 0x34e   : > { %1844 = vadd.xlane.f32.xlu0 %v1843_v28  ;;  %v1798_v35 = vsel %vm1566_vm2, %v4695_v49, 0.0  ;;  %v4704_v36 = vpop.eup %3641  ;;  %v3500_v28 = vunpack.i.h.bf16 %v4420_v25 }
 0x34f   : > { %v4706_v40 = vpop.eup %3643  ;;  %v1816_v1 = vsel %vm1566_vm2, %v4704_v36, 0.0 }
 0x350   : > { %v1807_v18 = vsel %vm1566_vm2, %v4706_v40, 0.0  ;;  %v4715_v56 = vpop.eup %3645  ;;  %v1966_v60 = vpack.c.bf16 %v3500_v28, %v3500_v28 }
 0x351   : > { %1814 = vadd.xlane.f32.xlu2 %v1813_v52  ;;  %v4717_v4 = vpop.eup %3647  ;;  %v1831_v8 = vsel %vm1566_vm2, %v4715_v56, 0.0 }
 0x352   : > { %v1810_v12 = vsel %vm1566_vm2, %v4717_v4, 0.0  ;;  %v4726_v13 = vpop.eup %3649 }
 0x353   : > { %v1819_v62 = vsel %vm1566_vm2, %v4726_v13, 0.0 }
 0x354   : > { %1799 = vadd.xlane.f32.xlu1 %v1798_v35 }
 0x359   : > { %1817 = vadd.xlane.f32.xlu2 %v1816_v1 }
 0x35c   : > { %1808 = vadd.xlane.f32.xlu1 %v1807_v18 }
 0x361   : > { %1832 = vadd.xlane.f32.xlu2 %v1831_v8 }
 0x362   : > { %3517 = vrot.lane.b32.xlu0 %v4210_v47, %s3924_s21 }
 0x363   : > { %v1779_v39 = vpop.xlane.xlu1 %1778 }
 0x364   : > { %1811 = vadd.xlane.f32.xlu1 %v1810_v12  ;;  %3651 = vrcp.f32 %v1779_v39  ;;  %v1690_v12 = vsub.f32 %v4544_v42, %v4702_v20 }
 0x365   : > { %3653 = vpow2.f32 %v1737_v5 }
 0x366   : > { %v1749_v15 = vmul.f32 1.442695, %v1690_v12 }
 0x36a   : > { %v3652_v53 = vpop.eup %3651  ;;  %3522 = vrot.lane.b32.xlu0 %v4234_v61, %s3923_s18 }
 0x36b   : > { %v1773_v47 = vpop.xlane.xlu2 %1772  ;;  %v1893_v37 = vmul.f32 %v3652_v53, %v4581_v3  ;;  %v4737_v22 = vpop.eup %3653  ;;  %v1689_v3 = vsub.f32 %v4541_v34, %v4663_v26  ;;  %v2216_v34 = vsel %vm1986_vm3, %v1963_v38, 0 }
 0x36c   : > { %v1782_v7 = vpop.xlane.xlu1 %1781  ;;  %3655 = vrcp.f32 %v1773_v47  ;;  %1820 = vadd.xlane.f32.xlu1 %v1819_v62  ;;  %v1822_v1 = vsel %vm1566_vm2, %v4737_v22, 0.0  ;;  %v1969_v47 = vpack.c.bf16 %v4218_v51, %v4218_v51 }
 0x36d   : > { %3657 = vrcp.f32 %v1782_v7  ;;  %v1925_v54 = vpack.c.bf16 %v1893_v37, %v1893_v37  ;;  %v1747_v8 = vmul.f32 1.442695, %v1689_v3  ;;  %v3485_v37 = vunpack.i.h.bf16 %v4418_v30 }
 0x36e   : > { %3659 = vpow2.f32 %v1745_v32 }
 0x36f   : > { %3139 = vmatmul.msk.bf16.vlgmr.msra.gmra.mxu0 %vm1566_vm2, %v1925_v54  ;;  %v1964_v32 = vpack.c.bf16 %v3485_v37, %v3485_v37 }
 0x370   : > { %2263 = vmatpush.bf16.msra.mxu0 %v2254_v46 }
 0x371   : > { %v2235_v38 = vsel %vm1986_vm3, %v1964_v32, 0 }
 0x372   : > { %v3656_v52 = vpop.eup %3655 }
 0x373   : > { %v3658_v0 = vpop.eup %3657  ;;  %v1891_v35 = vmul.f32 %v3656_v52, %v4589_v21  ;;  %v1791_v10 = vpop.xlane.xlu2 %1790  ;;  %v2273_v21 = vsel %vm1986_vm3, %v1966_v60, 0 }
 0x374   : > { %v1894_v25 = vmul.f32 %v3658_v0, %v4587_v59  ;;  %3661 = vrcp.f32 %v1791_v10  ;;  %1823 = vadd.xlane.f32.xlu1 %v1822_v1  ;;  %v4748_v18 = vpop.f32.mrf.mxu0  ;;  %v4752_v26 = vpop.eup %3659  ;;  %v1692_v1 = vsub.f32 %v4564_v45, %v4713_v19 }
 0x375   : > { %v1923_v33 = vpack.c.bf16 %v1891_v35, %v1891_v35  ;;  %3663 = vpow2.f32 %v1747_v8  ;;  %v1834_v5 = vsel %vm1566_vm2, %v4752_v26, 0.0 }
 0x376   : > { %v1926_v27 = vpack.c.bf16 %v1894_v25, %v1894_v25 }
 0x377   : > { %3137 = vmatmul.msk.bf16.vlgmr.msra.gmra.mxu2 %vm1566_vm2, %v1923_v33 }
 0x378   : > { %3140 = vmatmul.msk.bf16.vlgmr.msra.gmra.mxu1 %vm1566_vm2, %v1926_v27  ;;  %2225 = vmatpush.bf16.msra.mxu2 %v2216_v34  ;;  %v1968_v34 = vpack.c.bf16 %v4204_v44, %v4204_v44 }
 0x379   : > { %2282 = vmatpush.bf16.msra.mxu1 %v2273_v21  ;;  %3512 = vrot.lane.b32.xlu2 %v4234_v61, %s3925_s24  ;;  %v1753_v21 = vmul.f32 1.442695, %v1692_v1 }
 0x37a   : > { %v3662_v59 = vpop.eup %3661  ;;  %v2311_v45 = vsel %vm1986_vm3, %v1968_v34, 0 }
 0x37b   : > { %v1897_v39 = vmul.f32 %v3662_v59, %v4600_v63  ;;  %v1776_v29 = vpop.xlane.xlu0 %1775  ;;  %v4768_v42 = vpop.eup %3663  ;;  %v2330_v63 = vsel %vm1986_vm3, %v1969_v47, 0 }
 0x37c   : > { %1835 = vadd.xlane.f32.xlu1 %v1834_v5  ;;  %3665 = vrcp.f32 %v1776_v29  ;;  %v2039_v11 = vpop.f32.mrf.mxu0  ;;  %v4763_v53 = vpop.f32.mrf.mxu1  ;;  %v1837_v51 = vsel %vm1566_vm2, %v4768_v42, 0.0 }
 0x37d   : > { %v1929_v62 = vpack.c.bf16 %v1897_v39, %v1897_v39  ;;  %v1662_v20 = vpop.xlane.xlu2 %1661  ;;  %3667 = vpow2.f32 %v1749_v15 }
 0x37e   : > { %v1694_v54 = vsub.f32 %v4609_v14, %v1662_v20  ;;  %v1967_v20 = vpack.c.bf16 %v4202_v43, %v4202_v43 }
 0x37f   : > { %3143 = vmatmul.msk.bf16.vlgmr.msrb.gmra.mxu0 %vm1566_vm2, %v1929_v62 }
 0x380   : > { %2339 = vmatpush.bf16.msrb.mxu0 %v2330_v63  ;;  %v1757_v0 = vmul.f32 1.442695, %v1694_v54  ;;  %v2292_v32 = vsel %vm1986_vm3, %v1967_v20, 0 }
 0x382   : > { %v3666_v7 = vpop.eup %3665 }
 0x383   : > { %v1892_v24 = vmul.f32 %v3666_v7, %v4615_v50  ;;  %v1659_v28 = vpop.xlane.xlu0 %1658  ;;  %v4779_v35 = vpop.eup %3667 }
 0x384   : > { %1838 = vadd.xlane.f32.xlu1 %v1837_v51  ;;  %v1693_v30 = vsub.f32 %v4624_v48, %v1659_v28  ;;  %v2058_v46 = vpop.f32.mrf.mxu1  ;;  %v1840_v50 = vsel %vm1566_vm2, %v4779_v35, 0.0  ;;  %v3503_v5 = vpop.permute.xlu1 %3502 }
 0x385   : > { %v1924_v52 = vpack.c.bf16 %v1892_v24, %v1892_v24  ;;  %v4808_v47 = vpop.permute.xlu2 %3507  ;;  %v3504_v46 = vunpack.i.l.bf16 %v3503_v5 }
 0x386   : > { %v1755_v3 = vmul.f32 1.442695, %v1693_v30 }
 0x387   : > { %3138 = vmatmul.msk.bf16.vlgmr.msrb.gmra.mxu3 %vm1566_vm2, %v1924_v52 }
 0x388   : > { %2244 = vmatpush.bf16.msrb.mxu3 %v2235_v38  ;;  %v4781_v14 = vpop.f32.mrf.mxu3  ;;  %3669 = vpow2.f32 %v1755_v3  ;;  %v1970_v3 = vpack.c.bf16 %v4228_v58, %v4228_v58 }
 0x389   : > { %3671 = vpow2.f32 %v1757_v0 }
 0x38a   : > { %v2349_v1 = vsel %vm1986_vm3, %v1970_v3, 0 }
 0x38b   : > { %v1788_v10 = vpop.xlane.xlu0 %1787 }
 0x38c   : > { %1841 = vadd.xlane.f32.xlu1 %v1840_v50  ;;  %3673 = vrcp.f32 %v1788_v10 }
 0x38d   : > { %3675 = vpow2.f32 %v1753_v21 }
 0x38e   : > { %v4785_v48 = vpop.eup %3669 }
 0x38f   : > { %v4789_v25 = vpop.eup %3671  ;;  %v1849_v27 = vsel %vm1566_vm2, %v4785_v48, 0.0 }
 0x390   : > { %v2020_v60 = vpop.f32.mrf.mxu3  ;;  %v1852_v59 = vsel %vm1566_vm2, %v4789_v25, 0.0 }
 0x392   : > { %v3674_v33 = vpop.eup %3673 }
 0x393   : > { %v1896_v8 = vmul.f32 %v3674_v33, %v4633_v31  ;;  %v4802_v19 = vpop.eup %3675  ;;  %v1797_v11 = vpop.xlane.xlu0 %1796  ;;  %v3505_v33 = vunpack.i.h.bf16 %v3503_v5 }
 0x394   : > { %1850 = vadd.xlane.f32.xlu1 %v1849_v27  ;;  %1853 = vadd.xlane.f32.xlu0 %v1852_v59  ;;  %v1846_v44 = vsel %vm1566_vm2, %v4802_v19, 0.0 }
 0x395   : > { %v1928_v12 = vpack.c.bf16 %v1896_v8, %v1896_v8  ;;  %v1972_v59 = vpack.c.bf16 %v3505_v33, %v3505_v33 }
 0x397   : > { %3142 = vmatmul.msk.bf16.vlgmr.msra.gmra.mxu3 %vm1566_vm2, %v1928_v12 }
 0x398   : > { %2320 = vmatpush.bf16.msra.mxu3 %v2311_v45 }
 0x39a   : > { %v4800_v31 = vpop.f32.mrf.mxu2 }
 0x3a2   : > { %v2001_v39 = vpop.f32.mrf.mxu2  ;;  %1847 = vadd.xlane.f32.xlu2 %v1846_v44 }
 0x3a3   : > { %v1827_v7 = vpop.xlane.xlu0 %1826 }
 0x3ab   : > { %v4821_v38 = vpop.xlane.xlu0 %1829 }
 0x3ad   : > { %3527 = vrot.lane.b32.xlu1 %v4234_v61, %s3924_s21 }
 0x3af   : > { %v1785_v29 = vpop.xlane.xlu1 %1784 }
 0x3b0   : > { %3677 = vrcp.f32 %v1785_v29  ;;  %v3509_v29 = vunpack.i.l.bf16 %v4808_v47 }
 0x3b6   : > { %v3678_v62 = vpop.eup %3677 }
 0x3b7   : > { %v1895_v15 = vmul.f32 %v3678_v62, %v4661_v9  ;;  %v1803_v37 = vpop.xlane.xlu1 %1802 }
 0x3b8   : > { %3679 = vrcp.f32 %v1803_v37  ;;  %v1975_v37 = vpack.c.bf16 %v3509_v29, %v3509_v29 }
 0x3b9   : > { %v1927_v63 = vpack.c.bf16 %v1895_v15, %v1895_v15  ;;  %3681 = vrcp.f32 %v1797_v11  ;;  %v2387_v11 = vsel %vm1986_vm3, %v1972_v59, 0 }
 0x3bb   : > { %3141 = vmatmul.msk.bf16.vlgmr.msrb.gmra.mxu2 %vm1566_vm2, %v1927_v63 }
 0x3bc   : > { %2301 = vmatpush.bf16.msrb.mxu2 %v2292_v32  ;;  %v1794_v61 = vpop.xlane.xlu2 %1793  ;;  %v3510_v32 = vunpack.i.h.bf16 %v4808_v47 }
 0x3bd   : > { %3683 = vrcp.f32 %v1794_v61  ;;  %v2444_v61 = vsel %vm1986_vm3, %v1975_v37, 0 }
 0x3be   : > { %v3680_v54 = vpop.eup %3679 }
 0x3bf   : > { %v1901_v24 = vmul.f32 %v3680_v54, %v4671_v57  ;;  %v1806_v51 = vpop.xlane.xlu1 %1805  ;;  %v3682_v28 = vpop.eup %3681  ;;  %v1971_v57 = vpack.c.bf16 %v3504_v46, %v3504_v46 }
 0x3c0   : > { %v1899_v0 = vmul.f32 %v3682_v28, %v4641_v55 }
 0x3c1   : > { %v1933_v9 = vpack.c.bf16 %v1901_v24, %v1901_v24  ;;  %v2368_v58 = vsel %vm1986_vm3, %v1971_v57, 0  ;;  %v4827_v8 = vpop.xlane.xlu0 %1844 }
 0x3c2   : > { %v1931_v60 = vpack.c.bf16 %v1899_v0, %v1899_v0 }
 0x3c3   : > { %v3684_v30 = vpop.eup %3683  ;;  %3147 = vmatmul.msk.bf16.vlgmr.msra.gmra.mxu0 %vm1566_vm2, %v1933_v9 }
 0x3c4   : > { %v1898_v43 = vmul.f32 %v3684_v30, %v4677_v17  ;;  %v1815_v52 = vpop.xlane.xlu2 %1814 }
 0x3c5   : > { %3685 = vrcp.f32 %v1815_v52 }
 0x3c6   : > { %v1930_v50 = vpack.c.bf16 %v1898_v43, %v1898_v43 }
 0x3c7   : > { %v1800_v10 = vpop.xlane.xlu1 %1799 }
 0x3c8   : > { %3687 = vrcp.f32 %v1800_v10  ;;  %3144 = vmatmul.msk.bf16.vlgmr.msrb.gmra.mxu1 %vm1566_vm2, %v1930_v50 }
 0x3c9   : > { %3689 = vrcp.f32 %v1806_v51  ;;  %2358 = vmatpush.bf16.msrb.mxu1 %v2349_v1 }
 0x3cb   : > { %v3686_v17 = vpop.eup %3685  ;;  %3145 = vmatmul.msk.bf16.vlgmr.msra.gmra.mxu2 %vm1566_vm2, %v1931_v60 }
 0x3cc   : > { %2377 = vmatpush.bf16.msra.mxu2 %v2368_v58  ;;  %v1818_v55 = vpop.xlane.xlu2 %1817  ;;  %v1905_v27 = vmul.f32 %v3686_v17, %v4688_v23 }
 0x3ce   : > { %v3688_v34 = vpop.eup %3687  ;;  %v1937_v44 = vpack.c.bf16 %v1905_v27, %v1905_v27 }
 0x3cf   : > { %v3690_v21 = vpop.eup %3689  ;;  %v1900_v12 = vmul.f32 %v3688_v34, %v4695_v49  ;;  %v1809_v45 = vpop.xlane.xlu1 %1808 }
 0x3d0   : > { %3691 = vrcp.f32 %v1809_v45  ;;  %v1902_v5 = vmul.f32 %v3690_v21, %v4680_v16 }
 0x3d1   : > { %v1932_v39 = vpack.c.bf16 %v1900_v12, %v1900_v12  ;;  %3693 = vrcp.f32 %v1827_v7 }
 0x3d2   : > { %v1934_v49 = vpack.c.bf16 %v1902_v5, %v1902_v5 }
 0x3d3   : > { %3146 = vmatmul.msk.bf16.vlgmr.msrb.gmra.mxu3 %vm1566_vm2, %v1932_v39  ;;  %3151 = vmatmul.msk.bf16.vlgmr.msrb.gmra.mxu0 %vm1566_vm2, %v1937_v44 }
 0x3d4   : > { %2396 = vmatpush.bf16.msrb.mxu3 %v2387_v11  ;;  %v1833_v23 = vpop.xlane.xlu2 %1832  ;;  %v4836_v62 = vpop.permute.xlu0 %3517 }
 0x3d5   : > { %v3520_v44 = vunpack.i.h.bf16 %v4836_v62 }
 0x3d6   : > { %v3692_v15 = vpop.eup %3691 }
 0x3d7   : > { %v1903_v20 = vmul.f32 %v3692_v15, %v4706_v40  ;;  %v1812_v63 = vpop.xlane.xlu1 %1811  ;;  %v3694_v54 = vpop.eup %3693  ;;  %v1976_v40 = vpack.c.bf16 %v3510_v32, %v3510_v32  ;;  %v1980_v11 = vpack.c.bf16 %v3520_v44, %v3520_v44 }
 0x3d8   : > { %3695 = vrcp.f32 %v1812_v63  ;;  %3148 = vmatmul.msk.bf16.vlgmr.msra.gmra.mxu1 %vm1566_vm2, %v1934_v49  ;;  %v1909_v43 = vmul.f32 %v3694_v54, %v4650_v41 }
 0x3d9   : > { %3697 = vrcp.f32 %v1818_v55  ;;  %v1935_v16 = vpack.c.bf16 %v1903_v20, %v1903_v20  ;;  %v2463_v58 = vsel %vm1986_vm3, %v1976_v40, 0 }
 0x3da   : > { %v1941_v41 = vpack.c.bf16 %v1909_v43, %v1909_v43 }
 0x3db   : > { %3149 = vmatmul.msk.bf16.vlgmr.msrb.gmra.mxu2 %vm1566_vm2, %v1935_v16 }
 0x3dc   : > { %2453 = vmatpush.bf16.msrb.mxu2 %v2444_v61  ;;  %v3513_v24 = vpop.permute.xlu2 %3512  ;;  %v3523_v9 = vpop.permute.xlu0 %3522 }
 0x3dd   : > { %v3515_v7 = vunpack.i.h.bf16 %v3513_v24  ;;  %v3514_v51 = vunpack.i.l.bf16 %v3513_v24  ;;  %v3524_v30 = vunpack.i.l.bf16 %v3523_v9  ;;  %v3525_v50 = vunpack.i.h.bf16 %v3523_v9 }
 0x3de   : > { %v3696_v28 = vpop.eup %3695 }
 0x3df   : > { %v3698_v46 = vpop.eup %3697  ;;  %v1904_v52 = vmul.f32 %v3696_v28, %v4717_v4  ;;  %v1974_v3 = vpack.c.bf16 %v3515_v7, %v3515_v7  ;;  %v1973_v47 = vpack.c.bf16 %v3514_v51, %v3514_v51  ;;  %v1821_v0 = vpop.xlane.xlu1 %1820  ;;  %v1977_v57 = vpack.c.bf16 %v3524_v30, %v3524_v30 }
 0x3e0   : > { %3699 = vrcp.f32 %v1821_v0  ;;  %v1906_v17 = vmul.f32 %v3698_v46, %v4704_v36  ;;  %v3519_v4 = vunpack.i.l.bf16 %v4836_v62  ;;  %v1978_v55 = vpack.c.bf16 %v3525_v50, %v3525_v50 }
 0x3e1   : > { %v1936_v10 = vpack.c.bf16 %v1904_v52, %v1904_v52  ;;  %v2406_v1 = vsel %vm1986_vm3, %v1973_v47, 0  ;;  %v2425_v60 = vsel %vm1986_vm3, %v1974_v3, 0  ;;  %v2482_v33 = vsel %vm1986_vm3, %v1977_v57, 0 }
 0x3e2   : > { %2415 = vmatpush.bf16.msra.mxu0 %v2406_v1  ;;  %2434 = vmatpush.bf16.msra.mxu1 %v2425_v60  ;;  %v1938_v34 = vpack.c.bf16 %v1906_v17, %v1906_v17  ;;  %v1979_v21 = vpack.c.bf16 %v3519_v4, %v3519_v4  ;;  %v2501_v12 = vsel %vm1986_vm3, %v1978_v55, 0  ;;  %v2539_v62 = vsel %vm1986_vm3, %v1980_v11, 0 }
 0x3e3   : > { %3150 = vmatmul.msk.bf16.vlgmr.msra.gmra.mxu3 %vm1566_vm2, %v1936_v10 }
 0x3e4   : > { %2472 = vmatpush.bf16.msra.mxu3 %v2463_v58  ;;  %v2520_v39 = vsel %vm1986_vm3, %v1979_v21, 0 }
 0x3e5   : > { %3155 = vmatmul.msk.bf16.vlgmr.msra.gmra.mxu0 %vm1566_vm2, %v1941_v41 }
 0x3e6   : > { %2491 = vmatpush.bf16.msrb.mxu0 %v2482_v33  ;;  %v3700_v27 = vpop.eup %3699 }
 0x3e7   : > { %v1907_v36 = vmul.f32 %v3700_v27, %v4726_v13  ;;  %v1824_v59 = vpop.xlane.xlu1 %1823 }
 0x3e8   : > { %3701 = vrcp.f32 %v1824_v59  ;;  %3152 = vmatmul.msk.bf16.vlgmr.msrb.gmra.mxu1 %vm1566_vm2, %v1938_v34 }
 0x3e9   : > { %3703 = vrcp.f32 %v4821_v38  ;;  %v1939_v45 = vpack.c.bf16 %v1907_v36, %v1907_v36  ;;  %2510 = vmatpush.bf16.msrb.mxu1 %v2501_v12 }
 0x3ea   : > { %3705 = vrcp.f32 %v1833_v23 }
 0x3eb   : > { %3153 = vmatmul.msk.bf16.vlgmr.msra.gmra.mxu2 %vm1566_vm2, %v1939_v45 }
 0x3ec   : > { %2529 = vmatpush.bf16.msra.mxu2 %v2520_v39  ;;  %v4860_v5 = vpop.f32.mrf.mxu0 }
 0x3ee   : > { %v3702_v13 = vpop.eup %3701 }
 0x3ef   : > { %v3704_v29 = vpop.eup %3703  ;;  %v1908_v15 = vmul.f32 %v3702_v13, %v4737_v22  ;;  %v1836_v49 = vpop.xlane.xlu1 %1835 }
 0x3f0   : > { %v3706_v38 = vpop.eup %3705  ;;  %v1910_v20 = vmul.f32 %v3704_v29, %v4655_v6  ;;  %3707 = vrcp.f32 %v1836_v49 }
 0x3f1   : > { %v1940_v37 = vpack.c.bf16 %v1908_v15, %v1908_v15  ;;  %v1911_v23 = vmul.f32 %v3706_v38, %v4715_v56 }
 0x3f2   : > { %v1942_v32 = vpack.c.bf16 %v1910_v20, %v1910_v20 }
 0x3f3   : > { %3154 = vmatmul.msk.bf16.vlgmr.msrb.gmra.mxu3 %vm1566_vm2, %v1940_v37  ;;  %v1943_v6 = vpack.c.bf16 %v1911_v23, %v1911_v23 }
 0x3f4   : > { %2548 = vmatpush.bf16.msrb.mxu3 %v2539_v62  ;;  %v2115_v63 = vpop.f32.mrf.mxu0 }
 0x3f5   : > { %v4867_v16 = vpop.f32.mrf.mxu1 }
 0x3f6   : > { %v3561_v22 = vpack.i.bf16 %v4867_v16, %v4860_v5  ;;  %v3708_v54 = vpop.eup %3707  ;;  %v3253_v5 = vld [vmem:[%s5044_s7 + $0x38] sm:$0xff] }
 0x3f7   : > { %v1839_v61 = vpop.xlane.xlu1 %1838  ;;  %v1912_v56 = vmul.f32 %v3708_v54, %v4752_v26 }
 0x3f8   : > { %3709 = vrcp.f32 %v1839_v61  ;;  %3156 = vmatmul.msk.bf16.vlgmr.msra.gmra.mxu1 %vm1566_vm2, %v1942_v32 }
 0x3f9   : > { %3711 = vrcp.f32 %v4827_v8  ;;  %v1944_v30 = vpack.c.bf16 %v1912_v56, %v1912_v56 }
 0x3fa   : > { %v2075_v24 = vpop.f32.mrf.mxu2 }
 0x3fb   : > { %3157 = vmatmul.msk.bf16.vlgmr.msrb.gmra.mxu2 %vm1566_vm2, %v1943_v6 }
 0x3fc   : > { %v4875_v51 = vpop.f32.mrf.mxu0  ;;  %2850 = vmatpush.bf16.msrb.mxu2 %v3253_v5 }
 0x3fd   : > { %v2134_v7 = vpop.f32.mrf.mxu1 }
 0x3fe   : > { %v3710_v9 = vpop.eup %3709 }
 0x3ff   : > { %v1913_v28 = vmul.f32 %v3710_v9, %v4768_v42  ;;  %v1842_v40 = vpop.xlane.xlu1 %1841  ;;  %v3712_v43 = vpop.eup %3711 }
 0x400   : > { %3713 = vrcp.f32 %v1842_v40  ;;  %v1915_v8 = vmul.f32 %v3712_v43, %v4690_v2 }
 0x401   : > { %v1945_v46 = vpack.c.bf16 %v1913_v28, %v1913_v28 }
 0x402   : > { %v2077_v52 = vpop.f32.mrf.mxu2  ;;  %v1947_v0 = vpack.c.bf16 %v1915_v8, %v1915_v8 }
 0x403   : > { %3158 = vmatmul.msk.bf16.vlgmr.msra.gmra.mxu3 %vm1566_vm2, %v1944_v30  ;;  %3159 = vmatmul.msk.bf16.vlgmr.msrb.gmra.mxu0 %vm1566_vm2, %v1945_v46 }
 0x404   : > { %v2191_v3 = vpop.f32.mrf.mxu0 }
 0x406   : > { %v3714_v26 = vpop.eup %3713 }
 0x407   : > { %v1914_v47 = vmul.f32 %v3714_v26, %v4779_v35  ;;  %v1851_v1 = vpop.xlane.xlu1 %1850  ;;  %v1854_v17 = vpop.xlane.xlu0 %1853 }
 0x409   : > { %v1946_v50 = vpack.c.bf16 %v1914_v47, %v1914_v47 }
 0x40a   : > { %v2094_v57 = vpop.f32.mrf.mxu3 }
 0x40b   : > { %v3531_v42 = vpack.i.bf16 %v2094_v57, %v2075_v24  ;;  %3160 = vmatmul.msk.bf16.vlgmr.msrb.gmra.mxu1 %vm1566_vm2, %v1946_v50  ;;  %3161 = vmatmul.msk.bf16.vlgmr.msra.gmra.mxu2 %vm1566_vm2, %v1947_v0 }
 0x40d   : > { %3532 = vrot.lane.b32.xlu2 %v3531_v42, %s3924_s21 }
 0x412   : > { %v2096_v10 = vpop.f32.mrf.mxu3 }
 0x415   : > { %v1848_v60 = vpop.xlane.xlu2 %1847 }
 0x416   : > { %3715 = vrcp.f32 %v1848_v60 }
 0x417   : > { %3717 = vrcp.f32 %v1851_v1 }
 0x418   : > { %3719 = vrcp.f32 %v1854_v17 }
 0x41a   : > { %v2170_v2 = vpop.f32.mrf.mxu3 }
 0x41c   : > { %v3716_v33 = vpop.eup %3715 }
 0x41d   : > { %v1916_v35 = vmul.f32 %v3716_v33, %v4802_v19  ;;  %v3718_v41 = vpop.eup %3717 }
 0x41e   : > { %v3720_v4 = vpop.eup %3719  ;;  %v1917_v21 = vmul.f32 %v3718_v41, %v4785_v48 }
 0x41f   : > { %v1948_v58 = vpack.c.bf16 %v1916_v35, %v1916_v35  ;;  %v3528_v55 = vpop.permute.xlu1 %3527  ;;  %v1918_v36 = vmul.f32 %v3720_v4, %v4789_v25 }
 0x420   : > { %v3530_v27 = vunpack.i.h.bf16 %v3528_v55  ;;  %v3529_v34 = vunpack.i.l.bf16 %v3528_v55  ;;  %v1949_v19 = vpack.c.bf16 %v1917_v21, %v1917_v21 }
 0x421   : > { %3162 = vmatmul.msk.bf16.vlgmr.msrb.gmra.mxu3 %vm1566_vm2, %v1948_v58  ;;  %v1950_v13 = vpack.c.bf16 %v1918_v36, %v1918_v36  ;;  %v3252_v58 = vld [vmem:[%s5044_s7 + $0x30] sm:$0xff] }
 0x422   : > { %v1982_v59 = vpack.c.bf16 %v3530_v27, %v3530_v27  ;;  %v1981_v12 = vpack.c.bf16 %v3529_v34, %v3529_v34  ;;  %v2172_v45 = vpop.f32.mrf.mxu3  ;;  %2851 = vmatpush.bf16.msrb.mxu2 %v3252_v58  ;;  %v3250_v27 = vld [vmem:[%s5044_s7 + $0x20] sm:$0xff]  ;;  %v3249_v34 = vld [vmem:[%s5044_s7 + $0x18] sm:$0xff]  ;;  %v3248_v36 = vld [vmem:[%s5044_s7 + $0x10] sm:$0xff] }
 0x424   : > { %v2558_v44 = vsel %vm1986_vm3, %v1981_v12, 0  ;;  %v2577_v39 = vsel %vm1986_vm3, %v1982_v59, 0 }
 0x425   : > { %2567 = vmatpush.bf16.msra.mxu0 %v2558_v44  ;;  %2586 = vmatpush.bf16.msra.mxu1 %v2577_v39  ;;  %v3247_v44 = vld [vmem:[%s5044_s7 + $0x8] sm:$0xff] }
 0x428   : > { %3163 = vmatmul.msk.bf16.vlgmr.msra.gmra.mxu0 %vm1566_vm2, %v1949_v19  ;;  %3164 = vmatmul.msk.bf16.vlgmr.msra.gmra.mxu1 %vm1566_vm2, %v1950_v13 }
 0x43e   : > { %v2151_v29 = vpop.f32.mrf.mxu2 }
 0x43f   : > { %v3536_v11 = vpack.i.bf16 %v2170_v2, %v2151_v29 }
 0x440   : > { %v2265_v48 = vpop.f32.mrf.mxu0 }
 0x441   : > { %3537 = vrot.lane.b32.xlu1 %v3536_v11, %s3923_s18  ;;  %v3246_v11 = vld [vmem:[%s5044_s7] sm:$0xff] }
 0x445   : > { %v2208_v25 = vpop.f32.mrf.mxu1 }
 0x446   : > { %v2153_v15 = vpop.f32.mrf.mxu2  ;;  %v3566_v41 = vpack.i.bf16 %v2208_v25, %v4875_v51  ;;  %v3251_v51 = vld [vmem:[%s5044_s7 + $0x28] sm:$0xff] }
 0x447   : > { %2852 = vmatpush.bf16.msrb.mxu2 %v3251_v51 }
 0x448   : > { %v2267_v49 = vpop.f32.mrf.mxu0 }
 0x44b   : > { %2853 = vmatpush.bf16.msrb.mxu2 %v3250_v27 }
 0x44d   : > { %v2210_v37 = vpop.f32.mrf.mxu1 }
 0x44e   : > { %v2227_v38 = vpop.f32.mrf.mxu2 }
 0x44f   : > { %2854 = vmatpush.bf16.msrb.mxu2 %v3249_v34 }
 0x450   : > { %v4894_v20 = vpop.f32.mrf.mxu0 }
 0x453   : > { %2855 = vmatpush.bf16.msrb.mxu2 %v3248_v36 }
 0x455   : > { %v2284_v62 = vpop.f32.mrf.mxu1 }
 0x456   : > { %v2229_v23 = vpop.f32.mrf.mxu2  ;;  %v2246_v63 = vpop.f32.mrf.mxu3  ;;  %v3571_v1 = vpack.i.bf16 %v2284_v62, %v2265_v48 }
 0x457   : > { %v3541_v32 = vpack.i.bf16 %v2246_v63, %v2227_v38  ;;  %2856 = vmatpush.bf16.msrb.mxu2 %v3247_v44 }
 0x458   : > { %v2343_v61 = vpop.f32.mrf.mxu0 }
 0x459   : > { %3542 = vrot.lane.b32.xlu1 %v3541_v32, %s3925_s24 }
 0x45b   : > { %2857 = vmatpush.bf16.msrb.mxu2 %v3246_v11 }
 0x45d   : > { %v2286_v6 = vpop.f32.mrf.mxu1 }
 0x45e   : > { %v2248_v54 = vpop.f32.mrf.mxu3  ;;  %v4897_v24 = vpop.f32.mrf.mxu2 }
 0x462   : > { %v2417_v56 = vpop.f32.mrf.mxu0 }
 0x465   : > { %v4899_v7 = vpop.f32.mrf.mxu1 }
 0x466   : > { %v2305_v9 = vpop.f32.mrf.mxu2  ;;  %v4901_v28 = vpop.f32.mrf.mxu3 }
 0x467   : > { %v3533_v25 = vpop.permute.xlu2 %3532 }
 0x468   : > { %v3535_v15 = vunpack.i.h.bf16 %v3533_v25  ;;  %v3534_v49 = vunpack.i.l.bf16 %v3533_v25 }
 0x46a   : > { %v2419_v40 = vpop.f32.mrf.mxu0  ;;  %v2689_v23 = vsel %vm532_vm1, %v4781_v14, %v3535_v15  ;;  %v2688_v63 = vsel %vm532_vm1, %v4800_v31, %v3534_v49  ;;  %v3260_v14 = vld [vmem:[%s5044_s7 + $0x70] sm:$0xff]  ;;  %v3259_v31 = vld [vmem:[%s5044_s7 + $0x68] sm:$0xff] }
 0x46d   : > { %v2362_v30 = vpop.f32.mrf.mxu1 }
 0x46e   : > { %v2324_v46 = vpop.f32.mrf.mxu3  ;;  %v2379_v43 = vpop.f32.mrf.mxu2  ;;  %v3261_v30 = vld [vmem:[%s5044_s7 + $0x78] sm:$0xff] }
 0x46f   : > { %2869 = vmatpush.bf16.msra.mxu3 %v3261_v30 }
 0x473   : > { %2870 = vmatpush.bf16.msra.mxu3 %v3260_v14 }
 0x475   : > { %v2436_v52 = vpop.f32.mrf.mxu1 }
 0x476   : > { %v2381_v8 = vpop.f32.mrf.mxu2  ;;  %v2398_v3 = vpop.f32.mrf.mxu3  ;;  %v3576_v55 = vpack.i.bf16 %v2436_v52, %v2417_v56  ;;  %v3257_v52 = vld [vmem:[%s5044_s7 + $0x58] sm:$0xff] }
 0x477   : > { %v3546_v26 = vpack.i.bf16 %v2398_v3, %v2379_v43  ;;  %2871 = vmatpush.bf16.msra.mxu3 %v3259_v31  ;;  %v3258_v43 = vld [vmem:[%s5044_s7 + $0x60] sm:$0xff]  ;;  %v3256_v8 = vld [vmem:[%s5044_s7 + $0x50] sm:$0xff] }
 0x479   : > { %3547 = vrot.lane.b32.xlu2 %v3546_v26, %s3924_s21  ;;  %v3255_v26 = vld [vmem:[%s5044_s7 + $0x48] sm:$0xff] }
 0x47b   : > { %2872 = vmatpush.bf16.msra.mxu3 %v3258_v43 }
 0x47d   : > { %v2438_v47 = vpop.f32.mrf.mxu1 }
 0x47e   : > { %v2400_v0 = vpop.f32.mrf.mxu3  ;;  %v2455_v50 = vpop.f32.mrf.mxu2 }
 0x47f   : > { %2873 = vmatpush.bf16.msra.mxu3 %v3257_v52  ;;  %v3254_v0 = vld [vmem:[%s5044_s7 + $0x40] sm:$0xff] }
 0x480   : > { %v2493_v57 = vpop.f32.mrf.mxu0 }
 0x481   : > { %3562 = vrot.lane.b32.xlu2 %v3561_v22, %s3924_s21 }
 0x483   : > { %2874 = vmatpush.bf16.msra.mxu3 %v3256_v8 }
 0x486   : > { %v2457_v42 = vpop.f32.mrf.mxu2  ;;  %v2474_v10 = vpop.f32.mrf.mxu3 }
 0x487   : > { %v3551_v60 = vpack.i.bf16 %v2474_v10, %v2455_v50  ;;  %2875 = vmatpush.bf16.msra.mxu3 %v3255_v26 }
 0x488   : > { %v2495_v17 = vpop.f32.mrf.mxu0  ;;  %v2512_v2 = vpop.f32.mrf.mxu1 }
 0x489   : > { %3572 = vrot.lane.b32.xlu2 %v3571_v1, %s3925_s24  ;;  %3552 = vrot.lane.b32.xlu1 %v3551_v60, %s3923_s18  ;;  %v3581_v4 = vpack.i.bf16 %v2512_v2, %v2493_v57 }
 0x48b   : > { %2876 = vmatpush.bf16.msra.mxu3 %v3254_v0 }
 0x48e   : > { %v2476_v33 = vpop.f32.mrf.mxu3  ;;  %v2531_v35 = vpop.f32.mrf.mxu2 }
 0x490   : > { %v2514_v16 = vpop.f32.mrf.mxu1 }
 0x491   : > { %3567 = vrot.lane.b32.xlu1 %v3566_v41, %s3923_s18  ;;  %3582 = vrot.lane.b32.xlu2 %v3581_v4, %s3923_s18 }
 0x496   : > { %v2533_v22 = vpop.f32.mrf.mxu2 }
 0x499   : > { %3577 = vrot.lane.b32.xlu1 %v3576_v55, %s3924_s21 }
 0x4a4   : > { %v2550_v21 = vpop.f32.mrf.mxu3 }
 0x4a5   : > { %v3556_v59 = vpack.i.bf16 %v2550_v21, %v2531_v35  ;;  %v2569_v12 = vpop.f32.mrf.mxu0  ;;  %v2588_v45 = vpop.f32.mrf.mxu1 }
 0x4a6   : > { %v3586_v19 = vpack.i.bf16 %v2588_v45, %v2569_v12 }
 0x4a7   : > { %3557 = vrot.lane.b32.xlu0 %v3556_v59, %s3925_s24 }
 0x4ac   : > { %v2552_v39 = vpop.f32.mrf.mxu3 }
 0x4ad   : > { %v2571_v13 = vpop.f32.mrf.mxu0  ;;  %v2590_v29 = vpop.f32.mrf.mxu1 }
 0x4af   : > { %3587 = vrot.lane.b32.xlu0 %v3586_v19, %s3925_s24 }
 0x4b3   : > { %v3538_v48 = vpop.permute.xlu1 %3537 }
 0x4b4   : > { %v3540_v37 = vunpack.i.h.bf16 %v3538_v48  ;;  %v3539_v38 = vunpack.i.l.bf16 %v3538_v48 }
 0x4b6   : > { %v2694_v6 = vsel %vm2692_vm4, %v2689_v23, %v3540_v37  ;;  %v2693_v54 = vsel %vm2692_vm4, %v2688_v63, %v3539_v38 }
 0x4cb   : > { %v3543_v62 = vpop.permute.xlu1 %3542 }
 0x4cc   : > { %v3545_v32 = vunpack.i.h.bf16 %v3543_v62  ;;  %v3544_v61 = vunpack.i.l.bf16 %v3543_v62 }
 0x4ce   : > { %v2699_v56 = vsel %vm2697_vm5, %v2694_v6, %v3545_v32  ;;  %v2698_v9 = vsel %vm2697_vm5, %v2693_v54, %v3544_v61 }
 0x4cf   : > { %v2714_v40 = vpack.c.bf16 %v2699_v56, %v2698_v9 }
 0x4d1   : > { %2858 = vmatmul.bf16.vlgmr.msrb.gmra.mxu2 %v2714_v40 }
 0x4d3   : > { %v3548_v46 = vpop.permute.xlu2 %3547 }
 0x4d4   : > { %v3550_v58 = vunpack.i.h.bf16 %v3548_v46  ;;  %v3549_v55 = vunpack.i.l.bf16 %v3548_v46 }
 0x4d6   : > { %v2702_v34 = vsel %vm532_vm1, %v4897_v24, %v3549_v55 }
 0x4db   : > { %v3563_v3 = vpop.permute.xlu2 %3562 }
 0x4dc   : > { %v3565_v50 = vunpack.i.h.bf16 %v3563_v3  ;;  %v3564_v57 = vunpack.i.l.bf16 %v3563_v3 }
 0x4de   : > { %v2691_v17 = vsel %vm532_vm1, %v4763_v53, %v3565_v50  ;;  %v2690_v2 = vsel %vm532_vm1, %v4748_v18, %v3564_v57  ;;  %v2703_v18 = vsel %vm532_vm1, %v4901_v28, %v3550_v58 }
 0x4e3   : > { %v3573_v42 = vpop.permute.xlu2 %3572 }
 0x4e4   : > { %v3575_v33 = vunpack.i.h.bf16 %v3573_v42  ;;  %v3574_v35 = vunpack.i.l.bf16 %v3573_v42 }
 0x4eb   : > { %v3583_v28 = vpop.permute.xlu2 %3582 }
 0x4ec   : > { %v3585_v49 = vunpack.i.h.bf16 %v3583_v28  ;;  %v3584_v37 = vunpack.i.l.bf16 %v3583_v28 }
 0x4fb   : > { %v3553_v47 = vpop.permute.xlu1 %3552 }
 0x4fc   : > { %v3555_v51 = vunpack.i.h.bf16 %v3553_v47  ;;  %v3554_v27 = vunpack.i.l.bf16 %v3553_v47 }
 0x4fe   : > { %v2707_v59 = vsel %vm2692_vm4, %v2703_v18, %v3555_v51  ;;  %v2706_v12 = vsel %vm2692_vm4, %v2702_v34, %v3554_v27 }
 0x503   : > { %v3568_v10 = vpop.permute.xlu1 %3567 }
 0x504   : > { %v3570_v1 = vunpack.i.h.bf16 %v3568_v10  ;;  %v3569_v60 = vunpack.i.l.bf16 %v3568_v10 }
 0x506   : > { %v2696_v41 = vsel %vm2692_vm4, %v2691_v17, %v3570_v1  ;;  %v2695_v4 = vsel %vm2692_vm4, %v2690_v2, %v3569_v60 }
 0x507   : > { %v2700_v5 = vsel %vm2697_vm5, %v2695_v4, %v3574_v35  ;;  %v2701_v16 = vsel %vm2697_vm5, %v2696_v41, %v3575_v33 }
 0x508   : > { %v2716_v22 = vpack.c.bf16 %v2701_v16, %v2700_v5 }
 0x50a   : > { %2863 = vmatmul.bf16.gmra.mxu2 %v2716_v22 }
 0x50b   : > { %v3578_v19 = vpop.permute.xlu1 %3577 }
 0x50c   : > { %v3580_v13 = vunpack.i.h.bf16 %v3578_v19  ;;  %v3579_v29 = vunpack.i.l.bf16 %v3578_v19 }
 0x50e   : > { %v2705_v24 = vsel %vm532_vm1, %v4899_v7, %v3580_v13  ;;  %v2704_v48 = vsel %vm532_vm1, %v4894_v20, %v3579_v29  ;;  %v3592_v7 = vld [vmem:[%s5045_s8] ss:$0 sm:$0xff] }
 0x50f   : > { %v2708_v38 = vsel %vm2692_vm4, %v2704_v48, %v3584_v37  ;;  %v2709_v62 = vsel %vm2692_vm4, %v2705_v24, %v3585_v49 }
 0x519   : > { %v3558_v53 = vpop.permute.xlu0 %3557 }
 0x51a   : > { %v3560_v21 = vunpack.i.h.bf16 %v3558_v53  ;;  %v3559_v36 = vunpack.i.l.bf16 %v3558_v53 }
 0x51c   : > { %v2711_v45 = vsel %vm2697_vm5, %v2707_v59, %v3560_v21  ;;  %v2710_v44 = vsel %vm2697_vm5, %v2706_v12, %v3559_v36 }
 0x51d   : > { %v2715_v39 = vpack.c.bf16 %v2711_v45, %v2710_v44 }
 0x51f   : > { %2877 = vmatmul.bf16.vlgmr.msra.gmra.mxu3 %v2715_v39 }
 0x521   : > { %v3588_v11 = vpop.permute.xlu0 %3587 }
 0x522   : > { %v3590_v25 = vunpack.i.h.bf16 %v3588_v11  ;;  %v3589_v15 = vunpack.i.l.bf16 %v3588_v11 }
 0x524   : > { %v2712_v23 = vsel %vm2697_vm5, %v2708_v38, %v3589_v15  ;;  %v2713_v63 = vsel %vm2697_vm5, %v2709_v62, %v3590_v25 }
 0x525   : > { %v2717_v32 = vpack.c.bf16 %v2713_v63, %v2712_v23 }
 0x52f   : > { %2882 = vmatmul.bf16.gmra.mxu3 %v2717_v32 }
 0x554   : > { %v2859_v61 = vpop.f32.mrf.mxu2 }
 0x555   : > { %v2860_v20 = vadd.f32 %v3592_v7, %v2859_v61 }
 0x55c   : > { %v2861_v56 = vpop.f32.mrf.mxu2 }
 0x55d   : > { %v2862_v9 = vadd.f32 %v3592_v7, %v2861_v56 }
 0x58d   : > { %v2864_v14 = vpop.f32.mrf.mxu2 }
 0x58e   : > { %v2865_v31 = vadd.f32 %v3592_v7, %v2864_v14 }
 0x595   : > { %v2866_v52 = vpop.f32.mrf.mxu2 }
 0x596   : > { %v2867_v8 = vadd.f32 %v3592_v7, %v2866_v52 }
 0x5a2   : > { %v2878_v6 = vpop.f32.mrf.mxu3 }
 0x5a3   : > { %v2879_v54 = vadd.f32 %v2878_v6, %v2860_v20 }
 0x5aa   : > { %v2880_v40 = vpop.f32.mrf.mxu3 }
 0x5ab   : > { %v2881_v30 = vadd.f32 %v2880_v40, %v2862_v9 }
 0x5ad   : > { %2889 = vrot.lane.b32.xlu1 %v2881_v30, %s3924_s21  ;;  %s387_s21 = scalar_lea.vmem [#allocation10], %s3032_s28 }
 0x5ae   : > { %s2917_s11 = sshll.u32 %s387_s21, 4  ;;  %s2918_s11 = int_to_ptr.vmem [resolvable:$true] %s2917_s11 }
 0x5b2   : > { %v2883_v46 = vpop.f32.mrf.mxu3 }
 0x5b3   : > { %v2884_v43 = vadd.f32 %v2883_v46, %v2865_v31 }
 0x5b5   : > { %2893 = vrot.lane.b32.xlu2 %v2884_v43, %s3923_s18  ;;  %s2919_s18 = sshll.u32 %s2915_s2, 4  ;;  %s2920_s18 = int_to_ptr.hbm [resolvable:$true] %s2919_s18 }
 0x5ba   : > { %v2885_v3 = vpop.f32.mrf.mxu3 }
 0x5bb   : > { %v2886_v26 = vadd.f32 %v2885_v3, %v2867_v8 }
 0x5bd   : > { %2897 = vrot.lane.b32.xlu0 %v2886_v26, %s3925_s24  ;;  %s3855_s24 = sshra.s32 %s2920_s18, 4  ;;  %s3856_s24 = int_to_ptr.hbm [resolvable:$true] %s3855_s24 }
 0x5be   : > { %s3857_s15 = scalar_lea.hbm %s3856_s24, 8  ;;  %p3862_p3 = scmp.lt.s32.totalorder %s3856_s24, %s5046_s9 }
 0x5bf   : > { %p3858_p0 = scmp.ne.s32.totalorder %s3856_s24, %s3857_s15  ;;  %p3863_p4 = scmp.lt.s32.totalorder %s3861_s14, %s3857_s15 }
 0x5c1   : > { %p3859_p1 = pnand %p3858_p0, %p4014_p5  ;;  %p3864_p7 = por %p3863_p4, %p3862_p3 }
 0x5c3   : > { %p3860_p2 = pneg %p3859_p1 }
 0x5c5   : > { %p3865_p8 = pnand %p3864_p7, %p3860_p2 }
 0x60f   : > { %v2894_v50 = vpop.permute.xlu2 %2893 }
 0x61f   : > { %v2890_v47 = vpop.permute.xlu1 %2889 }
 0x620   : > { %v2900_v0 = vsel %vm532_vm1, %v2879_v54, %v2890_v47 }
 0x621   : > { %v2901_v42 = vsel %vm2692_vm4, %v2900_v0, %v2894_v50 }
 0x62f   : > { %v2898_v57 = vpop.permute.xlu0 %2897 }
 0x630   : > { %v2902_v10 = vsel %vm2697_vm5, %v2901_v42, %v2898_v57 }
 0x631   : > { %2903 = vst [vmem:[%s387_s21] sm:$0xff] %v2902_v10 }
 0x632   : > { %3868 = shalt.err (!%p3865_p8)
}
 0x633   : > { %3282 = dma.vmem_to_hbm [thread:$0]  (%p4014_p5), %s2918_s11, 128, %s2920_s18, %s2905_s13  }
 0x634 PF: > { %p3309_p9 = scmp.ge.s32.totalorder %s3915_s12, 2  ;;  %s2931_s25 = sand.u32 1, %s3903_s30  }
 0x635   : > { %s2932_s27 = scalar_lea.sflag [#allocation4], %s2931_s25 }
 0x636   : > { %p3298_p10 = pnand %p3309_p9, %p4018_p6 }
 0x638   : > { %p3299_p11 = pneg %p3298_p10 }
 0x63a   : > { %3898 = dma.done.wait (%p3299_p11), %s2932_s27, 128  }
 0x63b   : > { %3900 = vsyncadd (%p3299_p11), %s2932_s27, 4294967168  ;;  %s5061_s12 = sld [smem:[#allocation16_spill]]  ;;  %s5064_s30 = smov %s3907_s10 }
 0x63c   : > { %s5062_s28 = sld [smem:[#allocation15_spill]] }
 0x63d   : > { %s5063_s11 = sld [smem:[#allocation17_spill]] }
 0x641   : > { %p22_p12 = scmp.ge.s32.totalorder %s5061_s12, 4  }
 0x642   : > { %s5065_s10 = smov %s5062_s28 }
 0x643   :  { %24 = sbr.rel (!%p22_p12) target bundleno = 9 (0x9), region = 108 }
 0x648   :  { %2938 = vsyncpa [#allocation3], 1 }
 0x649   :  { %2940 = vsyncpa [#allocation3 + $0x1], 1 }
 0x64a   :  { %2941 = vsyncpa [#allocation6], 1 }
 0x64b   :  { %2942 = vsyncpa [#allocation9], 1 }
 0x64c   :  { %2943 = vsyncpa [#allocation4], 1 }
 0x64d   :  { %2945 = vsyncpa [#allocation4 + $0x1], 1 }

</bundles_post_ra>
